<compile_context>
chip_gen: v5e
topology: v5e:2x2
jax: 0.10.0
libtpu: 0.0.40
codegen_flags: <defaults>
</compile_context>

<pallas_src>
import functools
import math

import jax
import jax.numpy as jnp
from jax.experimental import pallas as pl
from jax.experimental.pallas import tpu as pltpu

LN_EPS = 1e-5
NEG_INF = -1e30


def _round_up(x: int, m: int) -> int:
    return ((x + m - 1) // m) * m


# ---------------------------------------------------------------------------
# Resident-operand BlockSpec helper (single-buffer constant-index operands).
# ---------------------------------------------------------------------------
def _probe_buffered() -> bool:
    try:
        pl.BlockSpec((8, 128), lambda i: (0, 0), pipeline_mode=pl.Buffered(1))
        return True
    except Exception:
        return False


_HAS_BUFFERED1 = _probe_buffered()


def _resident_spec(block_shape, index_map):
    """BlockSpec for operands whose block index never changes across the grid."""
    if _HAS_BUFFERED1:
        return pl.BlockSpec(block_shape, index_map, pipeline_mode=pl.Buffered(1))
    return pl.BlockSpec(block_shape, index_map)


# ---------------------------------------------------------------------------
# VMEM budgeting / FFN tiling
# ---------------------------------------------------------------------------
def _vmem_budget_bytes() -> int:
    """~75% of physical VMEM: 48 MiB on v7x (64 MiB), 96 MiB on v5e/v6e (128 MiB)."""
    phys = 128 * 1024 * 1024
    try:
        info = pltpu.get_tpu_info()
        phys = int(getattr(info, "vmem_capacity_bytes", phys)) or phys
    except Exception:
        pass
    return (phys * 3) // 4


def _choose_ffn_tiling(M: int, dim_p: int, hidden_p: int, budget: int):
    """Pick (TM, HC): largest token tile first, then the fewest hidden chunks,
    that fit the VMEM budget (weights counted with their real buffer count)."""
    usable = int(budget * 0.8)
    vecs = 8 * (3 * dim_p + hidden_p) * 4
    resident_bufs = 1 if _HAS_BUFFERED1 else 2
    for tm in (1024, 512, 256, 128, 64, 32, 16, 8):
        if tm > M or M % tm != 0:
            continue
        for n_chunks in (1, 2, 4, 8, 16):
            if hidden_p % (n_chunks * 128) != 0:
                continue
            hc = hidden_p // n_chunks
            w = 2 * dim_p * hc * 2                      # bf16 W1 + W2 blocks
            w_total = w * (resident_bufs if n_chunks == 1 else 2)
            act = tm * dim_p * 4 * 4                    # x/out tiles, double-buffered f32
            inter = tm * hc * 6                         # hidden intermediate f32 + bf16 copy
            acc = tm * dim_p * 4                        # accumulator scratch
            if w_total + act + inter + acc + vecs <= usable:
                return tm, hc
    return (128 if M % 128 == 0 else 8), (128 if hidden_p % 128 == 0 else hidden_p)


# ---------------------------------------------------------------------------
# Exact (erf) GELU built from guaranteed-lowering primitives.
# Abramowitz & Stegun 7.1.26 erf approximation, |error| <= 1.5e-7.
# ---------------------------------------------------------------------------
def _erf_approx(z):
    a1, a2, a3, a4, a5 = (0.254829592, -0.284496736, 1.421413741,
                          -1.453152027, 1.061405429)
    p = 0.3275911
    sgn = jnp.where(z < 0.0, -1.0, 1.0)
    za = jnp.abs(z)
    t = 1.0 / (1.0 + p * za)
    poly = ((((a5 * t + a4) * t + a3) * t + a2) * t + a1) * t
    return sgn * (1.0 - poly * jnp.exp(-za * za))


def _gelu_exact(x):
    return 0.5 * x * (1.0 + _erf_approx(x * 0.7071067811865476))


# ---------------------------------------------------------------------------
# Kernel 1: Residual(PreNorm(Attention))
# ---------------------------------------------------------------------------
def attn_block_kernel(x_ref, g_ref, b_ref, wqkv_ref, wo_ref, bo_ref, o_ref,
                      q_sc, k_sc, v_sc, cat_sc, *,
                      heads, dim_head, inner, n_true, dim_true, scale,
                      eps=LN_EPS):
    qi = pl.program_id(1)
    n_p = x_ref.shape[1]
    dim_p = x_ref.shape[2]
    tq = o_ref.shape[1]
    mask_dim = dim_p != dim_true
    mask_keys = n_p != n_true

    # ---- once per batch element: LayerNorm + one packed QKV matmul ----------
    @pl.when(qi == 0)
    def _():
        xf = x_ref[0].astype(jnp.float32)                       # (N_p, dim_p)
        inv_d = 1.0 / float(dim_true)
        mu = jnp.sum(xf, axis=-1, keepdims=True) * inv_d
        xc = xf - mu
        if mask_dim:
            lane = jax.lax.broadcasted_iota(jnp.int32, (1, dim_p), 1)
            xc = jnp.where(lane < dim_true, xc, 0.0)
        var = jnp.sum(xc * xc, axis=-1, keepdims=True) * inv_d
        xn = xc * jax.lax.rsqrt(var + eps) * g_ref[...] + b_ref[...]
        # Single lane-dense (N_p, dim) x (dim, 3*inner) MXU matmul for Q, K, V.
        qkv = jnp.dot(xn.astype(jnp.bfloat16), wqkv_ref[...],
                      preferred_element_type=jnp.float32)       # (N_p, qkv_p)
        for h in range(heads):                                  # cheap slice copies
            lo = h * dim_head
            q_sc[h] = qkv[:, lo:lo + dim_head].astype(jnp.bfloat16)
            k_sc[h] = qkv[:, inner + lo:inner + lo + dim_head].astype(jnp.bfloat16)
            v_sc[h] = qkv[:, 2 * inner + lo:2 * inner + lo + dim_head].astype(
                jnp.bfloat16)

    # ---- per query tile: batched-over-heads attention ------------------------
    row = pl.multiple_of(qi * tq, tq)
    q_t = q_sc[:, pl.ds(row, tq), :]                            # (H, TQ, dh) bf16
    s = jnp.einsum("hqd,hkd->hqk", q_t, k_sc[...],
                   preferred_element_type=jnp.float32) * scale  # (H, TQ, N_p)
    if mask_keys:
        key_lane = jax.lax.broadcasted_iota(jnp.int32, (1, 1, n_p), 2)
        s = jnp.where(key_lane < n_true, s, NEG_INF)
    m = jnp.max(s, axis=-1, keepdims=True)
    e = jnp.exp(s - m)
    denom = jnp.sum(e, axis=-1, keepdims=True)
    attn = e * pl.reciprocal(denom, approx=True)                # EUP, not VALU divide
    o_h = jnp.einsum("hqk,hkd->hqd", attn.astype(jnp.bfloat16), v_sc[...],
                     preferred_element_type=jnp.float32)        # (H, TQ, dh)
    for h in range(heads):                                      # concat heads
        cat_sc[:, h * dim_head:(h + 1) * dim_head] = o_h[h]
    # Single (TQ, inner) x (inner, dim) output projection (+bias).
    proj = jnp.dot(cat_sc[...].astype(jnp.bfloat16), wo_ref[...],
                   preferred_element_type=jnp.float32) + bo_ref[...]
    xq = x_ref[0, pl.ds(row, tq), :].astype(jnp.float32)
    o_ref[0] = (xq + proj).astype(o_ref.dtype)                  # residual add


# ---------------------------------------------------------------------------
# Kernel 2: Residual(PreNorm(FeedForward)) with hidden-chunk reduction axis.
# ---------------------------------------------------------------------------
def ffn_block_kernel(x_ref, g_ref, b_ref, w1_ref, b1_ref, w2_ref, b2_ref,
                     o_ref, acc_ref, *, dim_true, eps=LN_EPS):
    kc = pl.program_id(1)
    dim_p = x_ref.shape[1]
    mask_dim = dim_p != dim_true

    x = x_ref[...].astype(jnp.float32)                          # (TM, dim_p)
    inv_d = 1.0 / float(dim_true)
    mu = jnp.sum(x, axis=-1, keepdims=True) * inv_d
    xc = x - mu
    if mask_dim:
        lane = jax.lax.broadcasted_iota(jnp.int32, (1, dim_p), 1)
        xc = jnp.where(lane < dim_true, xc, 0.0)
    var = jnp.sum(xc * xc, axis=-1, keepdims=True) * inv_d
    xn = xc * jax.lax.rsqrt(var + eps) * g_ref[...] + b_ref[...]

    h = jnp.dot(xn.astype(jnp.bfloat16), w1_ref[...],
                preferred_element_type=jnp.float32) + b1_ref[...]
    # Exact (erf) GELU to match nn.GELU(); polynomial erf, error <= 1.5e-7.
    h = _gelu_exact(h)
    part = jnp.dot(h.astype(jnp.bfloat16), w2_ref[...],
                   preferred_element_type=jnp.float32)          # (TM, dim_p)

    @pl.when(kc == 0)
    def _():
        acc_ref[...] = x + b2_ref[...]                          # residual + bias once

    acc_ref[...] += part

    @pl.when(kc == pl.num_programs(1) - 1)
    def _():
        o_ref[...] = acc_ref[...].astype(o_ref.dtype)


# ---------------------------------------------------------------------------
# Wrappers
# ---------------------------------------------------------------------------
def attention_block(xp, ap, *, heads, dim_head, n_true, dim_true, budget):
    B, n_p, dim_p = xp.shape
    inner = heads * dim_head
    qkv_p = ap["w_qkv"].shape[1]
    tq = 256 if n_p % 256 == 0 else 128                          # v6e/v7x like 256
    tq = min(tq, n_p)
    n_q = n_p // tq

    kernel = functools.partial(
        attn_block_kernel, heads=heads, dim_head=dim_head, inner=inner,
        n_true=n_true, dim_true=dim_true, scale=dim_head ** -0.5)

    return pl.pallas_call(
        kernel,
        out_shape=jax.ShapeDtypeStruct((B, n_p, dim_p), xp.dtype),
        grid_spec=pltpu.PrefetchScalarGridSpec(
            num_scalar_prefetch=0,
            grid=(B, n_q),
            in_specs=[
                pl.BlockSpec((1, n_p, dim_p), lambda b, q: (b, 0, 0)),   # x (full seq)
                _resident_spec((1, dim_p), lambda b, q: (0, 0)),         # ln gamma
                _resident_spec((1, dim_p), lambda b, q: (0, 0)),         # ln beta
                _resident_spec((dim_p, qkv_p), lambda b, q: (0, 0)),     # W_qkv (bf16)
                _resident_spec((inner, dim_p), lambda b, q: (0, 0)),     # W_out (bf16)
                _resident_spec((1, dim_p), lambda b, q: (0, 0)),         # b_out
            ],
            out_specs=pl.BlockSpec((1, tq, dim_p), lambda b, q: (b, q, 0)),
            scratch_shapes=[
                pltpu.VMEM((heads, n_p, dim_head), jnp.bfloat16),        # q per head
                pltpu.VMEM((heads, n_p, dim_head), jnp.bfloat16),        # k per head
                pltpu.VMEM((heads, n_p, dim_head), jnp.bfloat16),        # v per head
                pltpu.VMEM((tq, inner), jnp.float32),                    # concat heads
            ],
        ),
        compiler_params=pltpu.CompilerParams(
            dimension_semantics=("parallel", "arbitrary"),
            vmem_limit_bytes=budget),
    )(xp, ap["ln_g"], ap["ln_b"], ap["w_qkv"], ap["w_out"], ap["b_out"])


def ffn_block(xp, fp, *, dim_true, budget):
    B, n_p, dim_p = xp.shape
    hidden_p = fp["w1"].shape[1]
    M = B * n_p
    TM, HC = _choose_ffn_tiling(M, dim_p, hidden_p, budget)
    n_chunks = hidden_p // HC
    x2 = xp.reshape(M, dim_p)                                    # free (leading-dim merge)

    wspec = _resident_spec if n_chunks == 1 else pl.BlockSpec
    kernel = functools.partial(ffn_block_kernel, dim_true=dim_true)

    out = pl.pallas_call(
        kernel,
        out_shape=jax.ShapeDtypeStruct((M, dim_p), xp.dtype),
        grid_spec=pltpu.PrefetchScalarGridSpec(
            num_scalar_prefetch=0,
            grid=(M // TM, n_chunks),
            in_specs=[
                pl.BlockSpec((TM, dim_p), lambda i, k: (i, 0)),          # x tile
                _resident_spec((1, dim_p), lambda i, k: (0, 0)),         # ln gamma
                _resident_spec((1, dim_p), lambda i, k: (0, 0)),         # ln beta
                wspec((dim_p, HC), lambda i, k: (0, k)),                 # W1 chunk (bf16)
                wspec((1, HC), lambda i, k: (0, k)),                     # b1 chunk
                wspec((HC, dim_p), lambda i, k: (k, 0)),                 # W2 chunk (bf16)
                _resident_spec((1, dim_p), lambda i, k: (0, 0)),         # b2
            ],
            out_specs=pl.BlockSpec((TM, dim_p), lambda i, k: (i, 0)),
            scratch_shapes=[pltpu.VMEM((TM, dim_p), jnp.float32)],       # accumulator
        ),
        compiler_params=pltpu.CompilerParams(
            dimension_semantics=("parallel", "arbitrary"),
            vmem_limit_bytes=budget),
    )(x2, fp["ln_g"], fp["ln_b"], fp["w1"], fp["b1"], fp["w2"], fp["b2"])
    return out.reshape(B, n_p, dim_p)


# ---------------------------------------------------------------------------
# One-time parameter preparation (hoisted out of the per-layer kernel calls)
# ---------------------------------------------------------------------------
def _prepare_attn(p, dim, heads, dim_head, dim_p):
    inner = heads * dim_head
    qkv_p = _round_up(3 * inner, 128)
    pad_d = dim_p - dim
    return dict(
        ln_g=jnp.pad(p["ln_g"].astype(jnp.float32), (0, pad_d)).reshape(1, dim_p),
        ln_b=jnp.pad(p["ln_b"].astype(jnp.float32), (0, pad_d)).reshape(1, dim_p),
        w_qkv=jnp.pad(p["w_qkv"].astype(jnp.float32),
                      ((0, pad_d), (0, qkv_p - 3 * inner))).astype(jnp.bfloat16),
        w_out=jnp.pad(p["w_out"].astype(jnp.float32),
                      ((0, 0), (0, pad_d))).astype(jnp.bfloat16),
        b_out=jnp.pad(p["b_out"].astype(jnp.float32), (0, pad_d)).reshape(1, dim_p),
    )


def _prepare_ffn(p, dim, dim_p):
    hidden = p["w1"].shape[1]
    hidden_p = _round_up(hidden, 128)
    pad_d, pad_h = dim_p - dim, hidden_p - hidden
    return dict(
        ln_g=jnp.pad(p["ln_g"].astype(jnp.float32), (0, pad_d)).reshape(1, dim_p),
        ln_b=jnp.pad(p["ln_b"].astype(jnp.float32), (0, pad_d)).reshape(1, dim_p),
        w1=jnp.pad(p["w1"].astype(jnp.float32),
                   ((0, pad_d), (0, pad_h))).astype(jnp.bfloat16),
        b1=jnp.pad(p["b1"].astype(jnp.float32), (0, pad_h)).reshape(1, hidden_p),
        w2=jnp.pad(p["w2"].astype(jnp.float32),
                   ((0, pad_h), (0, pad_d))).astype(jnp.bfloat16),
        b2=jnp.pad(p["b2"].astype(jnp.float32), (0, pad_d)).reshape(1, dim_p),
    )


def prepare_transformer(params, dim, heads, dim_head):
    """Pad to lane-dense widths and cast matmul weights to bf16, once."""
    # TODO(synk): when heads == 1 and dim_head == dim the PyTorch to_out is
    # nn.Identity(); pass an identity w_out / zero b_out in that configuration.
    dim_p = _round_up(dim, 128)
    return [dict(attn=_prepare_attn(l["attn"], dim, heads, dim_head, dim_p),
                 ffn=_prepare_ffn(l["ffn"], dim, dim_p)) for l in params]


def transformer_forward_prepared(x, prepared, heads, dim_head):
    B, N, dim = x.shape
    n_p = _round_up(N, 128)
    dim_p = _round_up(dim, 128)
    budget = _vmem_budget_bytes()
    # Pad the activation once for the whole stack (zero padding); padded key
    # rows are masked inside the attention softmax, padded feature lanes stay
    # zero because all weights/biases are zero-padded.
    xp = jnp.pad(x, ((0, 0), (0, n_p - N), (0, dim_p - dim)))
    for layer in prepared:
        xp = attention_block(xp, layer["attn"], heads=heads, dim_head=dim_head,
                             n_true=N, dim_true=dim, budget=budget)
        xp = ffn_block(xp, layer["ffn"], dim_true=dim, budget=budget)
    return xp[:, :N, :dim]


def transformer_forward(x, params, heads, dim_head, mask=None):
    # TODO(synk): the optional boolean attention-mask path (F.pad + masked_fill)
    # is not implemented; Transformer.forward is exercised with its default mask=None.
    assert mask is None
    prepared = prepare_transformer(params, x.shape[-1], heads, dim_head)
    return transformer_forward_prepared(x, prepared, heads, dim_head)


# ---------------------------------------------------------------------------
# Pure-JAX fp32 reference (matches the PyTorch module math)
# ---------------------------------------------------------------------------
def _layernorm_ref(x, gamma, beta, eps=LN_EPS):
    mu = jnp.mean(x, axis=-1, keepdims=True)
    var = jnp.mean((x - mu) ** 2, axis=-1, keepdims=True)
    return (x - mu) / jnp.sqrt(var + eps) * gamma + beta


def _attention_ref(x, p, heads, dim_head):
    B, N, _ = x.shape
    hp = jax.lax.Precision.HIGHEST
    xn = _layernorm_ref(x, p["ln_g"], p["ln_b"])
    qkv = jnp.einsum("bnd,de->bne", xn, p["w_qkv"], precision=hp)
    q, k, v = jnp.split(qkv, 3, axis=-1)

    def split_heads(t):
        return t.reshape(B, N, heads, dim_head).transpose(0, 2, 1, 3)

    q, k, v = map(split_heads, (q, k, v))
    dots = jnp.einsum("bhid,bhjd->bhij", q, k, precision=hp) * (dim_head ** -0.5)
    attn = jax.nn.softmax(dots, axis=-1)
    out = jnp.einsum("bhij,bhjd->bhid", attn, v, precision=hp)
    out = out.transpose(0, 2, 1, 3).reshape(B, N, heads * dim_head)
    out = jnp.einsum("bne,ed->bnd", out, p["w_out"], precision=hp) + p["b_out"]
    return x + out


def _ffn_ref(x, p):
    hp = jax.lax.Precision.HIGHEST
    xn = _layernorm_ref(x, p["ln_g"], p["ln_b"])
    h = jnp.einsum("bnd,dh->bnh", xn, p["w1"], precision=hp) + p["b1"]
    h = jax.nn.gelu(h, approximate=False)
    out = jnp.einsum("bnh,hd->bnd", h, p["w2"], precision=hp) + p["b2"]
    return x + out


def transformer_reference(x, params, heads, dim_head):
    for layer in params:
        x = _attention_ref(x, layer["attn"], heads, dim_head)
        x = _ffn_ref(x, layer["ffn"])
    return x


# ---------------------------------------------------------------------------
# Parameter init (mimics nn.Linear's U(-1/sqrt(in), 1/sqrt(in)); LN near 1/0)
# ---------------------------------------------------------------------------
def init_params(key, depth, dim, heads, dim_head, mlp_dim):
    inner = heads * dim_head
    lim_in = 1.0 / math.sqrt(dim)
    lim_inner = 1.0 / math.sqrt(inner)
    lim_hid = 1.0 / math.sqrt(mlp_dim)
    params = []
    for _ in range(depth):
        key, sub = jax.random.split(key)
        ks = jax.random.split(sub, 11)
        attn = dict(
            ln_g=1.0 + 0.1 * jax.random.normal(ks[0], (dim,), jnp.float32),
            ln_b=0.1 * jax.random.normal(ks[1], (dim,), jnp.float32),
            w_qkv=jax.random.uniform(ks[2], (dim, 3 * inner), jnp.float32, -lim_in, lim_in),
            w_out=jax.random.uniform(ks[3], (inner, dim), jnp.float32, -lim_inner, lim_inner),
            b_out=jax.random.uniform(ks[4], (dim,), jnp.float32, -lim_inner, lim_inner),
        )
        ffn = dict(
            ln_g=1.0 + 0.1 * jax.random.normal(ks[5], (dim,), jnp.float32),
            ln_b=0.1 * jax.random.normal(ks[6], (dim,), jnp.float32),
            w1=jax.random.uniform(ks[7], (dim, mlp_dim), jnp.float32, -lim_in, lim_in),
            b1=jax.random.uniform(ks[8], (mlp_dim,), jnp.float32, -lim_in, lim_in),
            w2=jax.random.uniform(ks[9], (mlp_dim, dim), jnp.float32, -lim_hid, lim_hid),
            b2=jax.random.uniform(ks[10], (dim,), jnp.float32, -lim_hid, lim_hid),
        )
        params.append({"attn": attn, "ffn": ffn})
    return params


if __name__ == "__main__":
    # Small, module-consistent config: Transformer(dim=32, depth=2, heads=2,
    # dim_head=16, mlp_dim=64) on x of shape (batch=2, seq=8, dim=32).
    B, N = 2, 8
    dim, depth, heads, dim_head, mlp_dim = 32, 2, 2, 16, 64

    key = jax.random.PRNGKey(0)
    key, xk = jax.random.split(key)
    x = jax.random.normal(xk, (B, N, dim), dtype=jnp.float32)
    params = init_params(key, depth, dim, heads, dim_head, mlp_dim)

    prepared = prepare_transformer(params, dim, heads, dim_head)   # hoisted, once
    out = transformer_forward_prepared(x, prepared, heads, dim_head)
    out = jax.block_until_ready(out)

    ref = transformer_reference(x, params, heads, dim_head)
    assert out.shape == (B, N, dim)
    # bf16 MXU operands with f32 accumulation (plus approx softmax reciprocal)
    # vs the fp32 reference -> compare with a relaxed tolerance.
    max_err = float(jnp.max(jnp.abs(out - ref)))
    assert jnp.allclose(out, ref, atol=1e-1, rtol=1e-1), (
        f"mismatch vs reference (max abs err {max_err})")

    print("KERNEL_OK")
</pallas_src>

<mosaic_0001>
module attributes {stable_mosaic.version = 11 : i64} {
  func.func @attn_block_kernel(%arg0: i32, %arg1: i32, %arg2: memref<1x128x128xf32, #tpu.memory_space<vmem>>, %arg3: memref<1x128xf32, #tpu.memory_space<vmem>>, %arg4: memref<1x128xf32, #tpu.memory_space<vmem>>, %arg5: memref<128x128xbf16, #tpu.memory_space<vmem>>, %arg6: memref<32x128xbf16, #tpu.memory_space<vmem>>, %arg7: memref<1x128xf32, #tpu.memory_space<vmem>>, %arg8: memref<1x128x128xf32, #tpu.memory_space<vmem>>, %arg9: memref<2x128x16xbf16, #tpu.memory_space<vmem>>, %arg10: memref<2x128x16xbf16, #tpu.memory_space<vmem>>, %arg11: memref<2x128x16xbf16, #tpu.memory_space<vmem>>, %arg12: memref<128x32xf32, #tpu.memory_space<vmem>>) attributes {dimension_semantics = [#tpu.dimension_semantics<parallel>, #tpu.dimension_semantics<arbitrary>], iteration_bounds = array<i64: 2, 1>, scalar_prefetch = 0 : i64, scratch_operands = 4 : i64, tpu.core_type = #tpu.core_type<tc>, window_params = [{transform_indices = @transform_0, window_bounds = array<i64: 1, 128, 128>}, {pipeline_mode = #tpu.pipeline_mode<synchronous>, transform_indices = @transform_1, window_bounds = array<i64: 1, 128>}, {pipeline_mode = #tpu.pipeline_mode<synchronous>, transform_indices = @transform_2, window_bounds = array<i64: 1, 128>}, {pipeline_mode = #tpu.pipeline_mode<synchronous>, transform_indices = @transform_3, window_bounds = array<i64: 128, 128>}, {pipeline_mode = #tpu.pipeline_mode<synchronous>, transform_indices = @transform_4, window_bounds = array<i64: 32, 128>}, {pipeline_mode = #tpu.pipeline_mode<synchronous>, transform_indices = @transform_5, window_bounds = array<i64: 1, 128>}, {transform_indices = @transform_6, window_bounds = array<i64: 1, 128, 128>}]} {
    %c0_i32 = arith.constant 0 : i32
    %0 = arith.cmpi eq, %arg1, %c0_i32 : i32
    %1 = arith.extui %0 : i1 to i32
    %c0_i32_0 = arith.constant 0 : i32
    %2 = arith.cmpi ne, %1, %c0_i32_0 : i32
    scf.if %2 {
      %c0_28 = arith.constant 0 : index
      %c0_29 = arith.constant 0 : index
      %c0_30 = arith.constant 0 : index
      %51 = vector.load %arg2[%c0_28, %c0_29, %c0_30] : memref<1x128x128xf32, #tpu.memory_space<vmem>>, vector<1x128x128xf32>
      %52 = vector.shape_cast %51 : vector<1x128x128xf32> to vector<128x128xf32>
      %cst_31 = arith.constant dense<0.000000e+00> : vector<128xf32>
      %53 = vector.multi_reduction <add>, %52, %cst_31 [1] : vector<128x128xf32> to vector<128xf32>
      %54 = vector.shape_cast %53 : vector<128xf32> to vector<128x1xf32>
      %cst_32 = arith.constant 3.125000e-02 : f32
      %55 = vector.broadcast %cst_32 : f32 to vector<128x1xf32>
      %56 = arith.mulf %54, %55 : vector<128x1xf32>
      %57 = vector.broadcast %56 : vector<128x1xf32> to vector<128x128xf32>
      %58 = arith.subf %52, %57 : vector<128x128xf32>
      %59 = tpu.iota {dimensions = array<i32: 1>} : vector<1x128xi32>
      %c32_i32 = arith.constant 32 : i32
      %60 = vector.broadcast %c32_i32 : i32 to vector<1x128xi32>
      %61 = arith.cmpi slt, %59, %60 : vector<1x128xi32>
      %cst_33 = arith.constant 0.000000e+00 : f32
      %62 = vector.shape_cast %61 : vector<1x128xi1> to vector<1x128xi1>
      %63 = vector.broadcast %62 : vector<1x128xi1> to vector<128x128xi1>
      %64 = vector.broadcast %cst_33 : f32 to vector<128x128xf32>
      %65 = arith.select %63, %58, %64 : vector<128x128xi1>, vector<128x128xf32>
      %66 = arith.mulf %65, %65 : vector<128x128xf32>
      %cst_34 = arith.constant dense<0.000000e+00> : vector<128xf32>
      %67 = vector.multi_reduction <add>, %66, %cst_34 [1] : vector<128x128xf32> to vector<128xf32>
      %68 = vector.shape_cast %67 : vector<128xf32> to vector<128x1xf32>
      %cst_35 = arith.constant 3.125000e-02 : f32
      %69 = vector.broadcast %cst_35 : f32 to vector<128x1xf32>
      %70 = arith.mulf %68, %69 : vector<128x1xf32>
      %cst_36 = arith.constant 9.99999974E-6 : f32
      %71 = vector.broadcast %cst_36 : f32 to vector<128x1xf32>
      %72 = arith.addf %70, %71 : vector<128x1xf32>
      %73 = math.rsqrt %72 : vector<128x1xf32>
      %74 = vector.broadcast %73 : vector<128x1xf32> to vector<128x128xf32>
      %75 = arith.mulf %65, %74 : vector<128x128xf32>
      %c0_37 = arith.constant 0 : index
      %c0_38 = arith.constant 0 : index
      %76 = vector.load %arg3[%c0_37, %c0_38] : memref<1x128xf32, #tpu.memory_space<vmem>>, vector<1x128xf32>
      %77 = vector.broadcast %76 : vector<1x128xf32> to vector<128x128xf32>
      %78 = arith.mulf %75, %77 : vector<128x128xf32>
      %c0_39 = arith.constant 0 : index
      %c0_40 = arith.constant 0 : index
      %79 = vector.load %arg4[%c0_39, %c0_40] : memref<1x128xf32, #tpu.memory_space<vmem>>, vector<1x128xf32>
      %80 = vector.broadcast %79 : vector<1x128xf32> to vector<128x128xf32>
      %81 = arith.addf %78, %80 : vector<128x128xf32>
      %82 = arith.truncf %81 : vector<128x128xf32> to vector<128x128xbf16>
      %c0_41 = arith.constant 0 : index
      %c0_42 = arith.constant 0 : index
      %83 = vector.load %arg5[%c0_41, %c0_42] : memref<128x128xbf16, #tpu.memory_space<vmem>>, vector<128x128xbf16>
      %cst_43 = arith.constant dense<0.000000e+00> : vector<128x128xf32>
      %84 = tpu.matmul %82, %83, %cst_43 {dimension_numbers = #tpu.dot_dimension_numbers<[1], [0], [0], [1], [0, 0, 1, 1], [], []>} : vector<128x128xbf16>, vector<128x128xbf16>, vector<128x128xf32> -> vector<128x128xf32>
      %85 = vector.extract_strided_slice %84 {offsets = [0, 0], sizes = [128, 16], strides = [1, 1]} : vector<128x128xf32> to vector<128x16xf32>
      %86 = arith.truncf %85 : vector<128x16xf32> to vector<128x16xbf16>
      %c0_44 = arith.constant 0 : index
      %c0_45 = arith.constant 0 : index
      %c0_46 = arith.constant 0 : index
      %87 = vector.load %arg9[%c0_44, %c0_45, %c0_46] : memref<2x128x16xbf16, #tpu.memory_space<vmem>>, vector<1x128x16xbf16>
      %88 = vector.shape_cast %87 : vector<1x128x16xbf16> to vector<128x16xbf16>
      %89 = vector.shape_cast %86 : vector<128x16xbf16> to vector<1x128x16xbf16>
      tpu.vector_store %arg9[%c0_44, %c0_45, %c0_46], %89 {strides = array<i32>} : memref<2x128x16xbf16, #tpu.memory_space<vmem>>, vector<1x128x16xbf16>,
      %90 = vector.extract_strided_slice %84 {offsets = [0, 32], sizes = [128, 16], strides = [1, 1]} : vector<128x128xf32> to vector<128x16xf32>
      %91 = arith.truncf %90 : vector<128x16xf32> to vector<128x16xbf16>
      %c0_47 = arith.constant 0 : index
      %c0_48 = arith.constant 0 : index
      %c0_49 = arith.constant 0 : index
      %92 = vector.load %arg10[%c0_47, %c0_48, %c0_49] : memref<2x128x16xbf16, #tpu.memory_space<vmem>>, vector<1x128x16xbf16>
      %93 = vector.shape_cast %92 : vector<1x128x16xbf16> to vector<128x16xbf16>
      %94 = vector.shape_cast %91 : vector<128x16xbf16> to vector<1x128x16xbf16>
      tpu.vector_store %arg10[%c0_47, %c0_48, %c0_49], %94 {strides = array<i32>} : memref<2x128x16xbf16, #tpu.memory_space<vmem>>, vector<1x128x16xbf16>,
      %95 = vector.extract_strided_slice %84 {offsets = [0, 64], sizes = [128, 16], strides = [1, 1]} : vector<128x128xf32> to vector<128x16xf32>
      %96 = arith.truncf %95 : vector<128x16xf32> to vector<128x16xbf16>
      %c0_50 = arith.constant 0 : index
      %c0_51 = arith.constant 0 : index
      %c0_52 = arith.constant 0 : index
      %97 = vector.load %arg11[%c0_50, %c0_51, %c0_52] : memref<2x128x16xbf16, #tpu.memory_space<vmem>>, vector<1x128x16xbf16>
      %98 = vector.shape_cast %97 : vector<1x128x16xbf16> to vector<128x16xbf16>
      %99 = vector.shape_cast %96 : vector<128x16xbf16> to vector<1x128x16xbf16>
      tpu.vector_store %arg11[%c0_50, %c0_51, %c0_52], %99 {strides = array<i32>} : memref<2x128x16xbf16, #tpu.memory_space<vmem>>, vector<1x128x16xbf16>,
      %100 = vector.extract_strided_slice %84 {offsets = [0, 16], sizes = [128, 16], strides = [1, 1]} : vector<128x128xf32> to vector<128x16xf32>
      %101 = arith.truncf %100 : vector<128x16xf32> to vector<128x16xbf16>
      %c1 = arith.constant 1 : index
      %c0_53 = arith.constant 0 : index
      %c0_54 = arith.constant 0 : index
      %102 = vector.load %arg9[%c1, %c0_53, %c0_54] : memref<2x128x16xbf16, #tpu.memory_space<vmem>>, vector<1x128x16xbf16>
      %103 = vector.shape_cast %102 : vector<1x128x16xbf16> to vector<128x16xbf16>
      %104 = vector.shape_cast %101 : vector<128x16xbf16> to vector<1x128x16xbf16>
      tpu.vector_store %arg9[%c1, %c0_53, %c0_54], %104 {strides = array<i32>} : memref<2x128x16xbf16, #tpu.memory_space<vmem>>, vector<1x128x16xbf16>,
      %105 = vector.extract_strided_slice %84 {offsets = [0, 48], sizes = [128, 16], strides = [1, 1]} : vector<128x128xf32> to vector<128x16xf32>
      %106 = arith.truncf %105 : vector<128x16xf32> to vector<128x16xbf16>
      %c1_55 = arith.constant 1 : index
      %c0_56 = arith.constant 0 : index
      %c0_57 = arith.constant 0 : index
      %107 = vector.load %arg10[%c1_55, %c0_56, %c0_57] : memref<2x128x16xbf16, #tpu.memory_space<vmem>>, vector<1x128x16xbf16>
      %108 = vector.shape_cast %107 : vector<1x128x16xbf16> to vector<128x16xbf16>
      %109 = vector.shape_cast %106 : vector<128x16xbf16> to vector<1x128x16xbf16>
      tpu.vector_store %arg10[%c1_55, %c0_56, %c0_57], %109 {strides = array<i32>} : memref<2x128x16xbf16, #tpu.memory_space<vmem>>, vector<1x128x16xbf16>,
      %110 = vector.extract_strided_slice %84 {offsets = [0, 80], sizes = [128, 16], strides = [1, 1]} : vector<128x128xf32> to vector<128x16xf32>
      %111 = arith.truncf %110 : vector<128x16xf32> to vector<128x16xbf16>
      %c1_58 = arith.constant 1 : index
      %c0_59 = arith.constant 0 : index
      %c0_60 = arith.constant 0 : index
      %112 = vector.load %arg11[%c1_58, %c0_59, %c0_60] : memref<2x128x16xbf16, #tpu.memory_space<vmem>>, vector<1x128x16xbf16>
      %113 = vector.shape_cast %112 : vector<1x128x16xbf16> to vector<128x16xbf16>
      %114 = vector.shape_cast %111 : vector<128x16xbf16> to vector<1x128x16xbf16>
      tpu.vector_store %arg11[%c1_58, %c0_59, %c0_60], %114 {strides = array<i32>} : memref<2x128x16xbf16, #tpu.memory_space<vmem>>, vector<1x128x16xbf16>,
    } else {
    }
    %c128_i32 = arith.constant 128 : i32
    %3 = arith.muli %arg1, %c128_i32 : i32
    %4 = tpu.assume_multiple %3, 128 : i32
    %c0 = arith.constant 0 : index
    %5 = arith.index_cast %4 : i32 to index
    %c0_1 = arith.constant 0 : index
    %6 = vector.load %arg9[%c0, %5, %c0_1] : memref<2x128x16xbf16, #tpu.memory_space<vmem>>, vector<2x128x16xbf16>
    %c0_2 = arith.constant 0 : index
    %c0_3 = arith.constant 0 : index
    %c0_4 = arith.constant 0 : index
    %7 = vector.load %arg10[%c0_2, %c0_3, %c0_4] : memref<2x128x16xbf16, #tpu.memory_space<vmem>>, vector<2x128x16xbf16>
    "tpu.trace_start"() <{level = 10 : i32, message = "hqd,hkd->hqk"}> : () -> ()
    %cst = arith.constant dense<0.000000e+00> : vector<2x128x128xf32>
    %8 = tpu.matmul %6, %7, %cst {dimension_numbers = #tpu.dot_dimension_numbers<[2], [2], [1], [1], [0, 0, 0, 1, 1, 1], [0], [0]>} : vector<2x128x16xbf16>, vector<2x128x16xbf16>, vector<2x128x128xf32> -> vector<2x128x128xf32>
    "tpu.trace_stop"() : () -> ()
    %cst_5 = arith.constant 2.500000e-01 : f32
    %9 = vector.broadcast %cst_5 : f32 to vector<2x128x128xf32>
    %10 = arith.mulf %8, %9 : vector<2x128x128xf32>
    %11 = tpu.iota {dimensions = array<i32: 2>} : vector<1x1x128xi32>
    %c8_i32 = arith.constant 8 : i32
    %12 = vector.broadcast %c8_i32 : i32 to vector<1x1x128xi32>
    %13 = arith.cmpi slt, %11, %12 : vector<1x1x128xi32>
    %cst_6 = arith.constant -1.000000e+30 : f32
    %14 = vector.shape_cast %13 : vector<1x1x128xi1> to vector<1x1x128xi1>
    %15 = vector.broadcast %14 : vector<1x1x128xi1> to vector<2x128x128xi1>
    %16 = vector.broadcast %cst_6 : f32 to vector<2x128x128xf32>
    %17 = arith.select %15, %10, %16 : vector<2x128x128xi1>, vector<2x128x128xf32>
    %cst_7 = arith.constant dense<0xFF800000> : vector<2x128xf32>
    %18 = vector.multi_reduction <maximumf>, %17, %cst_7 [2] : vector<2x128x128xf32> to vector<2x128xf32>
    %19 = vector.shape_cast %18 : vector<2x128xf32> to vector<2x128x1xf32>
    %20 = vector.broadcast %19 : vector<2x128x1xf32> to vector<2x128x128xf32>
    %21 = arith.subf %17, %20 : vector<2x128x128xf32>
    %22 = math.exp %21 : vector<2x128x128xf32>
    %cst_8 = arith.constant dense<0.000000e+00> : vector<2x128xf32>
    %23 = vector.multi_reduction <add>, %22, %cst_8 [2] : vector<2x128x128xf32> to vector<2x128xf32>
    %24 = vector.shape_cast %23 : vector<2x128xf32> to vector<2x128x1xf32>
    %25 = tpu.reciprocal %24 {approx = true} : vector<2x128x1xf32> -> vector<2x128x1xf32>
    %26 = vector.broadcast %25 : vector<2x128x1xf32> to vector<2x128x128xf32>
    %27 = arith.mulf %22, %26 : vector<2x128x128xf32>
    %28 = arith.truncf %27 : vector<2x128x128xf32> to vector<2x128x128xbf16>
    %c0_9 = arith.constant 0 : index
    %c0_10 = arith.constant 0 : index
    %c0_11 = arith.constant 0 : index
    %29 = vector.load %arg11[%c0_9, %c0_10, %c0_11] : memref<2x128x16xbf16, #tpu.memory_space<vmem>>, vector<2x128x16xbf16>
    "tpu.trace_start"() <{level = 10 : i32, message = "hqk,hkd->hqd"}> : () -> ()
    %cst_12 = arith.constant dense<0.000000e+00> : vector<2x128x16xf32>
    %30 = tpu.matmul %28, %29, %cst_12 {dimension_numbers = #tpu.dot_dimension_numbers<[2], [1], [1], [2], [0, 0, 0, 1, 1, 2], [0], [0]>} : vector<2x128x128xbf16>, vector<2x128x16xbf16>, vector<2x128x16xf32> -> vector<2x128x16xf32>
    "tpu.trace_stop"() : () -> ()
    %31 = vector.extract_strided_slice %30 {offsets = [0, 0, 0], sizes = [1, 128, 16], strides = [1, 1, 1]} : vector<2x128x16xf32> to vector<1x128x16xf32>
    %32 = vector.shape_cast %31 : vector<1x128x16xf32> to vector<128x16xf32>
    %c0_13 = arith.constant 0 : index
    %c0_14 = arith.constant 0 : index
    %33 = vector.load %arg12[%c0_13, %c0_14] : memref<128x32xf32, #tpu.memory_space<vmem>>, vector<128x16xf32>
    tpu.vector_store %arg12[%c0_13, %c0_14], %32 {strides = array<i32>} : memref<128x32xf32, #tpu.memory_space<vmem>>, vector<128x16xf32>,
    %34 = vector.extract_strided_slice %30 {offsets = [1, 0, 0], sizes = [1, 128, 16], strides = [1, 1, 1]} : vector<2x128x16xf32> to vector<1x128x16xf32>
    %35 = vector.shape_cast %34 : vector<1x128x16xf32> to vector<128x16xf32>
    %c0_15 = arith.constant 0 : index
    %c16 = arith.constant 16 : index
    %36 = vector.load %arg12[%c0_15, %c16] : memref<128x32xf32, #tpu.memory_space<vmem>>, vector<128x16xf32>
    tpu.vector_store %arg12[%c0_15, %c16], %35 {strides = array<i32>} : memref<128x32xf32, #tpu.memory_space<vmem>>, vector<128x16xf32>,
    %c0_16 = arith.constant 0 : index
    %c0_17 = arith.constant 0 : index
    %37 = vector.load %arg12[%c0_16, %c0_17] : memref<128x32xf32, #tpu.memory_space<vmem>>, vector<128x32xf32>
    %38 = arith.truncf %37 : vector<128x32xf32> to vector<128x32xbf16>
    %c0_18 = arith.constant 0 : index
    %c0_19 = arith.constant 0 : index
    %39 = vector.load %arg6[%c0_18, %c0_19] : memref<32x128xbf16, #tpu.memory_space<vmem>>, vector<32x128xbf16>
    %cst_20 = arith.constant dense<0.000000e+00> : vector<128x128xf32>
    %40 = tpu.matmul %38, %39, %cst_20 {dimension_numbers = #tpu.dot_dimension_numbers<[1], [0], [0], [1], [0, 0, 1, 1], [], []>} : vector<128x32xbf16>, vector<32x128xbf16>, vector<128x128xf32> -> vector<128x128xf32>
    %c0_21 = arith.constant 0 : index
    %c0_22 = arith.constant 0 : index
    %41 = vector.load %arg7[%c0_21, %c0_22] : memref<1x128xf32, #tpu.memory_space<vmem>>, vector<1x128xf32>
    %42 = vector.broadcast %41 : vector<1x128xf32> to vector<128x128xf32>
    %43 = arith.addf %40, %42 : vector<128x128xf32>
    %c0_23 = arith.constant 0 : index
    %44 = arith.index_cast %4 : i32 to index
    %c0_24 = arith.constant 0 : index
    %45 = vector.load %arg2[%c0_23, %44, %c0_24] : memref<1x128x128xf32, #tpu.memory_space<vmem>>, vector<1x128x128xf32>
    %46 = vector.shape_cast %45 : vector<1x128x128xf32> to vector<128x128xf32>
    %47 = arith.addf %46, %43 : vector<128x128xf32>
    %c0_25 = arith.constant 0 : index
    %c0_26 = arith.constant 0 : index
    %c0_27 = arith.constant 0 : index
    %48 = vector.load %arg8[%c0_25, %c0_26, %c0_27] : memref<1x128x128xf32, #tpu.memory_space<vmem>>, vector<1x128x128xf32>
    %49 = vector.shape_cast %48 : vector<1x128x128xf32> to vector<128x128xf32>
    %50 = vector.shape_cast %47 : vector<128x128xf32> to vector<1x128x128xf32>
    tpu.vector_store %arg8[%c0_25, %c0_26, %c0_27], %50 {strides = array<i32>} : memref<1x128x128xf32, #tpu.memory_space<vmem>>, vector<1x128x128xf32>,
    return
  }
  func.func @transform_0(%arg0: i32, %arg1: i32) -> (i32, i32, i32) {
    %c0_i32 = arith.constant 0 : i32
    %c0_i32_0 = arith.constant 0 : i32
    %c0_i32_1 = arith.constant 0 : i32
    return %arg0, %c0_i32, %c0_i32_0 : i32, i32, i32
  }
  func.func @transform_1(%arg0: i32, %arg1: i32) -> (i32, i32) {
    %c0_i32 = arith.constant 0 : i32
    %c0_i32_0 = arith.constant 0 : i32
    %c0_i32_1 = arith.constant 0 : i32
    return %c0_i32, %c0_i32_0 : i32, i32
  }
  func.func @transform_2(%arg0: i32, %arg1: i32) -> (i32, i32) {
    %c0_i32 = arith.constant 0 : i32
    %c0_i32_0 = arith.constant 0 : i32
    %c0_i32_1 = arith.constant 0 : i32
    return %c0_i32, %c0_i32_0 : i32, i32
  }
  func.func @transform_3(%arg0: i32, %arg1: i32) -> (i32, i32) {
    %c0_i32 = arith.constant 0 : i32
    %c0_i32_0 = arith.constant 0 : i32
    %c0_i32_1 = arith.constant 0 : i32
    return %c0_i32, %c0_i32_0 : i32, i32
  }
  func.func @transform_4(%arg0: i32, %arg1: i32) -> (i32, i32) {
    %c0_i32 = arith.constant 0 : i32
    %c0_i32_0 = arith.constant 0 : i32
    %c0_i32_1 = arith.constant 0 : i32
    return %c0_i32, %c0_i32_0 : i32, i32
  }
  func.func @transform_5(%arg0: i32, %arg1: i32) -> (i32, i32) {
    %c0_i32 = arith.constant 0 : i32
    %c0_i32_0 = arith.constant 0 : i32
    %c0_i32_1 = arith.constant 0 : i32
    return %c0_i32, %c0_i32_0 : i32, i32
  }
  func.func @transform_6(%arg0: i32, %arg1: i32) -> (i32, i32, i32) {
    %c0_i32 = arith.constant 0 : i32
    %c0_i32_0 = arith.constant 0 : i32
    return %arg0, %arg1, %c0_i32 : i32, i32, i32
  }
}

</mosaic_0001>

<bundles_post_ra>
// kernel: tpu_custom_call.1
= control target key start
LH: loop header
LB: loop body
LE: loop exit
PB: predicated region body
PF: predicated region fallthrough
CT: control target
= control target key end

     0   :  { %s4913_s0 = inlined_call_operand.hbm [shape: f32[2,128,128], index: 0, kind: input, shape index: {}]   ;;  %s4914_s1 = inlined_call_operand.hbm [shape: f32[1,128], index: 1, kind: input, shape index: {}]   ;;  %s4915_s2 = inlined_call_operand.vmem [shape: f32[1,128], index: 2, kind: input, shape index: {}]   ;;  %s4916_s3 = inlined_call_operand.hbm [shape: bf16[128,128], index: 3, kind: input, shape index: {}]   ;;  %s4917_s4 = inlined_call_operand.hbm [shape: bf16[32,128], index: 4, kind: input, shape index: {}]   ;;  %s4918_s5 = inlined_call_operand.vmem [shape: f32[1,128], index: 5, kind: input, shape index: {}]   ;;  %s4919_s6 = inlined_call_operand.hbm [shape: f32[2,128,128], index: 6, kind: output, shape index: {}]  }
   0x1   :  { %4921 = sst [smem:[#allocation20_spill]] %s4914_s1 }
   0x2   :  { %4922 = sst [smem:[#allocation21_spill]] %s4916_s3 }
   0x3   :  { %4923 = sst [smem:[#allocation22_spill]] %s4917_s4 }
   0x4   :  { %11 = vsyncpa [#allocation7], 0 }
   0x5   :  { %13 = vsyncpa [#allocation7 + $0x1], 0 }
   0x6   :  { %14 = vsyncpa [#allocation10], 0 }
   0x7   :  { %15 = vsyncpa [#allocation13], 0 }
   0x8   :  { %16 = vsyncpa [#allocation8], 0 }
   0x9   :  { %18 = vsyncpa [#allocation8 + $0x1], 0  ;;  %s3647_s21 = smov 0   ;;  %s3649_s22 = smov 0  }
   0xa   :  { %s3651_s23 = smov 0   ;;  %s3653_s24 = smov 0  }
   0xb   :  { %s3655_s25 = smov 0   ;;  %s3657_s26 = smov 0  }
   0xc LB: > { %s2764_s27 = sadd.s32 4294967295, %s3595_s26   ;;  %s2765_s28 = sadd.s32 4294967294, %s3595_s26   ;;  %s3595_s26 = sphi %s3657_s26, %s24_s26   ;;  %s3591_s25 = sphi %s3655_s25, %s4951_s25   ;;  %s3587_s24 = sphi %s3653_s24, %s4950_s24   ;;  %s3583_s23 = sphi %s3651_s23, %s4949_s23   ;;  %s3579_s22 = sphi %s3649_s22, %s4948_s22   ;;  %s3575_s21 = sphi %s3647_s21, %s4947_s21  }
   0xd   : > { %p56_p0 = scmp.ne.s32.totalorder %s3579_s22, %s3575_s21  ;;  %p3681_p1 = scmp.eq.s32.totalorder %s2764_s27, 0 }
   0xe   : > { %p3685_p2 = scmp.eq.s32.totalorder %s2764_s27, 1  ;;  %p193_p3 = scmp.eq.s32.totalorder %s2765_s28, 1 }
   0xf   : > { %p3691_p4 = por %p3681_p1, %p56_p0  ;;  %p2766_p5 = scmp.ge.s32.totalorder %s3595_s26, 1 }
  0x10   : > { %p3696_p6 = por %p193_p3, %p56_p0  ;;  %p200_p7 = scmp.lt.s32.totalorder %s3595_s26, 3 }
  0x11   : > { %s4928_s1 = sld [smem:[#allocation20_spill]]  ;;  %p2770_p9 = scmp.ge.s32.totalorder %s3595_s26, 2 }
  0x12   : > { %p3704_p8 = pnand %p2766_p5, %p200_p7  ;;  %s3597_s13 = smov [#allocation9]  }
  0x13   : > { %s214_s14 = sshll.u32 %s3597_s13, 4  ;;  %s4930_s3 = sld [smem:[#allocation21_spill]]  ;;  %s215_s14 = int_to_ptr.vmem [resolvable:$true] %s214_s14 }
  0x14   : > { %p3133_p10 = pneg %p3704_p8  ;;  %s3598_s19 = smov [#allocation11]  }
  0x15   : > { %s228_s20 = sshll.u32 %s3598_s19, 4  ;;  %s3599_s27 = smov 64   ;;  %s229_s20 = int_to_ptr.vmem [resolvable:$true] %s228_s20 }
  0x16   : > { %p3716_p11 = pnand %p3133_p10, %p3681_p1  ;;  %s3600_s28 = smov 4  }
  0x17   : > { %s212_s11 = sshll.u32 %s4928_s1, 4  ;;  %s4932_s4 = sld [smem:[#allocation22_spill]]  ;;  %s213_s11 = int_to_ptr.hbm [resolvable:$true] %s212_s11 }
  0x18   : > { %3136 = dma.hbm_to_vmem [thread:$0]  (!%p3716_p11), %s213_s11, 16, %s215_s14, [#allocation10]  }
  0x19   : > { %s226_s17 = sshll.u32 %s4930_s3, 4  ;;  %s3601_s15 = smov [#allocation12]   ;;  %s227_s17 = int_to_ptr.hbm [resolvable:$true] %s226_s17 }
  0x1a   : > { %3139 = dma.hbm_to_vmem [thread:$0]  (!%p3716_p11), %s227_s17, 1024, %s229_s20, [#allocation10], %s3599_s27, %s3599_s27, %s3600_s28  }
  0x1b   : > { %s242_s16 = sshll.u32 %s3601_s15, 4  ;;  %s43_s11 = sadd.s32 1, %s3583_s23  ;;  %s243_s16 = int_to_ptr.vmem [resolvable:$true] %s242_s16 }
  0x1c   : > { %s36_s14 = sadd.s32 1, %s3591_s25  ;;  %p50_p12 = scmp.ne.s32.totalorder %s3583_s23, %s3579_s22 }
  0x1d   : > { %s240_s13 = sshll.u32 %s4932_s4, 4  ;;  %p38_p13 = scmp.ge.s32.totalorder %s36_s14, 2  ;;  %s241_s13 = int_to_ptr.hbm [resolvable:$true] %s240_s13 }
  0x1e   : > { %3142 = dma.hbm_to_vmem [thread:$0]  (!%p3716_p11), %s241_s13, 256, %s243_s16, [#allocation13], %s3599_s27, %s3599_s27, %s3600_s28  }
  0x1f   : > { %p51_p0 = scmp.eq.s32.totalorder %s3595_s26, 0  ;;  %p3736_p3 = por %p3685_p2, %p50_p12 }
  0x20   : > { %p3154_p5 = scmp.lt.s32.totalorder %s3595_s26, 2  ;;  %s4953_s14 = smov (%p38_p13, %s36_s14), 0 }
  0x21   : > { %4934 = sst [smem:[#allocation19_spill]] %s4953_s14  ;;  %p3743_p7 = por %p51_p0, %p50_p12 }
  0x22   : > { %s259_s18 = sand.u32 1, %s3583_s23   ;;  %s40_s20 = ssub.s32 %s3591_s25, %s4953_s14 }
  0x23   : > { %p41_p10 = scmp.eq.s32.totalorder %s40_s20, 0  ;;  %s2771_s27 = sshll.u32 %s259_s18, 7 }
  0x24   : > { %s3041_s28 = sshll.u32 %s3591_s25, 7  ;;  %s263_s15 = scalar_lea.vmem [#allocation6], %s2771_s27 }
  0x25   : > { %s3752_s30 = scalar_select %p41_p10, %s3583_s23, %s43_s11  }
  0x26   : > { %s268_s13 = scalar_lea.hbm %s4913_s0, %s3041_s28  ;;  %s271_s16 = sshll.u32 %s263_s15, 4  ;;  %s272_s16 = int_to_ptr.vmem [resolvable:$true] %s271_s16 }
  0x27   : > { %s269_s1 = sshll.u32 %s268_s13, 4  ;;  %p3144_p2 = pnand %p3154_p5, %p3743_p7  ;;  %s270_s1 = int_to_ptr.hbm [resolvable:$true] %s269_s1 }
  0x28   : > { %s260_s3 = scalar_lea.sflag [#allocation7], %s259_s18  ;;  %s3602_s4 = smov 128  }
  0x29   : > { %s3603_s14 = smov 8   ;;  %283 = sbr.rel (%p3704_p8) target bundleno = 1970 (0x7b2), region = 44 }
  0x2a   : > { %3146 = dma.hbm_to_vmem [thread:$0]  (!%p3144_p2), %s270_s1, 2048, %s272_s16, %s260_s3, %s3602_s4, %s3602_s4, %s3603_s14  }
  0x2b   : > { %s3764_s11 = sand.u32 (!%p3704_p8), 1, %s3579_s22  }
  0x2c   : > { %s2775_s20 = sshll.u32 (!%p3704_p8), %s3764_s11, 7  ;;  %s286_s27 = scalar_lea.sflag (!%p3704_p8), [#allocation7], %s3764_s11 }
  0x2d   : > { %s3770_s19 = scalar_lea.vmem (!%p3704_p8), [#allocation6], %s2775_s20 }
  0x2e   : > { %3558 = dma.done.wait (%p3691_p4), %s286_s27, 2048  }
  0x2f   : > { %3560 = vsyncadd (%p3691_p4), %s286_s27, 4294965248 }
  0x30   : > { %3562 = dma.done.wait (%p3681_p1), [#allocation10], 1040  }
  0x31   : > { %3564 = vsyncadd (%p3681_p1), [#allocation10], 4294966256 }
  0x32   : > { %3566 = dma.done.wait (%p3681_p1), [#allocation13], 256  }
  0x33   : > { %3568 = vsyncadd (%p3681_p1), [#allocation13], 4294967040  ;;  %v342_v0 = vld [vmem:[%s3770_s19 + $0x10] sm:$0xff]  ;;  %v340_v1 = vld [vmem:[%s3770_s19] sm:$0xff]  ;;  %v420_v7 = vlaneseq  ;;  %s3604_s4 = smov 80   ;;  %s3605_s29 = smov 96  }
  0x34   : > { %360 = vadd.xlane.f32.xlu1 %v342_v0  ;;  %356 = vadd.xlane.f32.xlu0 %v340_v1  ;;  %v344_v2 = vld [vmem:[%s3770_s19 + $0x20] sm:$0xff]  ;;  %v343_v3 = vld [vmem:[%s3770_s19 + $0x18] sm:$0xff]  ;;  %v341_v4 = vld [vmem:[%s3770_s19 + $0x8] sm:$0xff]  ;;  %s3606_s7 = smov 112   ;;  %s3607_s12 = smov 48  }
  0x35   : > { %364 = vadd.xlane.f32.xlu2 %v344_v2  ;;  %v345_v5 = vld [vmem:[%s3770_s19 + $0x28] sm:$0xff]  ;;  %v346_v6 = vld [vmem:[%s3770_s19 + $0x30] sm:$0xff]  ;;  %v3791_v8 = vand.u32 127, %v420_v7  ;;  %v3805_v27 = vld [vmem:[%s3770_s19 + $0x38] sm:$0xff]  ;;  %s3608_s14 = smov 64   ;;  %s3609_s18 = smov 16  }
  0x36   : > { %v3827_v37 = vld [vmem:[%s3770_s19 + $0x40] sm:$0xff]  ;;  %v3839_v44 = vld [vmem:[%s3770_s19 + $0x58] sm:$0xff]  ;;  %v3842_v45 = vld [vmem:[%s3770_s19 + $0x48] sm:$0xff]  ;;  %s4823_s10 = scalar_lea.vmem [#allocation14], %s2775_s20  ;;  %s3100_s13 = sshll.u32 %s3587_s24, 7 }
  0x37   : > { %vm422_vm0 = vcmp.lt.s32.totalorder %v3791_v8, 32  ;;  %v3853_v48 = vld [vmem:[%s3770_s19 + $0x60] sm:$0xff]  ;;  %v3856_v49 = vld [vmem:[%s3770_s19 + $0x50] sm:$0xff]  ;;  %v3861_v50 = vld [vmem:[%s3770_s19 + $0x68] sm:$0xff]  ;;  %s2643_s20 = scalar_lea.hbm %s4919_s6, %s3100_s13  ;;  %s2644_s27 = sshll.u32 %s4823_s10, 4  ;;  %s2645_s27 = int_to_ptr.vmem [resolvable:$true] %s2644_s27 }
  0x38   : > { %v3865_v51 = vld [vmem:[%s3770_s19 + $0x70] sm:$0xff]  ;;  %v3049_v52 = vld [vmem:[#allocation11 + $0x38] sm:$0xff]  ;;  %v3046_v55 = vld [vmem:[#allocation11 + $0x20] sm:$0xff]  ;;  %s2646_s1 = sshll.u32 %s2643_s20, 4  ;;  %s2630_s3 = scalar_lea.sflag [#allocation8], %s3764_s11  ;;  %s2647_s1 = int_to_ptr.hbm [resolvable:$true] %s2646_s1 }
  0x39   : > { %809 = vmatpush.bf16.msra.mxu0 %v3049_v52  ;;  %v3048_v53 = vld [vmem:[#allocation11 + $0x30] sm:$0xff]  ;;  %v3047_v54 = vld [vmem:[#allocation11 + $0x28] sm:$0xff]  ;;  %v3045_v56 = vld [vmem:[#allocation11 + $0x18] sm:$0xff] }
  0x3a   : > { %v3044_v57 = vld [vmem:[#allocation11 + $0x10] sm:$0xff]  ;;  %v3043_v58 = vld [vmem:[#allocation11 + $0x8] sm:$0xff]  ;;  %v3042_v62 = vld [vmem:[#allocation11] sm:$0xff] }
  0x3c   : > { %362 = vadd.xlane.f32.xlu1 %v343_v3  ;;  %358 = vadd.xlane.f32.xlu0 %v341_v4 }
  0x3d   : > { %366 = vadd.xlane.f32.xlu2 %v345_v5  ;;  %810 = vmatpush.bf16.msra.mxu0 %v3048_v53 }
  0x41   : > { %811 = vmatpush.bf16.msra.mxu0 %v3047_v54 }
  0x45   : > { %368 = vadd.xlane.f32.xlu2 %v346_v6  ;;  %812 = vmatpush.bf16.msra.mxu0 %v3046_v55 }
  0x49   : > { %813 = vmatpush.bf16.msra.mxu0 %v3045_v56 }
  0x4d   : > { %814 = vmatpush.bf16.msra.mxu0 %v3044_v57 }
  0x51   : > { %815 = vmatpush.bf16.msra.mxu0 %v3043_v58 }
  0x55   : > { %816 = vmatpush.bf16.msra.mxu0 %v3042_v62 }
  0xa7   : > { %v361_v9 = vpop.xlane.xlu1 %360  ;;  %v357_v10 = vpop.xlane.xlu0 %356 }
  0xa8   : > { %v388_v11 = vmul.f32 0.03125, %v357_v10  ;;  %v365_v12 = vpop.xlane.xlu2 %364  ;;  %v390_v21 = vmul.f32 0.03125, %v361_v9 }
  0xa9   : > { %v392_v20 = vmul.f32 0.03125, %v365_v12 }
  0xaa   : > { %v404_v13 = vsub.f32 %v340_v1, %v388_v11  ;;  %v406_v29 = vsub.f32 %v342_v0, %v390_v21 }
  0xab   : > { %v408_v25 = vsub.f32 %v344_v2, %v392_v20 }
  0xac   : > { %v3796_v14 = vsel %vm422_vm0, %v404_v13, 0.0  ;;  %v3822_v34 = vsel %vm422_vm0, %v406_v29, 0.0 }
  0xad   : > { %v441_v15 = vmul.f32 %v3796_v14, %v3796_v14  ;;  %v3818_v33 = vsel %vm422_vm0, %v408_v25, 0.0  ;;  %v443_v38 = vmul.f32 %v3822_v34, %v3822_v34 }
  0xae   : > { %v445_v35 = vmul.f32 %v3818_v33, %v3818_v33 }
  0xaf   : > { %v363_v16 = vpop.xlane.xlu1 %362  ;;  %457 = vadd.xlane.f32.xlu0 %v441_v15  ;;  %v359_v17 = vpop.xlane.xlu0 %358 }
  0xb0   : > { %v391_v18 = vmul.f32 0.03125, %v363_v16  ;;  %v389_v19 = vmul.f32 0.03125, %v359_v17  ;;  %v367_v24 = vpop.xlane.xlu2 %366 }
  0xb1   : > { %v393_v32 = vmul.f32 0.03125, %v367_v24 }
  0xb2   : > { %v407_v22 = vsub.f32 %v343_v3, %v391_v18  ;;  %v405_v23 = vsub.f32 %v341_v4, %v389_v19 }
  0xb3   : > { %v409_v36 = vsub.f32 %v345_v5, %v393_v32 }
  0xb4   : > { %v3802_v26 = vsel %vm422_vm0, %v407_v22, 0.0  ;;  %v3809_v28 = vsel %vm422_vm0, %v405_v23, 0.0 }
  0xb5   : > { %v444_v30 = vmul.f32 %v3802_v26, %v3802_v26  ;;  %v442_v31 = vmul.f32 %v3809_v28, %v3809_v28  ;;  %v3834_v41 = vsel %vm422_vm0, %v409_v36, 0.0 }
  0xb6   : > { %v446_v42 = vmul.f32 %v3834_v41, %v3834_v41 }
  0xb7   : > { %463 = vadd.xlane.f32.xlu2 %v444_v30  ;;  %370 = vadd.xlane.f32.xlu0 %v3805_v27 }
  0xb8   : > { %459 = vadd.xlane.f32.xlu1 %v442_v31  ;;  %v369_v39 = vpop.xlane.xlu2 %368 }
  0xb9   : > { %v394_v40 = vmul.f32 0.03125, %v369_v39 }
  0xbb   : > { %v410_v43 = vsub.f32 %v346_v6, %v394_v40 }
  0xbd   : > { %v3848_v46 = vsel %vm422_vm0, %v410_v43, 0.0 }
  0xbe   : > { %v447_v47 = vmul.f32 %v3848_v46, %v3848_v46 }
  0xbf   : > { %465 = vadd.xlane.f32.xlu2 %v445_v35  ;;  %372 = vadd.xlane.f32.xlu0 %v3827_v37 }
  0xc0   : > { %461 = vadd.xlane.f32.xlu1 %v443_v38 }
  0xc7   : > { %378 = vadd.xlane.f32.xlu2 %v3839_v44  ;;  %467 = vadd.xlane.f32.xlu0 %v446_v42 }
  0xc8   : > { %374 = vadd.xlane.f32.xlu1 %v3842_v45 }
  0xcf   : > { %380 = vadd.xlane.f32.xlu2 %v3853_v48  ;;  %469 = vadd.xlane.f32.xlu0 %v447_v47 }
  0xd0   : > { %376 = vadd.xlane.f32.xlu1 %v3856_v49 }
  0xd7   : > { %382 = vadd.xlane.f32.xlu0 %v3861_v50 }
  0xdf   : > { %384 = vadd.xlane.f32.xlu0 %v3865_v51 }
 0x122   : > { %v458_v59 = vpop.xlane.xlu0 %457 }
 0x123   : > { %v489_v60 = vmul.f32 0.03125, %v458_v59 }
 0x125   : > { %v505_v61 = vadd.f32 1e-05, %v489_v60 }
 0x127   : > { %3225 = vrsqrt.f32 %v505_v61  ;;  %vm527_vm2 = vweird.f32 %v505_v61 }
 0x12a   : > { %v464_v63 = vpop.xlane.xlu2 %463  ;;  %v371_v0 = vpop.xlane.xlu0 %370 }
 0x12b   : > { %v492_v1 = vmul.f32 0.03125, %v464_v63  ;;  %v460_v2 = vpop.xlane.xlu1 %459  ;;  %v395_v3 = vmul.f32 0.03125, %v371_v0  ;;  %v3917_v0 = vld [vmem:[#allocation9] ss:$0 sm:$0xff] }
 0x12c   : > { %v490_v4 = vmul.f32 0.03125, %v460_v2 }
 0x12d   : > { %v3226_v5 = vpop.eup %3225  ;;  %v3868_v6 = vadd.f32 1e-05, %v492_v1  ;;  %v411_v7 = vsub.f32 %v3805_v27, %v395_v3 }
 0x12e   : > { %v522_v9 = vmul.f32 %v3226_v5, %v505_v61  ;;  %v506_v10 = vadd.f32 1e-05, %v490_v4  ;;  %vm528_vm1 = vweird.f32 %v3226_v5 }
 0x12f   : > { %3227 = vrsqrt.f32 %v3868_v6  ;;  %v3874_v11 = vsel %vm422_vm0, %v411_v7, 0.0  ;;  %vm3894_vm4 = vmor %vm527_vm2, %vm528_vm1  ;;  %vm557_vm9 = vweird.f32 %v3868_v6 }
 0x130   : > { %v523_v12 = vmul.f32 %v3226_v5, %v522_v9  ;;  %3229 = vrsqrt.f32 %v506_v10  ;;  %v448_v13 = vmul.f32 %v3874_v11, %v3874_v11  ;;  %vm537_vm3 = vweird.f32 %v506_v10 }
 0x132   : > { %v524_v15 = vmul.f32 0.5, %v523_v12  ;;  %v466_v16 = vpop.xlane.xlu2 %465  ;;  %471 = vadd.xlane.f32.xlu1 %v448_v13  ;;  %v373_v17 = vpop.xlane.xlu0 %372 }
 0x133   : > { %v462_v18 = vpop.xlane.xlu1 %461  ;;  %v396_v19 = vmul.f32 0.03125, %v373_v17  ;;  %v493_v25 = vmul.f32 0.03125, %v466_v16 }
 0x134   : > { %v525_v20 = vsub.f32 1.5, %v524_v15  ;;  %v491_v21 = vmul.f32 0.03125, %v462_v18  ;;  %v3945_v18 = vld [vmem:[%s4915_s2] ss:$0 sm:$0xff] }
 0x135   : > { %v3878_v22 = vpop.eup %3227  ;;  %v412_v23 = vsub.f32 %v3827_v37, %v396_v19  ;;  %v3892_v37 = vadd.f32 1e-05, %v493_v25 }
 0x136   : > { %v3230_v24 = vpop.eup %3229  ;;  %v3881_v27 = vadd.f32 1e-05, %v491_v21  ;;  %v526_v30 = vmul.f32 %v3226_v5, %v525_v20  ;;  %v552_v31 = vmul.f32 %v3878_v22, %v3868_v6  ;;  %vm558_vm10 = vweird.f32 %v3878_v22 }
 0x137   : > { %v532_v29 = vmul.f32 %v3230_v24, %v506_v10  ;;  %v3888_v32 = vsel %vm422_vm0, %v412_v23, 0.0  ;;  %vm538_vm5 = vweird.f32 %v3230_v24  ;;  %vm3977_vm12 = vmor %vm557_vm9, %vm558_vm10  ;;  %vm567_vm15 = vweird.f32 %v3892_v37 }
 0x138   : > { %3231 = vrsqrt.f32 %v3881_v27  ;;  %v449_v36 = vmul.f32 %v3888_v32, %v3888_v32  ;;  %v553_v53 = vmul.f32 %v3878_v22, %v552_v31  ;;  %v530_v55 = vsel %vm3894_vm4, %v3226_v5, %v526_v30  ;;  %vm3907_vm6 = vmor %vm537_vm3, %vm538_vm5 }
 0x139   : > { %v533_v35 = vmul.f32 %v3230_v24, %v532_v29  ;;  %3233 = vrsqrt.f32 %v3892_v37  ;;  %vm547_vm7 = vweird.f32 %v3881_v27 }
 0x13a   : > { %v379_v38 = vpop.xlane.xlu2 %378  ;;  %v468_v39 = vpop.xlane.xlu0 %467  ;;  %473 = vadd.xlane.f32.xlu1 %v449_v36  ;;  %v554_v1 = vmul.f32 0.5, %v553_v53 }
 0x13b   : > { %v534_v42 = vmul.f32 0.5, %v533_v35  ;;  %v399_v43 = vmul.f32 0.03125, %v379_v38  ;;  %v375_v47 = vpop.xlane.xlu1 %374  ;;  %v494_v52 = vmul.f32 0.03125, %v468_v39 }
 0x13c   : > { %v397_v54 = vmul.f32 0.03125, %v375_v47  ;;  %v555_v20 = vsub.f32 1.5, %v554_v1 }
 0x13d   : > { %v535_v56 = vsub.f32 1.5, %v534_v42  ;;  %v415_v57 = vsub.f32 %v3839_v44, %v399_v43  ;;  %v3902_v58 = vadd.f32 1e-05, %v494_v52  ;;  %v681_v44 = vmul.f32 %v530_v55, %v3796_v14  ;;  %v3933_v14 = vld [vmem:[%s3770_s19 + $0x78] sm:$0xff] }
 0x13e   : > { %v3904_v59 = vpop.eup %3231  ;;  %v413_v61 = vsub.f32 %v3842_v45, %v397_v54  ;;  %v556_v6 = vmul.f32 %v3878_v22, %v555_v20 }
 0x13f   : > { %v536_v62 = vmul.f32 %v3230_v24, %v535_v56  ;;  %v542_v63 = vmul.f32 %v3904_v59, %v3881_v27  ;;  %3235 = vrsqrt.f32 %v3902_v58  ;;  %v3921_v2 = vsel %vm422_vm0, %v415_v57, 0.0  ;;  %v3947_v19 = vpop.eup %3233 }
 0x140   : > { %v3925_v3 = vsel %vm422_vm0, %v413_v61, 0.0  ;;  %v452_v4 = vmul.f32 %v3921_v2, %v3921_v2  ;;  %v701_v17 = vmul.f32 %v3917_v0, %v681_v44  ;;  %vm548_vm8 = vweird.f32 %v3904_v59 }
 0x141   : > { %v543_v45 = vmul.f32 %v3904_v59, %v542_v63  ;;  %v450_v5 = vmul.f32 %v3925_v3, %v3925_v3  ;;  %v540_v7 = vsel %vm3907_vm6, %v3230_v24, %v536_v62  ;;  %vm3960_vm11 = vmor %vm547_vm7, %vm548_vm8  ;;  %v562_v38 = vmul.f32 %v3947_v19, %v3892_v37 }
 0x142   : > { %v381_v9 = vpop.xlane.xlu2 %380  ;;  %v3937_v10 = vpop.xlane.xlu0 %469  ;;  %v682_v12 = vmul.f32 %v540_v7, %v3809_v28  ;;  %479 = vadd.xlane.f32.xlu0 %v452_v4  ;;  %386 = vadd.xlane.f32.xlu1 %v3933_v14  ;;  %v721_v36 = vadd.f32 %v3945_v18, %v701_v17  ;;  %v560_v56 = vsel %vm3977_vm12, %v3878_v22, %v556_v6  ;;  %vm577_vm13 = vweird.f32 %v3902_v58 }
 0x143   : > { %v544_v13 = vmul.f32 0.5, %v543_v45  ;;  %v400_v15 = vmul.f32 0.03125, %v381_v9  ;;  %475 = vadd.xlane.f32.xlu2 %v450_v5  ;;  %v377_v16 = vpop.xlane.xlu1 %376  ;;  %v563_v55 = vmul.f32 %v3947_v19, %v562_v38  ;;  %vm568_vm1 = vweird.f32 %v3947_v19 }
 0x144   : > { %v398_v28 = vmul.f32 0.03125, %v377_v16  ;;  %v702_v21 = vmul.f32 %v3917_v0, %v682_v12  ;;  %vm569_vm3 = vmor %vm567_vm15, %vm568_vm1 }
 0x145   : > { %v3236_v23 = vpop.eup %3235  ;;  %v545_v24 = vsub.f32 1.5, %v544_v13  ;;  %v416_v25 = vsub.f32 %v3853_v48, %v400_v15  ;;  %v564_v63 = vmul.f32 0.5, %v563_v55 }
 0x146   : > { %v572_v29 = vmul.f32 %v3236_v23, %v3902_v58  ;;  %v414_v30 = vsub.f32 %v3856_v49, %v398_v28  ;;  %v722_v48 = vadd.f32 %v3945_v18, %v702_v21  ;;  %vm578_vm14 = vweird.f32 %v3236_v23 }
 0x147   : > { %v546_v31 = vmul.f32 %v3904_v59, %v545_v24  ;;  %v3975_v27 = vsel %vm422_vm0, %v416_v25, 0.0  ;;  %vm579_vm2 = vmor %vm577_vm13, %vm578_vm14  ;;  %vm874_vm14 = vcmask 125952  }
 0x148   : > { %v3971_v49 = vsel %vm422_vm0, %v414_v30, 0.0  ;;  %v737_v40 = vpack.c.bf16 %v722_v48, %v721_v36  ;;  %v453_v43 = vmul.f32 %v3975_v27, %v3975_v27  ;;  %v573_v47 = vmul.f32 %v3236_v23, %v572_v29 }
 0x149   : > { %v451_v42 = vmul.f32 %v3971_v49, %v3971_v49  ;;  %v550_v53 = vsel %vm3960_vm11, %v3904_v59, %v546_v31  ;;  %v684_v59 = vmul.f32 %v560_v56, %v3802_v26  ;;  %v495_v29 = vmul.f32 0.03125, %v3937_v10 }
 0x14a   : > { %v383_v52 = vpop.xlane.xlu0 %382  ;;  %817 = vmatmul.bf16.vlgmr.msra.gmra.mxu0 %v737_v40  ;;  %481 = vadd.xlane.f32.xlu1 %v453_v43  ;;  %v683_v60 = vmul.f32 %v550_v53, %v3822_v34  ;;  %v574_v61 = vmul.f32 0.5, %v573_v47  ;;  %v565_v34 = vsub.f32 1.5, %v564_v63 }
 0x14b   : > { %477 = vadd.xlane.f32.xlu2 %v451_v42  ;;  %v401_v54 = vmul.f32 0.03125, %v383_v52 }
 0x14c   : > { %v703_v1 = vmul.f32 %v3917_v0, %v683_v60  ;;  %v575_v45 = vsub.f32 1.5, %v574_v61  ;;  %v566_v13 = vmul.f32 %v3947_v19, %v565_v34 }
 0x14d   : > { %v417_v57 = vsub.f32 %v3861_v50, %v401_v54  ;;  %v704_v50 = vmul.f32 %v3917_v0, %v684_v59 }
 0x14e   : > { %v723_v26 = vadd.f32 %v3945_v18, %v703_v1  ;;  %v576_v7 = vmul.f32 %v3236_v23, %v575_v45  ;;  %v570_v37 = vsel %vm569_vm3, %v3947_v19, %v566_v13 }
 0x14f   : > { %v3996_v62 = vsel %vm422_vm0, %v417_v57, 0.0  ;;  %v724_v9 = vadd.f32 %v3945_v18, %v704_v50  ;;  %v685_v17 = vmul.f32 %v570_v37, %v3818_v33 }
 0x150   : > { %v454_v44 = vmul.f32 %v3996_v62, %v3996_v62  ;;  %v580_v15 = vsel %vm579_vm2, %v3236_v23, %v576_v7  ;;  %v511_v23 = vadd.f32 1e-05, %v495_v29 }
 0x151   : > { %v686_v16 = vmul.f32 %v580_v15, %v3834_v41  ;;  %v705_v28 = vmul.f32 %v3917_v0, %v685_v17 }
 0x152   : > { %v385_v4 = vpop.xlane.xlu0 %384  ;;  %3237 = vrsqrt.f32 %v511_v23  ;;  %vm587_vm4 = vweird.f32 %v511_v23 }
 0x153   : > { %483 = vadd.xlane.f32.xlu2 %v454_v44  ;;  %v402_v22 = vmul.f32 0.03125, %v385_v4  ;;  %v706_v20 = vmul.f32 %v3917_v0, %v686_v16  ;;  %v725_v24 = vadd.f32 %v3945_v18, %v705_v28 }
 0x155   : > { %v418_v5 = vsub.f32 %v3865_v51, %v402_v22  ;;  %v738_v51 = vpack.c.bf16 %v724_v9, %v723_v26  ;;  %v726_v21 = vadd.f32 %v3945_v18, %v706_v20 }
 0x157   : > { %v4011_v12 = vsel %vm422_vm0, %v418_v5, 0.0  ;;  %v739_v25 = vpack.c.bf16 %v726_v21, %v725_v24 }
 0x158   : > { %v455_v58 = vmul.f32 %v4011_v12, %v4011_v12  ;;  %v3238_v30 = vpop.eup %3237 }
 0x159   : > { %v582_v19 = vmul.f32 %v3238_v30, %v511_v23  ;;  %vm588_vm5 = vweird.f32 %v3238_v30 }
 0x15a   : > { %485 = vadd.xlane.f32.xlu0 %v455_v58  ;;  %822 = vmatmul.bf16.gmra.mxu0 %v738_v51  ;;  %vm589_vm6 = vmor %vm587_vm4, %vm588_vm5 }
 0x15b   : > { %v583_v31 = vmul.f32 %v3238_v30, %v582_v19 }
 0x15d   : > { %v584_v36 = vmul.f32 0.5, %v583_v31 }
 0x15f   : > { %v585_v48 = vsub.f32 1.5, %v584_v36 }
 0x161   : > { %v586_v40 = vmul.f32 %v3238_v30, %v585_v48 }
 0x163   : > { %v590_v52 = vsel %vm589_vm6, %v3238_v30, %v586_v40 }
 0x164   : > { %v687_v59 = vmul.f32 %v590_v52, %v3848_v46 }
 0x166   : > { %v707_v7 = vmul.f32 %v3917_v0, %v687_v59 }
 0x168   : > { %v727_v20 = vadd.f32 %v3945_v18, %v707_v7 }
 0x16a   : > { %827 = vmatmul.bf16.gmra.mxu0 %v739_v25 }
 0x1a5   : > { %v472_v41 = vpop.xlane.xlu1 %471 }
 0x1a6   : > { %v496_v35 = vmul.f32 0.03125, %v472_v41 }
 0x1a8   : > { %v512_v33 = vadd.f32 1e-05, %v496_v35 }
 0x1aa   : > { %3239 = vrsqrt.f32 %v512_v33  ;;  %vm597_vm8 = vweird.f32 %v512_v33 }
 0x1ad   : > { %v474_v6 = vpop.xlane.xlu1 %473 }
 0x1ae   : > { %v497_v38 = vmul.f32 0.03125, %v474_v6 }
 0x1b0   : > { %v3240_v39 = vpop.eup %3239  ;;  %v513_v43 = vadd.f32 1e-05, %v497_v38 }
 0x1b1   : > { %v592_v42 = vmul.f32 %v3240_v39, %v512_v33  ;;  %vm598_vm7 = vweird.f32 %v3240_v39 }
 0x1b2   : > { %3241 = vrsqrt.f32 %v513_v43  ;;  %vm599_vm9 = vmor %vm597_vm8, %vm598_vm7  ;;  %vm607_vm10 = vweird.f32 %v513_v43 }
 0x1b3   : > { %v593_v10 = vmul.f32 %v3240_v39, %v592_v42 }
 0x1b5   : > { %v594_v47 = vmul.f32 0.5, %v593_v10  ;;  %v480_v54 = vpop.xlane.xlu0 %479  ;;  %v387_v57 = vpop.xlane.xlu1 %386 }
 0x1b6   : > { %v476_v53 = vpop.xlane.xlu2 %475  ;;  %v500_v60 = vmul.f32 0.03125, %v480_v54  ;;  %v403_v61 = vmul.f32 0.03125, %v387_v57 }
 0x1b7   : > { %v595_v55 = vsub.f32 1.5, %v594_v47  ;;  %v498_v56 = vmul.f32 0.03125, %v476_v53 }
 0x1b8   : > { %v3242_v63 = vpop.eup %3241  ;;  %v4025_v45 = vadd.f32 1e-05, %v500_v60  ;;  %v419_v22 = vsub.f32 %v3933_v14, %v403_v61 }
 0x1b9   : > { %v596_v44 = vmul.f32 %v3240_v39, %v595_v55  ;;  %v514_v1 = vadd.f32 1e-05, %v498_v56  ;;  %v602_v4 = vmul.f32 %v3242_v63, %v513_v43 }
 0x1ba   : > { %v4031_v5 = vsel %vm422_vm0, %v419_v22, 0.0  ;;  %vm608_vm0 = vweird.f32 %v3242_v63  ;;  %vm637_vm3 = vweird.f32 %v4025_v45 }
 0x1bb   : > { %3243 = vrsqrt.f32 %v514_v1  ;;  %v600_v50 = vsel %vm599_vm9, %v3240_v39, %v596_v44  ;;  %v603_v34 = vmul.f32 %v3242_v63, %v602_v4  ;;  %v456_v26 = vmul.f32 %v4031_v5, %v4031_v5  ;;  %vm4044_vm11 = vmor %vm607_vm10, %vm608_vm0 }
 0x1bc   : > { %3245 = vrsqrt.f32 %v4025_v45  ;;  %v688_v46 = vmul.f32 %v600_v50, %v3874_v11  ;;  %vm617_vm12 = vweird.f32 %v514_v1 }
 0x1bd   : > { %v604_v9 = vmul.f32 0.5, %v603_v34  ;;  %487 = vadd.xlane.f32.xlu1 %v456_v26  ;;  %v482_v51 = vpop.xlane.xlu1 %481 }
 0x1be   : > { %v478_v13 = vpop.xlane.xlu2 %477  ;;  %v708_v14 = vmul.f32 %v3917_v0, %v688_v46  ;;  %v501_v24 = vmul.f32 0.03125, %v482_v51 }
 0x1bf   : > { %v499_v58 = vmul.f32 0.03125, %v478_v13  ;;  %v605_v15 = vsub.f32 1.5, %v604_v9 }
 0x1c0   : > { %v728_v37 = vadd.f32 %v3945_v18, %v708_v14  ;;  %v4048_v31 = vadd.f32 1e-05, %v501_v24 }
 0x1c1   : > { %v3244_v16 = vpop.eup %3243  ;;  %v515_v17 = vadd.f32 1e-05, %v499_v58  ;;  %v606_v28 = vmul.f32 %v3242_v63, %v605_v15 }
 0x1c2   : > { %v4040_v11 = vpop.eup %3245  ;;  %v612_v21 = vmul.f32 %v3244_v16, %v514_v1  ;;  %v740_v23 = vpack.c.bf16 %v728_v37, %v727_v20  ;;  %vm618_vm13 = vweird.f32 %v3244_v16  ;;  %vm647_vm9 = vweird.f32 %v4048_v31 }
 0x1c3   : > { %v632_v25 = vmul.f32 %v4040_v11, %v4025_v45  ;;  %3247 = vrsqrt.f32 %v515_v17  ;;  %v610_v35 = vsel %vm4044_vm11, %v3242_v63, %v606_v28  ;;  %vm619_vm15 = vmor %vm617_vm12, %vm618_vm13  ;;  %vm627_vm1 = vweird.f32 %v515_v17 }
 0x1c4   : > { %v613_v29 = vmul.f32 %v3244_v16, %v612_v21  ;;  %832 = vmatmul.bf16.gmra.mxu0 %v740_v23  ;;  %v689_v42 = vmul.f32 %v610_v35, %v3888_v32  ;;  %3249 = vrsqrt.f32 %v4048_v31  ;;  %vm638_vm4 = vweird.f32 %v4040_v11 }
 0x1c5   : > { %v633_v33 = vmul.f32 %v4040_v11, %v632_v25  ;;  %vm639_vm6 = vmor %vm637_vm3, %vm638_vm4  ;;  %vm1379_vm4 = vcmask 130048  }
 0x1c6   : > { %v614_v19 = vmul.f32 0.5, %v613_v29  ;;  %v484_v41 = vpop.xlane.xlu2 %483  ;;  %v709_v55 = vmul.f32 %v3917_v0, %v689_v42 }
 0x1c7   : > { %v502_v36 = vmul.f32 0.03125, %v484_v41  ;;  %v818_v6 = vpop.f32.mrf.mxu0  ;;  %v634_v47 = vmul.f32 0.5, %v633_v33 }
 0x1c8   : > { %v615_v48 = vsub.f32 1.5, %v614_v19  ;;  %v4053_v40 = vpack.c.bf16 %v818_v6, %v818_v6 }
 0x1c9   : > { %v3248_v38 = vpop.eup %3247  ;;  %v518_v39 = vadd.f32 1e-05, %v502_v36  ;;  %v635_v57 = vsub.f32 1.5, %v634_v47 }
 0x1ca   : > { %v616_v43 = vmul.f32 %v3244_v16, %v615_v48  ;;  %v622_v10 = vmul.f32 %v3248_v38, %v515_v17  ;;  %875 = vst.msk [vmem:[#allocation2] sm:$0xf] %vm874_vm14, %v4053_v40  ;;  %vm628_vm2 = vweird.f32 %v3248_v38  ;;  %v3250_v60 = vpop.eup %3249 }
 0x1cb   : > { %3251 = vrsqrt.f32 %v518_v39  ;;  %vm629_vm5 = vmor %vm627_vm1, %vm628_vm2  ;;  %v636_v50 = vmul.f32 %v4040_v11, %v635_v57  ;;  %v642_v34 = vmul.f32 %v3250_v60, %v4048_v31  ;;  %vm657_vm7 = vweird.f32 %v518_v39 }
 0x1cc   : > { %v623_v52 = vmul.f32 %v3248_v38, %v622_v10  ;;  %v620_v53 = vsel %vm619_vm15, %v3244_v16, %v616_v43  ;;  %vm648_vm0 = vweird.f32 %v3250_v60 }
 0x1cd   : > { %v690_v54 = vmul.f32 %v620_v53, %v3925_v3  ;;  %v729_v3 = vadd.f32 %v3945_v18, %v709_v55  ;;  %v643_v9 = vmul.f32 %v3250_v60, %v642_v34  ;;  %v640_v13 = vsel %vm639_vm6, %v4040_v11, %v636_v50  ;;  %vm649_vm11 = vmor %vm647_vm9, %vm648_vm0 }
 0x1ce   : > { %v624_v56 = vmul.f32 0.5, %v623_v52  ;;  %v692_v37 = vmul.f32 %v640_v13, %v3921_v2  ;;  %vm2506_vm6 = vcmask 261120  }
 0x1cf   : > { %v710_v32 = vmul.f32 %v3917_v0, %v690_v54  ;;  %v820_v59 = vpop.f32.mrf.mxu0  ;;  %v644_v16 = vmul.f32 0.5, %v643_v9 }
 0x1d0   : > { %v625_v61 = vsub.f32 1.5, %v624_v56  ;;  %v4064_v44 = vpack.c.bf16 %v820_v59, %v820_v59  ;;  %v712_v20 = vmul.f32 %v3917_v0, %v692_v37 }
 0x1d1   : > { %v3252_v63 = vpop.eup %3251  ;;  %v730_v1 = vadd.f32 %v3945_v18, %v710_v32  ;;  %v645_v28 = vsub.f32 1.5, %v644_v16 }
 0x1d2   : > { %v626_v4 = vmul.f32 %v3248_v38, %v625_v61  ;;  %v652_v22 = vmul.f32 %v3252_v63, %v518_v39  ;;  %876 = vst.msk [vmem:[#allocation2 + $0x4] sm:$0xf] %vm874_vm14, %v4064_v44  ;;  %vm658_vm8 = vweird.f32 %v3252_v63  ;;  %v732_v24 = vadd.f32 %v3945_v18, %v712_v20 }
 0x1d3   : > { %v741_v46 = vpack.c.bf16 %v730_v1, %v729_v3  ;;  %vm659_vm10 = vmor %vm657_vm7, %vm658_vm8  ;;  %v646_v25 = vmul.f32 %v3250_v60, %v645_v28 }
 0x1d4   : > { %v653_v26 = vmul.f32 %v3252_v63, %v652_v22  ;;  %v630_v7 = vsel %vm629_vm5, %v3248_v38, %v626_v4  ;;  %vm1688_vm5 = vcmp.lt.s32.totalorder %v3791_v8, 8 }
 0x1d5   : > { %837 = vmatmul.bf16.gmra.mxu0 %v741_v46  ;;  %v691_v58 = vmul.f32 %v630_v7, %v3971_v49  ;;  %v650_v30 = vsel %vm649_vm11, %v3250_v60, %v646_v25 }
 0x1d6   : > { %v654_v51 = vmul.f32 0.5, %v653_v26  ;;  %v693_v35 = vmul.f32 %v650_v30, %v3975_v27  ;;  %v486_v27 = vpop.xlane.xlu0 %485 }
 0x1d7   : > { %v823_v14 = vpop.f32.mrf.mxu0  ;;  %v711_v45 = vmul.f32 %v3917_v0, %v691_v58  ;;  %v503_v42 = vmul.f32 0.03125, %v486_v27 }
 0x1d8   : > { %v4076_v15 = vpack.c.bf16 %v823_v14, %v823_v14  ;;  %v655_v17 = vsub.f32 1.5, %v654_v51  ;;  %v713_v36 = vmul.f32 %v3917_v0, %v693_v35 }
 0x1d9   : > { %v731_v49 = vadd.f32 %v3945_v18, %v711_v45  ;;  %v519_v43 = vadd.f32 1e-05, %v503_v42 }
 0x1da   : > { %877 = vst.msk [vmem:[#allocation2 + $0x8] sm:$0xf] %vm874_vm14, %v4076_v15  ;;  %v656_v21 = vmul.f32 %v3252_v63, %v655_v17  ;;  %v733_v39 = vadd.f32 %v3945_v18, %v713_v36 }
 0x1db   : > { %v742_v29 = vpack.c.bf16 %v732_v24, %v731_v49  ;;  %3253 = vrsqrt.f32 %v519_v43  ;;  %vm667_vm12 = vweird.f32 %v519_v43 }
 0x1dc   : > { %v660_v23 = vsel %vm659_vm10, %v3252_v63, %v656_v21 }
 0x1dd   : > { %v694_v41 = vmul.f32 %v660_v23, %v3996_v62 }
 0x1df   : > { %v825_v11 = vpop.f32.mrf.mxu0  ;;  %v714_v33 = vmul.f32 %v3917_v0, %v694_v41 }
 0x1e0   : > { %v4085_v2 = vpack.c.bf16 %v825_v11, %v825_v11 }
 0x1e1   : > { %v734_v6 = vadd.f32 %v3945_v18, %v714_v33  ;;  %v3254_v10 = vpop.eup %3253 }
 0x1e2   : > { %878 = vst.msk [vmem:[#allocation2 + $0xc] sm:$0xf] %vm874_vm14, %v4085_v2  ;;  %v662_v47 = vmul.f32 %v3254_v10, %v519_v43  ;;  %vm668_vm13 = vweird.f32 %v3254_v10 }
 0x1e3   : > { %v743_v62 = vpack.c.bf16 %v734_v6, %v733_v39  ;;  %vm669_vm15 = vmor %vm667_vm12, %vm668_vm13 }
 0x1e4   : > { %v663_v52 = vmul.f32 %v3254_v10, %v662_v47 }
 0x1e5   : > { %842 = vmatmul.bf16.gmra.mxu0 %v742_v29 }
 0x1e6   : > { %v664_v56 = vmul.f32 0.5, %v663_v52 }
 0x1e7   : > { %v828_v19 = vpop.f32.mrf.mxu0 }
 0x1e8   : > { %v4091_v31 = vpack.c.bf16 %v828_v19, %v828_v19  ;;  %v665_v57 = vsub.f32 1.5, %v664_v56 }
 0x1ea   : > { %879 = vst.msk [vmem:[#allocation2 + $0x10] sm:$0xf] %vm874_vm14, %v4091_v31  ;;  %v666_v60 = vmul.f32 %v3254_v10, %v665_v57 }
 0x1ec   : > { %v670_v3 = vsel %vm669_vm15, %v3254_v10, %v666_v60 }
 0x1ed   : > { %v695_v50 = vmul.f32 %v670_v3, %v4011_v12 }
 0x1ef   : > { %v830_v48 = vpop.f32.mrf.mxu0  ;;  %v715_v7 = vmul.f32 %v3917_v0, %v695_v50 }
 0x1f0   : > { %v4099_v38 = vpack.c.bf16 %v830_v48, %v830_v48 }
 0x1f1   : > { %v735_v58 = vadd.f32 %v3945_v18, %v715_v7 }
 0x1f2   : > { %880 = vst.msk [vmem:[#allocation2 + $0x14] sm:$0xf] %vm874_vm14, %v4099_v38 }
 0x1f5   : > { %847 = vmatmul.bf16.gmra.mxu0 %v743_v62 }
 0x230   : > { %v488_v53 = vpop.xlane.xlu1 %487 }
 0x231   : > { %v504_v54 = vmul.f32 0.03125, %v488_v53 }
 0x233   : > { %v520_v55 = vadd.f32 1e-05, %v504_v54 }
 0x235   : > { %3255 = vrsqrt.f32 %v520_v55  ;;  %vm677_vm2 = vweird.f32 %v520_v55 }
 0x23b   : > { %v3256_v32 = vpop.eup %3255 }
 0x23c   : > { %v672_v61 = vmul.f32 %v3256_v32, %v520_v55  ;;  %vm678_vm1 = vweird.f32 %v3256_v32 }
 0x23d   : > { %vm679_vm3 = vmor %vm677_vm2, %vm678_vm1 }
 0x23e   : > { %v673_v59 = vmul.f32 %v3256_v32, %v672_v61 }
 0x240   : > { %v674_v63 = vmul.f32 0.5, %v673_v59 }
 0x241   : > { %v833_v1 = vpop.f32.mrf.mxu0 }
 0x242   : > { %v675_v4 = vsub.f32 1.5, %v674_v63  ;;  %v4104_v22 = vpack.c.bf16 %v833_v1, %v833_v1 }
 0x244   : > { %v676_v34 = vmul.f32 %v3256_v32, %v675_v4  ;;  %881 = vst.msk [vmem:[#allocation2 + $0x18] sm:$0xf] %vm874_vm14, %v4104_v22 }
 0x246   : > { %v680_v46 = vsel %vm679_vm3, %v3256_v32, %v676_v34 }
 0x247   : > { %v696_v26 = vmul.f32 %v680_v46, %v4031_v5 }
 0x249   : > { %v835_v9 = vpop.f32.mrf.mxu0  ;;  %v716_v13 = vmul.f32 %v3917_v0, %v696_v26 }
 0x24a   : > { %v4112_v14 = vpack.c.bf16 %v835_v9, %v835_v9 }
 0x24b   : > { %v736_v12 = vadd.f32 %v3945_v18, %v716_v13 }
 0x24c   : > { %882 = vst.msk [vmem:[#allocation2 + $0x1c] sm:$0xf] %vm874_vm14, %v4112_v14 }
 0x24d   : > { %v744_v51 = vpack.c.bf16 %v736_v12, %v735_v58 }
 0x24f   : > { %852 = vmatmul.bf16.gmra.mxu0 %v744_v51 }
 0x252   : > { %v838_v37 = vpop.f32.mrf.mxu0 }
 0x253   : > { %v4118_v16 = vpack.c.bf16 %v838_v37, %v838_v37 }
 0x255   : > { %883 = vst.msk [vmem:[#allocation2 + $0x20] sm:$0xf] %vm874_vm14, %v4118_v16  ;;  %1116 = vrot.lane.b32.xlu1 %v4118_v16, %s3604_s4 }
 0x25a   : > { %v840_v0 = vpop.f32.mrf.mxu0 }
 0x25b   : > { %v4124_v5 = vpack.c.bf16 %v840_v0, %v840_v0 }
 0x25d   : > { %884 = vst.msk [vmem:[#allocation2 + $0x24] sm:$0xf] %vm874_vm14, %v4124_v5  ;;  %1118 = vrot.lane.b32.xlu0 %v4124_v5, %s3604_s4 }
 0x262   : > { %v843_v18 = vpop.f32.mrf.mxu0 }
 0x263   : > { %v4130_v45 = vpack.c.bf16 %v843_v18, %v843_v18 }
 0x265   : > { %885 = vst.msk [vmem:[#allocation2 + $0x28] sm:$0xf] %vm874_vm14, %v4130_v45  ;;  %1120 = vrot.lane.b32.xlu0 %v4130_v45, %s3604_s4 }
 0x26a   : > { %v845_v17 = vpop.f32.mrf.mxu0 }
 0x26b   : > { %v4136_v20 = vpack.c.bf16 %v845_v17, %v845_v17 }
 0x26d   : > { %886 = vst.msk [vmem:[#allocation2 + $0x2c] sm:$0xf] %vm874_vm14, %v4136_v20  ;;  %1122 = vrot.lane.b32.xlu2 %v4136_v20, %s3604_s4 }
 0x272   : > { %v848_v28 = vpop.f32.mrf.mxu0 }
 0x273   : > { %v4142_v11 = vpack.c.bf16 %v848_v28, %v848_v28 }
 0x275   : > { %887 = vst.msk [vmem:[#allocation2 + $0x30] sm:$0xf] %vm874_vm14, %v4142_v11  ;;  %1124 = vrot.lane.b32.xlu1 %v4142_v11, %s3604_s4 }
 0x27a   : > { %v850_v49 = vpop.f32.mrf.mxu0 }
 0x27b   : > { %v4148_v21 = vpack.c.bf16 %v850_v49, %v850_v49 }
 0x27d   : > { %888 = vst.msk [vmem:[#allocation2 + $0x34] sm:$0xf] %vm874_vm14, %v4148_v21  ;;  %1114 = vrot.lane.b32.xlu1 %v4112_v14, %s3604_s4  ;;  %1126 = vrot.lane.b32.xlu2 %v4148_v21, %s3604_s4 }
 0x285   : > { %1108 = vrot.lane.b32.xlu1 %v4091_v31, %s3604_s4 }
 0x28d   : > { %933 = vrot.lane.b32.xlu1 %v4148_v21, %s3605_s29 }
 0x295   : > { %927 = vrot.lane.b32.xlu1 %v4130_v45, %s3605_s29 }
 0x29d   : > { %1102 = vrot.lane.b32.xlu1 %v4064_v44, %s3604_s4 }
 0x2a5   : > { %1035 = vrot.lane.b32.xlu1 %v4053_v40, %s3606_s7 }
 0x2ad   : > { %921 = vrot.lane.b32.xlu1 %v4112_v14, %s3605_s29 }
 0x2b5   : > { %1039 = vrot.lane.b32.xlu1 %v4076_v15, %s3606_s7 }
 0x2bd   : > { %913 = vrot.lane.b32.xlu1 %v4085_v2, %s3605_s29 }
 0x2c5   : > { %1043 = vrot.lane.b32.xlu1 %v4091_v31, %s3606_s7 }
 0x2c7   : > { %v1117_v24 = vpop.permute.xlu1 %1116  ;;  %v1123_v25 = vpop.permute.xlu2 %1122 }
 0x2c8   : > { %1157 = vst.msk [vmem:[#allocation3 + $0x60] sm:$0xf] %vm874_vm14, %v1117_v24 }
 0x2c9   : > { %1160 = vst.msk [vmem:[#allocation3 + $0x6c] sm:$0xf] %vm874_vm14, %v1123_v25 }
 0x2cc   : > { %v853_v29 = vpop.f32.mrf.mxu0 }
 0x2cd   : > { %1049 = vrot.lane.b32.xlu1 %v4112_v14, %s3606_s7  ;;  %v4178_v23 = vpack.c.bf16 %v853_v29, %v853_v29 }
 0x2cf   : > { %v1119_v30 = vpop.permute.xlu0 %1118  ;;  %889 = vst.msk [vmem:[#allocation2 + $0x38] sm:$0xf] %vm874_vm14, %v4178_v23  ;;  %1128 = vrot.lane.b32.xlu2 %v4178_v23, %s3604_s4 }
 0x2d0   : > { %1158 = vst.msk [vmem:[#allocation3 + $0x64] sm:$0xf] %vm874_vm14, %v1119_v30 }
 0x2d4   : > { %v855_v19 = vpop.f32.mrf.mxu0 }
 0x2d5   : > { %1055 = vrot.lane.b32.xlu1 %v4130_v45, %s3606_s7  ;;  %v4187_v41 = vpack.c.bf16 %v855_v19, %v855_v19 }
 0x2d7   : > { %v1127_v35 = vpop.permute.xlu2 %1126  ;;  %v1121_v33 = vpop.permute.xlu0 %1120  ;;  %890 = vst.msk [vmem:[#allocation2 + $0x3c] sm:$0xf] %vm874_vm14, %v4187_v41  ;;  %1112 = vrot.lane.b32.xlu2 %v4104_v22, %s3604_s4  ;;  %1130 = vrot.lane.b32.xlu0 %v4187_v41, %s3604_s4 }
 0x2d8   : > { %1162 = vst.msk [vmem:[#allocation3 + $0x74] sm:$0xf] %vm874_vm14, %v1127_v35 }
 0x2d9   : > { %1159 = vst.msk [vmem:[#allocation3 + $0x68] sm:$0xf] %vm874_vm14, %v1121_v33 }
 0x2dd   : > { %1061 = vrot.lane.b32.xlu1 %v4148_v21, %s3606_s7 }
 0x2df   : > { %931 = vrot.lane.b32.xlu2 %v4142_v11, %s3605_s29  ;;  %935 = vrot.lane.b32.xlu0 %v4178_v23, %s3605_s29 }
 0x2e0   : > { %v3079_v58 = vld [vmem:[#allocation3 + $0x68] sm:$0xff] }
 0x2e1   : > { %v1597_v0 = vsel %vm1379_vm4, %v3079_v58, 0 }
 0x2e5   : > { %1189 = vrot.lane.b32.xlu1 %v4142_v11, %s3607_s12 }
 0x2e7   : > { %v1125_v36 = vpop.permute.xlu1 %1124  ;;  %1106 = vrot.lane.b32.xlu2 %v4085_v2, %s3604_s4  ;;  %1110 = vrot.lane.b32.xlu0 %v4099_v38, %s3604_s4 }
 0x2e8   : > { %1161 = vst.msk [vmem:[#allocation3 + $0x70] sm:$0xf] %vm874_vm14, %v1125_v36 }
 0x2ed   : > { %1187 = vrot.lane.b32.xlu1 %v4136_v20, %s3607_s12 }
 0x2ef   : > { %v1115_v48 = vpop.permute.xlu1 %1114  ;;  %1100 = vrot.lane.b32.xlu2 %v4053_v40, %s3604_s4  ;;  %1104 = vrot.lane.b32.xlu0 %v4076_v15, %s3604_s4  ;;  %s3519_s4 = sshra.s32 %s2647_s1, 4  ;;  %s3520_s4 = int_to_ptr.hbm [resolvable:$true] %s3519_s4 }
 0x2f0   : > { %1156 = vst.msk [vmem:[#allocation3 + $0x5c] sm:$0xf] %vm874_vm14, %v1115_v48  ;;  %s3521_s24 = scalar_lea.hbm %s3520_s4, 128  ;;  %p3526_p11 = scmp.lt.s32.totalorder %s3520_s4, %s4919_s6 }
 0x2f1   : > { %p3522_p1 = scmp.ne.s32.totalorder %s3520_s4, %s3521_s24 }
 0x2f3   : > { %p3523_p4 = pnand %p3522_p1, %p3736_p3 }
 0x2f5   : > { %1177 = vrot.lane.b32.xlu1 %v4104_v22, %s3607_s12  ;;  %p3524_p8 = pneg %p3523_p4 }
 0x2f7   : > { %v1109_v6 = vpop.permute.xlu1 %1108  ;;  %937 = vrot.lane.b32.xlu2 %v4187_v41, %s3605_s29  ;;  %929 = vrot.lane.b32.xlu0 %v4136_v20, %s3605_s29 }
 0x2f8   : > { %1153 = vst.msk [vmem:[#allocation3 + $0x50] sm:$0xf] %vm874_vm14, %v1109_v6 }
 0x2fd   : > { %1175 = vrot.lane.b32.xlu1 %v4099_v38, %s3607_s12 }
 0x2ff   : > { %v934_v39 = vpop.permute.xlu1 %933  ;;  %925 = vrot.lane.b32.xlu2 %v4124_v5, %s3605_s29  ;;  %923 = vrot.lane.b32.xlu0 %v4118_v16, %s3605_s29 }
 0x300   : > { %968 = vst.msk [vmem:[#allocation3 + $0x34] sm:$0xf] %vm874_vm14, %v934_v39 }
 0x305   : > { %1171 = vrot.lane.b32.xlu1 %v4085_v2, %s3607_s12 }
 0x307   : > { %v928_v62 = vpop.permute.xlu1 %927  ;;  %919 = vrot.lane.b32.xlu2 %v4104_v22, %s3605_s29  ;;  %1037 = vrot.lane.b32.xlu0 %v4064_v44, %s3606_s7 }
 0x308   : > { %965 = vst.msk [vmem:[#allocation3 + $0x28] sm:$0xf] %vm874_vm14, %v928_v62 }
 0x30d   : > { %999 = vrot.lane.b32.xlu1 %v4178_v23, %s3608_s14 }
 0x30f   : > { %v1103_v27 = vpop.permute.xlu1 %1102  ;;  %917 = vrot.lane.b32.xlu2 %v4099_v38, %s3605_s29  ;;  %915 = vrot.lane.b32.xlu0 %v4091_v31, %s3605_s29 }
 0x310   : > { %1150 = vst.msk [vmem:[#allocation3 + $0x44] sm:$0xf] %vm874_vm14, %v1103_v27 }
 0x315   : > { %995 = vrot.lane.b32.xlu1 %v4142_v11, %s3608_s14 }
 0x317   : > { %v1036_v42 = vpop.permute.xlu1 %1035  ;;  %911 = vrot.lane.b32.xlu2 %v4076_v15, %s3605_s29  ;;  %1041 = vrot.lane.b32.xlu0 %v4085_v2, %s3606_s7 }
 0x318   : > { %1084 = vst.msk [vmem:[#allocation2 + $0x40] sm:$0xf] %vm874_vm14, %v1036_v42 }
 0x31d   : > { %991 = vrot.lane.b32.xlu1 %v4130_v45, %s3608_s14 }
 0x31f   : > { %v922_v43 = vpop.permute.xlu1 %921  ;;  %909 = vrot.lane.b32.xlu2 %v4064_v44, %s3605_s29  ;;  %907 = vrot.lane.b32.xlu0 %v4053_v40, %s3605_s29 }
 0x320   : > { %962 = vst.msk [vmem:[#allocation3 + $0x1c] sm:$0xf] %vm874_vm14, %v922_v43 }
 0x325   : > { %983 = vrot.lane.b32.xlu1 %v4104_v22, %s3608_s14 }
 0x327   : > { %v1040_v10 = vpop.permute.xlu1 %1039  ;;  %1047 = vrot.lane.b32.xlu2 %v4104_v22, %s3606_s7  ;;  %1045 = vrot.lane.b32.xlu0 %v4099_v38, %s3606_s7  ;;  %v3080_v22 = vld [vmem:[#allocation3 + $0x70] sm:$0xff] }
 0x328   : > { %1086 = vst.msk [vmem:[#allocation2 + $0x48] sm:$0xf] %vm874_vm14, %v1040_v10  ;;  %v1600_v7 = vsel %vm1379_vm4, %v3080_v22, 0 }
 0x329   : > { %v1129_v47 = vpop.permute.xlu2 %1128 }
 0x32a   : > { %1163 = vst.msk [vmem:[#allocation3 + $0x78] sm:$0xf] %vm874_vm14, %v1129_v47 }
 0x32d   : > { %979 = vrot.lane.b32.xlu1 %v4091_v31, %s3608_s14 }
 0x32f   : > { %v914_v52 = vpop.permute.xlu1 %913  ;;  %1053 = vrot.lane.b32.xlu2 %v4124_v5, %s3606_s7  ;;  %1051 = vrot.lane.b32.xlu0 %v4118_v16, %s3606_s7 }
 0x330   : > { %958 = vst.msk [vmem:[#allocation3 + $0xc] sm:$0xf] %vm874_vm14, %v914_v52 }
 0x331   : > { %v1113_v53 = vpop.permute.xlu2 %1112 }
 0x332   : > { %1155 = vst.msk [vmem:[#allocation3 + $0x58] sm:$0xf] %vm874_vm14, %v1113_v53 }
 0x337   : > { %v1044_v54 = vpop.permute.xlu1 %1043  ;;  %1059 = vrot.lane.b32.xlu2 %v4142_v11, %s3606_s7  ;;  %1057 = vrot.lane.b32.xlu0 %v4136_v20, %s3606_s7 }
 0x338   : > { %1088 = vst.msk [vmem:[#allocation2 + $0x50] sm:$0xf] %vm874_vm14, %v1044_v54 }
 0x339   : > { %v932_v55 = vpop.permute.xlu2 %931 }
 0x33a   : > { %967 = vst.msk [vmem:[#allocation3 + $0x30] sm:$0xf] %vm874_vm14, %v932_v55 }
 0x33f   : > { %v1050_v56 = vpop.permute.xlu1 %1049  ;;  %1181 = vrot.lane.b32.xlu2 %v4118_v16, %s3607_s12  ;;  %1063 = vrot.lane.b32.xlu0 %v4178_v23, %s3606_s7 }
 0x340   : > { %1091 = vst.msk [vmem:[#allocation2 + $0x5c] sm:$0xf] %vm874_vm14, %v1050_v56 }
 0x341   : > { %v1107_v57 = vpop.permute.xlu2 %1106  ;;  %v3072_v13 = vld [vmem:[#allocation3 + $0x30] sm:$0xff] }
 0x342   : > { %1152 = vst.msk [vmem:[#allocation3 + $0x4c] sm:$0xf] %vm874_vm14, %v1107_v57  ;;  %v1423_v37 = vsel %vm1379_vm4, %v3072_v13, 0  ;;  %v3051_v13 = vld [vmem:[#allocation2 + $0x8] sm:$0xff] }
 0x347   : > { %v1056_v32 = vpop.permute.xlu1 %1055  ;;  %1173 = vrot.lane.b32.xlu2 %v4091_v31, %s3607_s12  ;;  %1193 = vrot.lane.b32.xlu0 %v4178_v23, %s3607_s12 }
 0x348   : > { %1094 = vst.msk [vmem:[#allocation2 + $0x68] sm:$0xf] %vm874_vm14, %v1056_v32 }
 0x349   : > { %v1101_v60 = vpop.permute.xlu2 %1100  ;;  %v1131_v61 = vpop.permute.xlu0 %1130 }
 0x34a   : > { %1149 = vst.msk [vmem:[#allocation3 + $0x40] sm:$0xf] %vm874_vm14, %v1101_v60 }
 0x34b   : > { %1164 = vst.msk [vmem:[#allocation3 + $0x7c] sm:$0xf] %vm874_vm14, %v1131_v61 }
 0x34f   : > { %v1062_v59 = vpop.permute.xlu1 %1061  ;;  %1169 = vrot.lane.b32.xlu2 %v4076_v15, %s3607_s12  ;;  %1191 = vrot.lane.b32.xlu0 %v4148_v21, %s3607_s12 }
 0x350   : > { %1097 = vst.msk [vmem:[#allocation2 + $0x74] sm:$0xf] %vm874_vm14, %v1062_v59 }
 0x351   : > { %v938_v63 = vpop.permute.xlu2 %937  ;;  %v936_v31 = vpop.permute.xlu0 %935 }
 0x352   : > { %970 = vst.msk [vmem:[#allocation3 + $0x3c] sm:$0xf] %vm874_vm14, %v938_v63  ;;  %v3081_v3 = vld [vmem:[#allocation3 + $0x78] sm:$0xff] }
 0x353   : > { %969 = vst.msk [vmem:[#allocation3 + $0x38] sm:$0xf] %vm874_vm14, %v936_v31  ;;  %v1603_v1 = vsel %vm1379_vm4, %v3081_v3, 0 }
 0x354   : > { %1605 = vmatpush.bf16.xpose.msra.mxu2 %v1603_v1 }
 0x357   : > { %v1190_v4 = vpop.permute.xlu1 %1189  ;;  %1167 = vrot.lane.b32.xlu2 %v4064_v44, %s3607_s12  ;;  %1185 = vrot.lane.b32.xlu0 %v4130_v45, %s3607_s12  ;;  %v3078_v45 = vld [vmem:[#allocation3 + $0x60] sm:$0xff] }
 0x358   : > { %1226 = vst.msk [vmem:[#allocation4 + $0x70] sm:$0xf] %vm874_vm14, %v1190_v4  ;;  %v1594_v11 = vsel %vm1379_vm4, %v3078_v45, 0 }
 0x359   : > { %v926_v50 = vpop.permute.xlu2 %925  ;;  %v1111_v34 = vpop.permute.xlu0 %1110 }
 0x35a   : > { %964 = vst.msk [vmem:[#allocation3 + $0x24] sm:$0xf] %vm874_vm14, %v926_v50  ;;  %v3073_v46 = vld [vmem:[#allocation3 + $0x38] sm:$0xff]  ;;  %v3050_v50 = vld [vmem:[#allocation2] sm:$0xff] }
 0x35b   : > { %1154 = vst.msk [vmem:[#allocation3 + $0x54] sm:$0xf] %vm874_vm14, %v1111_v34  ;;  %v1426_v26 = vsel %vm1379_vm4, %v3073_v46, 0 }
 0x35c   : > { %1428 = vmatpush.bf16.xpose.msra.mxu1 %v1426_v26  ;;  %1606 = vmatpush.bf16.xpose.msra.mxu2 %v1600_v7 }
 0x35f   : > { %v1188_v9 = vpop.permute.xlu1 %1187  ;;  %997 = vrot.lane.b32.xlu2 %v4148_v21, %s3608_s14  ;;  %1183 = vrot.lane.b32.xlu0 %v4124_v5, %s3607_s12 }
 0x360   : > { %1225 = vst.msk [vmem:[#allocation4 + $0x6c] sm:$0xf] %vm874_vm14, %v1188_v9 }
 0x361   : > { %v920_v12 = vpop.permute.xlu2 %919  ;;  %v1105_v51 = vpop.permute.xlu0 %1104 }
 0x362   : > { %961 = vst.msk [vmem:[#allocation3 + $0x18] sm:$0xf] %vm874_vm14, %v920_v12 }
 0x363   : > { %1151 = vst.msk [vmem:[#allocation3 + $0x48] sm:$0xf] %vm874_vm14, %v1105_v51 }
 0x364   : > { %1429 = vmatpush.bf16.xpose.msra.mxu1 %v1423_v37  ;;  %1607 = vmatpush.bf16.xpose.msra.mxu2 %v1597_v0 }
 0x367   : > { %v1178_v18 = vpop.permute.xlu1 %1177  ;;  %993 = vrot.lane.b32.xlu2 %v4136_v20, %s3608_s14  ;;  %1179 = vrot.lane.b32.xlu0 %v4112_v14, %s3607_s12  ;;  %v3077_v20 = vld [vmem:[#allocation3 + $0x58] sm:$0xff] }
 0x368   : > { %1220 = vst.msk [vmem:[#allocation4 + $0x58] sm:$0xf] %vm874_vm14, %v1178_v18  ;;  %v1591_v23 = vsel %vm1379_vm4, %v3077_v20, 0  ;;  %v3052_v18 = vld [vmem:[#allocation2 + $0x10] sm:$0xff]  ;;  %v3053_v20 = vld [vmem:[#allocation2 + $0x18] sm:$0xff] }
 0x369   : > { %v918_v17 = vpop.permute.xlu2 %917  ;;  %v930_v28 = vpop.permute.xlu0 %929 }
 0x36a   : > { %960 = vst.msk [vmem:[#allocation3 + $0x14] sm:$0xf] %vm874_vm14, %v918_v17 }
 0x36b   : > { %966 = vst.msk [vmem:[#allocation3 + $0x2c] sm:$0xf] %vm874_vm14, %v930_v28 }
 0x36c   : > { %1608 = vmatpush.bf16.xpose.msra.mxu2 %v1594_v11 }
 0x36f   : > { %v1176_v49 = vpop.permute.xlu1 %1175  ;;  %989 = vrot.lane.b32.xlu2 %v4124_v5, %s3608_s14  ;;  %1165 = vrot.lane.b32.xlu0 %v4053_v40, %s3607_s12  ;;  %v3076_v5 = vld [vmem:[#allocation3 + $0x50] sm:$0xff] }
 0x370   : > { %1219 = vst.msk [vmem:[#allocation4 + $0x54] sm:$0xf] %vm874_vm14, %v1176_v49  ;;  %v1588_v48 = vsel %vm1379_vm4, %v3076_v5, 0 }
 0x371   : > { %v912_v21 = vpop.permute.xlu2 %911  ;;  %v924_v24 = vpop.permute.xlu0 %923 }
 0x372   : > { %957 = vst.msk [vmem:[#allocation3 + $0x8] sm:$0xf] %vm874_vm14, %v912_v21  ;;  %v3071_v25 = vld [vmem:[#allocation3 + $0x28] sm:$0xff] }
 0x373   : > { %963 = vst.msk [vmem:[#allocation3 + $0x20] sm:$0xf] %vm874_vm14, %v924_v24  ;;  %v1420_v29 = vsel %vm1379_vm4, %v3071_v25, 0 }
 0x374   : > { %1430 = vmatpush.bf16.xpose.msra.mxu1 %v1420_v29  ;;  %1609 = vmatpush.bf16.xpose.msra.mxu2 %v1591_v23 }
 0x377   : > { %v1172_v30 = vpop.permute.xlu1 %1171  ;;  %985 = vrot.lane.b32.xlu2 %v4112_v14, %s3608_s14  ;;  %987 = vrot.lane.b32.xlu0 %v4118_v16, %s3608_s14  ;;  %v3069_v14 = vld [vmem:[#allocation3 + $0x18] sm:$0xff]  ;;  %v3075_v16 = vld [vmem:[#allocation3 + $0x48] sm:$0xff] }
 0x378   : > { %1217 = vst.msk [vmem:[#allocation4 + $0x4c] sm:$0xf] %vm874_vm14, %v1172_v30  ;;  %v1414_v27 = vsel %vm1379_vm4, %v3069_v14, 0  ;;  %v1585_v42 = vsel %vm1379_vm4, %v3075_v16, 0  ;;  %v3054_v30 = vld [vmem:[#allocation2 + $0x20] sm:$0xff]  ;;  %v3055_v14 = vld [vmem:[#allocation2 + $0x28] sm:$0xff] }
 0x379   : > { %v910_v19 = vpop.permute.xlu2 %909  ;;  %v1038_v35 = vpop.permute.xlu0 %1037  ;;  %v3067_v56 = vld [vmem:[#allocation3 + $0x8] sm:$0xff] }
 0x37a   : > { %956 = vst.msk [vmem:[#allocation3 + $0x4] sm:$0xf] %vm874_vm14, %v910_v19  ;;  %v3070_v33 = vld [vmem:[#allocation3 + $0x20] sm:$0xff]  ;;  %v1408_v61 = vsel %vm1379_vm4, %v3067_v56, 0 }
 0x37b   : > { %1085 = vst.msk [vmem:[#allocation2 + $0x44] sm:$0xf] %vm874_vm14, %v1038_v35  ;;  %v1417_v36 = vsel %vm1379_vm4, %v3070_v33, 0 }
 0x37c   : > { %1431 = vmatpush.bf16.xpose.msra.mxu1 %v1417_v36  ;;  %1610 = vmatpush.bf16.xpose.msra.mxu2 %v1588_v48 }
 0x37f   : > { %v1000_v6 = vpop.permute.xlu1 %999  ;;  %1065 = vrot.lane.b32.xlu2 %v4187_v41, %s3606_s7  ;;  %981 = vrot.lane.b32.xlu0 %v4099_v38, %s3608_s14  ;;  %v3074_v38 = vld [vmem:[#allocation3 + $0x40] sm:$0xff] }
 0x380   : > { %1033 = vst.msk [vmem:[#allocation4 + $0x38] sm:$0xf] %vm874_vm14, %v1000_v6  ;;  %v1582_v54 = vsel %vm1379_vm4, %v3074_v38, 0 }
 0x381   : > { %v1048_v39 = vpop.permute.xlu2 %1047  ;;  %v916_v62 = vpop.permute.xlu0 %915 }
 0x382   : > { %1090 = vst.msk [vmem:[#allocation2 + $0x58] sm:$0xf] %vm874_vm14, %v1048_v39  ;;  %v3058_v60 = vld [vmem:[#allocation2 + $0x40] sm:$0xff] }
 0x383   : > { %959 = vst.msk [vmem:[#allocation3 + $0x10] sm:$0xf] %vm874_vm14, %v916_v62 }
 0x384   : > { %1432 = vmatpush.bf16.xpose.msra.mxu1 %v1414_v27  ;;  %1611 = vmatpush.bf16.xpose.msra.mxu2 %v1585_v42 }
 0x387   : > { %v996_v43 = vpop.permute.xlu1 %995  ;;  %1195 = vrot.lane.b32.xlu2 %v4187_v41, %s3607_s12  ;;  %s3525_s12 = scalar_lea.hbm %s4919_s6, 256 }
 0x388   : > { %1031 = vst.msk [vmem:[#allocation4 + $0x30] sm:$0xf] %vm874_vm14, %v996_v43  ;;  %p3527_p12 = scmp.lt.s32.totalorder %s3525_s12, %s3521_s24 }
 0x389   : > { %v1054_v10 = vpop.permute.xlu2 %1053  ;;  %v1042_v47 = vpop.permute.xlu0 %1041  ;;  %v3061_v45 = vld [vmem:[#allocation2 + $0x58] sm:$0xff] }
 0x38a   : > { %1093 = vst.msk [vmem:[#allocation2 + $0x64] sm:$0xf] %vm874_vm14, %v1054_v10  ;;  %v3068_v52 = vld [vmem:[#allocation3 + $0x10] sm:$0xff]  ;;  %p3528_p13 = por %p3527_p12, %p3526_p11 }
 0x38b   : > { %1087 = vst.msk [vmem:[#allocation2 + $0x4c] sm:$0xf] %vm874_vm14, %v1042_v47  ;;  %v1411_v53 = vsel %vm1379_vm4, %v3068_v52, 0  ;;  %v3056_v52 = vld [vmem:[#allocation2 + $0x30] sm:$0xff] }
 0x38c   : > { %1433 = vmatpush.bf16.xpose.msra.mxu1 %v1411_v53  ;;  %1612 = vmatpush.bf16.xpose.msra.mxu2 %v1582_v54  ;;  %p3529_p0 = pnand %p3528_p13, %p3524_p8 }
 0x38f   : > { %v992_v55 = vpop.permute.xlu1 %991  ;;  %1001 = vrot.lane.b32.xlu2 %v4187_v41, %s3608_s14 }
 0x390   : > { %1029 = vst.msk [vmem:[#allocation4 + $0x28] sm:$0xf] %vm874_vm14, %v992_v55 }
 0x391   : > { %v1060_v57 = vpop.permute.xlu2 %1059  ;;  %v908_v32 = vpop.permute.xlu0 %907 }
 0x392   : > { %1096 = vst.msk [vmem:[#allocation2 + $0x70] sm:$0xf] %vm874_vm14, %v1060_v57  ;;  %v3059_v34 = vld [vmem:[#allocation2 + $0x48] sm:$0xff]  ;;  %v3057_v57 = vld [vmem:[#allocation2 + $0x38] sm:$0xff] }
 0x393   : > { %955 = vst.msk [vmem:[#allocation3] sm:$0xf] %vm874_vm14, %v908_v32  ;;  %2948 = vmatmul.msk.bf16.vlgmr.msra.gmra.mxu2 %vm1379_vm4, %v3058_v60 }
 0x394   : > { %1434 = vmatpush.bf16.xpose.msra.mxu1 %v1408_v61 }
 0x397   : > { %v984_v59 = vpop.permute.xlu1 %983 }
 0x398   : > { %1025 = vst.msk [vmem:[#allocation4 + $0x18] sm:$0xf] %vm874_vm14, %v984_v59 }
 0x399   : > { %v1182_v63 = vpop.permute.xlu2 %1181  ;;  %v1046_v31 = vpop.permute.xlu0 %1045  ;;  %v3064_v16 = vld [vmem:[#allocation2 + $0x70] sm:$0xff] }
 0x39a   : > { %1222 = vst.msk [vmem:[#allocation4 + $0x60] sm:$0xf] %vm874_vm14, %v1182_v63  ;;  %v3066_v41 = vld [vmem:[#allocation3] sm:$0xff] }
 0x39b   : > { %1089 = vst.msk [vmem:[#allocation2 + $0x54] sm:$0xf] %vm874_vm14, %v1046_v31  ;;  %v1405_v3 = vsel %vm1379_vm4, %v3066_v41, 0 }
 0x39c   : > { %1435 = vmatpush.bf16.xpose.msra.mxu1 %v1405_v3 }
 0x39f   : > { %v980_v1 = vpop.permute.xlu1 %979 }
 0x3a0   : > { %1023 = vst.msk [vmem:[#allocation4 + $0x10] sm:$0xf] %vm874_vm14, %v980_v1 }
 0x3a1   : > { %v1174_v4 = vpop.permute.xlu2 %1173  ;;  %v1052_v22 = vpop.permute.xlu0 %1051 }
 0x3a2   : > { %1218 = vst.msk [vmem:[#allocation4 + $0x50] sm:$0xf] %vm874_vm14, %v1174_v4  ;;  %v3060_v58 = vld [vmem:[#allocation2 + $0x50] sm:$0xff] }
 0x3a3   : > { %1092 = vst.msk [vmem:[#allocation2 + $0x60] sm:$0xf] %vm874_vm14, %v1052_v22  ;;  %2876 = vmatmul.msk.bf16.vlgmr.msra.gmra.mxu1 %vm1379_vm4, %v3050_v50  ;;  %2949 = vmatmul.msk.bf16.gmra.mxu2 %vm1379_vm4, %v3059_v34 }
 0x3a9   : > { %v1170_v46 = vpop.permute.xlu2 %1169  ;;  %v1058_v26 = vpop.permute.xlu0 %1057  ;;  %v3092_v10 = vld [vmem:[#allocation4 + $0x50] sm:$0xff] }
 0x3aa   : > { %1216 = vst.msk [vmem:[#allocation4 + $0x48] sm:$0xf] %vm874_vm14, %v1170_v46  ;;  %v3062_v21 = vld [vmem:[#allocation2 + $0x60] sm:$0xff] }
 0x3ab   : > { %1095 = vst.msk [vmem:[#allocation2 + $0x6c] sm:$0xf] %vm874_vm14, %v1058_v26 }
 0x3b1   : > { %v1168_v7 = vpop.permute.xlu2 %1167  ;;  %v1064_v9 = vpop.permute.xlu0 %1063  ;;  %v3091_v54 = vld [vmem:[#allocation4 + $0x48] sm:$0xff] }
 0x3b2   : > { %1215 = vst.msk [vmem:[#allocation4 + $0x44] sm:$0xf] %vm874_vm14, %v1168_v7  ;;  %v3063_v5 = vld [vmem:[#allocation2 + $0x68] sm:$0xff] }
 0x3b3   : > { %1098 = vst.msk [vmem:[#allocation2 + $0x78] sm:$0xf] %vm874_vm14, %v1064_v9  ;;  %2877 = vmatmul.msk.bf16.gmra.mxu1 %vm1379_vm4, %v3051_v13  ;;  %2950 = vmatmul.msk.bf16.gmra.mxu2 %vm1379_vm4, %v3060_v58 }
 0x3b9   : > { %v998_v12 = vpop.permute.xlu2 %997  ;;  %v1194_v51 = vpop.permute.xlu0 %1193 }
 0x3ba   : > { %1032 = vst.msk [vmem:[#allocation4 + $0x34] sm:$0xf] %vm874_vm14, %v998_v12 }
 0x3bb   : > { %1228 = vst.msk [vmem:[#allocation4 + $0x78] sm:$0xf] %vm874_vm14, %v1194_v51 }
 0x3c1   : > { %v994_v37 = vpop.permute.xlu2 %993  ;;  %v1192_v0 = vpop.permute.xlu0 %1191  ;;  %v3088_v62 = vld [vmem:[#allocation4 + $0x30] sm:$0xff] }
 0x3c2   : > { %1030 = vst.msk [vmem:[#allocation4 + $0x2c] sm:$0xf] %vm874_vm14, %v994_v37 }
 0x3c3   : > { %1227 = vst.msk [vmem:[#allocation4 + $0x74] sm:$0xf] %vm874_vm14, %v1192_v0  ;;  %2878 = vmatmul.msk.bf16.gmra.mxu1 %vm1379_vm4, %v3052_v18  ;;  %2951 = vmatmul.msk.bf16.gmra.mxu2 %vm1379_vm4, %v3061_v45 }
 0x3c9   : > { %v990_v17 = vpop.permute.xlu2 %989  ;;  %v1186_v28 = vpop.permute.xlu0 %1185  ;;  %v3087_v42 = vld [vmem:[#allocation4 + $0x28] sm:$0xff] }
 0x3ca   : > { %1028 = vst.msk [vmem:[#allocation4 + $0x24] sm:$0xf] %vm874_vm14, %v990_v17  ;;  %v3096_v36 = vld [vmem:[#allocation4 + $0x70] sm:$0xff] }
 0x3cb   : > { %1224 = vst.msk [vmem:[#allocation4 + $0x68] sm:$0xf] %vm874_vm14, %v1186_v28 }
 0x3d1   : > { %v986_v11 = vpop.permute.xlu2 %985  ;;  %v1184_v49 = vpop.permute.xlu0 %1183 }
 0x3d2   : > { %1026 = vst.msk [vmem:[#allocation4 + $0x1c] sm:$0xf] %vm874_vm14, %v986_v11  ;;  %v3095_v39 = vld [vmem:[#allocation4 + $0x68] sm:$0xff] }
 0x3d3   : > { %1223 = vst.msk [vmem:[#allocation4 + $0x64] sm:$0xf] %vm874_vm14, %v1184_v49  ;;  %2879 = vmatmul.msk.bf16.gmra.mxu1 %vm1379_vm4, %v3053_v20  ;;  %2952 = vmatmul.msk.bf16.gmra.mxu2 %vm1379_vm4, %v3062_v21 }
 0x3d9   : > { %v1066_v24 = vpop.permute.xlu2 %1065  ;;  %v1180_v25 = vpop.permute.xlu0 %1179  ;;  %v3085_v47 = vld [vmem:[#allocation4 + $0x18] sm:$0xff] }
 0x3da   : > { %1099 = vst.msk [vmem:[#allocation2 + $0x7c] sm:$0xf] %vm874_vm14, %v1066_v24  ;;  %v3094_v27 = vld [vmem:[#allocation4 + $0x60] sm:$0xff] }
 0x3db   : > { %1221 = vst.msk [vmem:[#allocation4 + $0x5c] sm:$0xf] %vm874_vm14, %v1180_v25 }
 0x3e1   : > { %v1196_v29 = vpop.permute.xlu2 %1195  ;;  %v1166_v23 = vpop.permute.xlu0 %1165  ;;  %v3065_v53 = vld [vmem:[#allocation2 + $0x78] sm:$0xff] }
 0x3e2   : > { %1229 = vst.msk [vmem:[#allocation4 + $0x7c] sm:$0xf] %vm874_vm14, %v1196_v29  ;;  %v3093_v43 = vld [vmem:[#allocation4 + $0x58] sm:$0xff] }
 0x3e3   : > { %1214 = vst.msk [vmem:[#allocation4 + $0x40] sm:$0xf] %vm874_vm14, %v1166_v23  ;;  %2880 = vmatmul.msk.bf16.gmra.mxu1 %vm1379_vm4, %v3054_v30  ;;  %2953 = vmatmul.msk.bf16.gmra.mxu2 %vm1379_vm4, %v3063_v5 }
 0x3e9   : > { %v1002_v19 = vpop.permute.xlu2 %1001  ;;  %v988_v35 = vpop.permute.xlu0 %987  ;;  %v3097_v33 = vld [vmem:[#allocation4 + $0x78] sm:$0xff] }
 0x3ea   : > { %1034 = vst.msk [vmem:[#allocation4 + $0x3c] sm:$0xf] %vm874_vm14, %v1002_v19  ;;  %2316 = vmatpush.bf16.msrb.mxu0 %v3097_v33  ;;  %3109 = vmatpush.bf16.msrb.mxu1 %v3097_v33  ;;  %v3090_v56 = vld [vmem:[#allocation4 + $0x40] sm:$0xff] }
 0x3eb   : > { %1027 = vst.msk [vmem:[#allocation4 + $0x20] sm:$0xf] %vm874_vm14, %v988_v35 }
 0x3ee   : > { %2317 = vmatpush.bf16.msrb.mxu0 %v3096_v36  ;;  %3110 = vmatpush.bf16.msrb.mxu1 %v3096_v36 }
 0x3f1   : > { %v982_v48 = vpop.permute.xlu0 %981  ;;  %v3089_v6 = vld [vmem:[#allocation4 + $0x38] sm:$0xff] }
 0x3f2   : > { %1024 = vst.msk [vmem:[#allocation4 + $0x14] sm:$0xf] %vm874_vm14, %v982_v48  ;;  %2171 = vmatpush.bf16.msrb.mxu2 %v3089_v6  ;;  %3101 = vmatpush.bf16.msra.mxu3 %v3089_v6  ;;  %v3086_v38 = vld [vmem:[#allocation4 + $0x20] sm:$0xff] }
 0x3f3   : > { %2881 = vmatmul.msk.bf16.gmra.mxu1 %vm1379_vm4, %v3055_v14  ;;  %2954 = vmatmul.msk.bf16.gmra.mxu2 %vm1379_vm4, %v3064_v16 }
 0x3f4   : > { %2318 = vmatpush.bf16.msrb.mxu0 %v3095_v39  ;;  %3111 = vmatpush.bf16.msrb.mxu1 %v3095_v39 }
 0x3f6   : > { %2172 = vmatpush.bf16.msrb.mxu2 %v3088_v62  ;;  %3102 = vmatpush.bf16.msra.mxu3 %v3088_v62 }
 0x3f8   : > { %2319 = vmatpush.bf16.msrb.mxu0 %v3094_v27  ;;  %3112 = vmatpush.bf16.msrb.mxu1 %v3094_v27 }
 0x3f9   : > { %v3084_v55 = vld [vmem:[#allocation4 + $0x10] sm:$0xff] }
 0x3fa   : > { %2173 = vmatpush.bf16.msrb.mxu2 %v3087_v42  ;;  %3103 = vmatpush.bf16.msra.mxu3 %v3087_v42 }
 0x3fc   : > { %2320 = vmatpush.bf16.msrb.mxu0 %v3093_v43  ;;  %3113 = vmatpush.bf16.msrb.mxu1 %v3093_v43 }
 0x3fe   : > { %2174 = vmatpush.bf16.msrb.mxu2 %v3086_v38  ;;  %3104 = vmatpush.bf16.msra.mxu3 %v3086_v38 }
 0x400   : > { %2321 = vmatpush.bf16.msrb.mxu0 %v3092_v10  ;;  %3114 = vmatpush.bf16.msrb.mxu1 %v3092_v10 }
 0x402   : > { %2175 = vmatpush.bf16.msrb.mxu2 %v3085_v47  ;;  %3105 = vmatpush.bf16.msra.mxu3 %v3085_v47 }
 0x403   : > { %2882 = vmatmul.msk.bf16.gmra.mxu1 %vm1379_vm4, %v3056_v52  ;;  %2955 = vmatmul.msk.bf16.gmra.mxu2 %vm1379_vm4, %v3065_v53 }
 0x404   : > { %2322 = vmatpush.bf16.msrb.mxu0 %v3091_v54  ;;  %3115 = vmatpush.bf16.msrb.mxu1 %v3091_v54 }
 0x406   : > { %2176 = vmatpush.bf16.msrb.mxu2 %v3084_v55  ;;  %3106 = vmatpush.bf16.msra.mxu3 %v3084_v55 }
 0x408   : > { %2323 = vmatpush.bf16.msrb.mxu0 %v3090_v56  ;;  %3116 = vmatpush.bf16.msrb.mxu1 %v3090_v56 }
 0x413   : > { %2883 = vmatmul.msk.bf16.gmra.mxu1 %vm1379_vm4, %v3057_v57 }
 0x416   : > { %v1614_v32 = vpop.f32.mrf.mxu2 }
 0x417   : > { %v1670_v60 = vmul.f32 0.25, %v1614_v32 }
 0x419   : > { %v4413_v61 = vsel %vm1688_vm5, %v1670_v60, -1e+30 }
 0x41a   : > { %1755 = vmax.xlane.f32.xlu1 %v4413_v61 }
 0x41e   : > { %v1616_v59 = vpop.f32.mrf.mxu2 }
 0x41f   : > { %v1671_v26 = vmul.f32 0.25, %v1616_v59 }
 0x420   : > { %v1437_v63 = vpop.f32.mrf.mxu1 }
 0x421   : > { %v1654_v31 = vmul.f32 0.25, %v1437_v63  ;;  %v4438_v58 = vsel %vm1688_vm5, %v1671_v26, -1e+30 }
 0x423   : > { %v4418_v41 = vsel %vm1688_vm5, %v1654_v31, -1e+30 }
 0x424   : > { %1723 = vmax.xlane.f32.xlu2 %v4418_v41 }
 0x426   : > { %v1619_v3 = vpop.f32.mrf.mxu2 }
 0x427   : > { %v1672_v1 = vmul.f32 0.25, %v1619_v3 }
 0x428   : > { %v1439_v4 = vpop.f32.mrf.mxu1 }
 0x429   : > { %v1655_v22 = vmul.f32 0.25, %v1439_v4  ;;  %v4423_v50 = vsel %vm1688_vm5, %v1672_v1, -1e+30 }
 0x42b   : > { %v4427_v34 = vsel %vm1688_vm5, %v1655_v22, -1e+30 }
 0x42c   : > { %1759 = vmax.xlane.f32.xlu2 %v4423_v50  ;;  %1725 = vmax.xlane.f32.xlu0 %v4427_v34 }
 0x42e   : > { %v1621_v46 = vpop.f32.mrf.mxu2 }
 0x42f   : > { %v1673_v7 = vmul.f32 0.25, %v1621_v46 }
 0x430   : > { %v1442_v9 = vpop.f32.mrf.mxu1 }
 0x431   : > { %v4433_v13 = vsel %vm1688_vm5, %v1673_v7, -1e+30  ;;  %v1656_v51 = vmul.f32 0.25, %v1442_v9 }
 0x432   : > { %1761 = vmax.xlane.f32.xlu1 %v4433_v13 }
 0x433   : > { %v4448_v17 = vsel %vm1688_vm5, %v1656_v51, -1e+30 }
 0x434   : > { %1757 = vmax.xlane.f32.xlu0 %v4438_v58 }
 0x436   : > { %v1624_v12 = vpop.f32.mrf.mxu2 }
 0x437   : > { %v1674_v37 = vmul.f32 0.25, %v1624_v12 }
 0x438   : > { %v1444_v0 = vpop.f32.mrf.mxu1 }
 0x439   : > { %v1657_v18 = vmul.f32 0.25, %v1444_v0  ;;  %v4443_v45 = vsel %vm1688_vm5, %v1674_v37, -1e+30 }
 0x43a   : > { %1763 = vmax.xlane.f32.xlu1 %v4443_v45 }
 0x43b   : > { %v4452_v28 = vsel %vm1688_vm5, %v1657_v18, -1e+30 }
 0x43c   : > { %1727 = vmax.xlane.f32.xlu0 %v4448_v17  ;;  %1729 = vmax.xlane.f32.xlu2 %v4452_v28 }
 0x43e   : > { %v1626_v11 = vpop.f32.mrf.mxu2 }
 0x43f   : > { %v1675_v49 = vmul.f32 0.25, %v1626_v11 }
 0x440   : > { %v1447_v20 = vpop.f32.mrf.mxu1 }
 0x441   : > { %v1658_v21 = vmul.f32 0.25, %v1447_v20  ;;  %v4462_v25 = vsel %vm1688_vm5, %v1675_v49, -1e+30 }
 0x443   : > { %v4458_v24 = vsel %vm1688_vm5, %v1658_v21, -1e+30 }
 0x444   : > { %1731 = vmax.xlane.f32.xlu0 %v4458_v24  ;;  %1765 = vmax.xlane.f32.xlu2 %v4462_v25 }
 0x446   : > { %v1629_v29 = vpop.f32.mrf.mxu2 }
 0x447   : > { %v1676_v35 = vmul.f32 0.25, %v1629_v29 }
 0x448   : > { %v1449_v23 = vpop.f32.mrf.mxu1 }
 0x449   : > { %v1659_v30 = vmul.f32 0.25, %v1449_v23  ;;  %v4482_v16 = vsel %vm1688_vm5, %v1676_v35, -1e+30 }
 0x44b   : > { %v4468_v5 = vsel %vm1688_vm5, %v1659_v30, -1e+30 }
 0x44c   : > { %1733 = vmax.xlane.f32.xlu1 %v4468_v5 }
 0x44e   : > { %v1631_v19 = vpop.f32.mrf.mxu2 }
 0x44f   : > { %v1677_v33 = vmul.f32 0.25, %v1631_v19 }
 0x450   : > { %v1452_v36 = vpop.f32.mrf.mxu1 }
 0x451   : > { %v1660_v48 = vmul.f32 0.25, %v1452_v36  ;;  %v4473_v6 = vsel %vm1688_vm5, %v1677_v33, -1e+30 }
 0x452   : > { %1769 = vmax.xlane.f32.xlu0 %v4473_v6 }
 0x453   : > { %v4478_v14 = vsel %vm1688_vm5, %v1660_v48, -1e+30 }
 0x454   : > { %1735 = vmax.xlane.f32.xlu2 %v4478_v14  ;;  %1767 = vmax.xlane.f32.xlu1 %v4482_v16 }
 0x456   : > { %v1634_v39 = vpop.f32.mrf.mxu2 }
 0x457   : > { %v1678_v57 = vmul.f32 0.25, %v1634_v39 }
 0x458   : > { %v1454_v52 = vpop.f32.mrf.mxu1 }
 0x459   : > { %v1661_v53 = vmul.f32 0.25, %v1454_v52 }
 0x45b   : > { %v4504_v55 = vsel %vm1688_vm5, %v1661_v53, -1e+30 }
 0x45e   : > { %v1636_v62 = vpop.f32.mrf.mxu2 }
 0x45f   : > { %v1679_v27 = vmul.f32 0.25, %v1636_v62 }
 0x460   : > { %v1457_v63 = vpop.f32.mrf.mxu1 }
 0x461   : > { %v4488_v42 = vsel %vm1688_vm5, %v1679_v27, -1e+30  ;;  %v1662_v51 = vmul.f32 0.25, %v1457_v63 }
 0x462   : > { %1773 = vmax.xlane.f32.xlu0 %v4488_v42 }
 0x463   : > { %v4541_v11 = vsel %vm1688_vm5, %v1662_v51, -1e+30 }
 0x466   : > { %v1639_v43 = vpop.f32.mrf.mxu2 }
 0x467   : > { %v1680_v38 = vmul.f32 0.25, %v1639_v43 }
 0x468   : > { %v4533_v37 = vpop.f32.mrf.mxu1 }
 0x469   : > { %v4493_v10 = vsel %vm1688_vm5, %v1680_v38, -1e+30 }
 0x46a   : > { %1775 = vmax.xlane.f32.xlu0 %v4493_v10 }
 0x46c   : > { %977 = vrot.lane.b32.xlu2 %v4085_v2, %s3608_s14 }
 0x46d   : > { %975 = vrot.lane.b32.xlu1 %v4076_v15, %s3608_s14 }
 0x46e   : > { %v1641_v47 = vpop.f32.mrf.mxu2 }
 0x46f   : > { %v1681_v1 = vmul.f32 0.25, %v1641_v47 }
 0x470   : > { %v4547_v19 = vpop.f32.mrf.mxu1 }
 0x471   : > { %v4525_v26 = vsel %vm1688_vm5, %v1681_v1, -1e+30 }
 0x474   : > { %971 = vrot.lane.b32.xlu2 %v4053_v40, %s3608_s14  ;;  %v4511_v40 = vsel %vm1688_vm5, %v1678_v57, -1e+30 }
 0x476   : > { %v1644_v54 = vpop.f32.mrf.mxu2 }
 0x477   : > { %v1682_v60 = vmul.f32 0.25, %v1644_v54 }
 0x479   : > { %v4516_v31 = vsel %vm1688_vm5, %v1682_v60, -1e+30 }
 0x47e   : > { %v1646_v3 = vpop.f32.mrf.mxu2 }
 0x48d   : > { %v1756_v32 = vpop.xlane.xlu1 %1755 }
 0x48e   : > { %v1803_v59 = vsub.f32 %v4413_v61, %v1756_v32  ;;  %v1683_v61 = vmul.f32 0.25, %v1646_v3 }
 0x490   : > { %v1851_v4 = vmul.f32 1.442695, %v1803_v59  ;;  %v4530_v7 = vsel %vm1688_vm5, %v1683_v61, -1e+30 }
 0x497   : > { %v1724_v56 = vpop.xlane.xlu2 %1723  ;;  %1737 = vmax.xlane.f32.xlu1 %v4504_v55 }
 0x498   : > { %v1787_v2 = vsub.f32 %v4418_v41, %v1724_v56 }
 0x49a   : > { %v1819_v15 = vmul.f32 1.442695, %v1787_v2 }
 0x49c   : > { %3257 = vpow2.f32 %v1819_v15 }
 0x49d   : > { %1771 = vmax.xlane.f32.xlu2 %v4511_v40  ;;  %3259 = vpow2.f32 %v1851_v4 }
 0x49f   : > { %1779 = vmax.xlane.f32.xlu1 %v4516_v31  ;;  %v1726_v41 = vpop.xlane.xlu0 %1725  ;;  %v1760_v9 = vpop.xlane.xlu2 %1759 }
 0x4a0   : > { %v1788_v46 = vsub.f32 %v4427_v34, %v1726_v41  ;;  %v1805_v33 = vsub.f32 %v4423_v50, %v1760_v9  ;;  %v1464_v50 = vpop.f32.mrf.mxu1 }
 0x4a1   : > { %v1665_v52 = vmul.f32 0.25, %v1464_v50 }
 0x4a2   : > { %v4519_v22 = vpop.eup %3257  ;;  %v1821_v0 = vmul.f32 1.442695, %v1788_v46  ;;  %v1649_v46 = vpop.f32.mrf.mxu2 }
 0x4a3   : > { %1883 = vadd.xlane.f32.xlu0 %v4519_v22  ;;  %v4535_v18 = vpop.eup %3259  ;;  %v1684_v51 = vmul.f32 0.25, %v1649_v46 }
 0x4a4   : > { %3261 = vpow2.f32 %v1821_v0 }
 0x4a5   : > { %1777 = vmax.xlane.f32.xlu2 %v4525_v26  ;;  %v1762_v49 = vpop.xlane.xlu1 %1761 }
 0x4a6   : > { %v1806_v43 = vsub.f32 %v4433_v13, %v1762_v49  ;;  %v4570_v13 = vsel %vm1688_vm5, %v1665_v52, -1e+30 }
 0x4a7   : > { %1781 = vmax.xlane.f32.xlu1 %v4530_v7  ;;  %v1758_v12 = vpop.xlane.xlu0 %1757 }
 0x4a8   : > { %v1804_v34 = vsub.f32 %v4438_v58, %v1758_v12  ;;  %v1855_v58 = vmul.f32 1.442695, %v1805_v33  ;;  %v1857_v53 = vmul.f32 1.442695, %v1806_v43  ;;  %v1467_v33 = vpop.f32.mrf.mxu1 }
 0x4aa   : > { %v1853_v29 = vmul.f32 1.442695, %v1804_v34  ;;  %v4545_v30 = vpop.eup %3261 }
 0x4ab   : > { %1915 = vadd.xlane.f32.xlu0 %v4535_v18 }
 0x4ac   : > { %3263 = vpow2.f32 %v1853_v29 }
 0x4ad   : > { %1739 = vmax.xlane.f32.xlu2 %v4541_v11  ;;  %v4551_v36 = vpop.xlane.xlu1 %1763 }
 0x4af   : > { %v1730_v20 = vpop.xlane.xlu2 %1729  ;;  %v1728_v21 = vpop.xlane.xlu0 %1727 }
 0x4b0   : > { %v1789_v23 = vsub.f32 %v4448_v17, %v1728_v21  ;;  %v1790_v38 = vsub.f32 %v4452_v28, %v1730_v20  ;;  %v4594_v20 = vsel %vm1688_vm5, %v1684_v51, -1e+30  ;;  %v1469_v52 = vpop.f32.mrf.mxu1 }
 0x4b2   : > { %v1823_v35 = vmul.f32 1.442695, %v1789_v23  ;;  %v4554_v62 = vpop.eup %3263  ;;  %v1825_v54 = vmul.f32 1.442695, %v1790_v38 }
 0x4b3   : > { %1885 = vadd.xlane.f32.xlu0 %v4545_v30 }
 0x4b4   : > { %3265 = vpow2.f32 %v1823_v35 }
 0x4b5   : > { %3267 = vpow2.f32 %v1855_v58  ;;  %v1666_v58 = vmul.f32 0.25, %v1467_v33  ;;  %v1667_v33 = vmul.f32 0.25, %v1469_v52 }
 0x4b7   : > { %v1766_v48 = vpop.xlane.xlu2 %1765  ;;  %v1732_v47 = vpop.xlane.xlu0 %1731 }
 0x4b8   : > { %v1808_v39 = vsub.f32 %v4462_v25, %v1766_v48  ;;  %v1791_v1 = vsub.f32 %v4458_v24, %v1732_v47  ;;  %v1663_v47 = vmul.f32 0.25, %v4533_v37 }
 0x4ba   : > { %v1861_v17 = vmul.f32 1.442695, %v1808_v39  ;;  %v4556_v27 = vpop.eup %3265  ;;  %v1807_v39 = vsub.f32 %v4443_v45, %v4551_v36  ;;  %v1664_v45 = vmul.f32 0.25, %v4547_v19 }
 0x4bb   : > { %1917 = vadd.xlane.f32.xlu0 %v4554_v62  ;;  %1887 = vadd.xlane.f32.xlu2 %v4556_v27  ;;  %v4562_v56 = vpop.eup %3267 }
 0x4bc   : > { %3269 = vpow2.f32 %v1861_v17  ;;  %v1859_v17 = vmul.f32 1.442695, %v1807_v39 }
 0x4bd   : > { %3271 = vpow2.f32 %v1857_v53 }
 0x4be   : > { %3273 = vpow2.f32 %v1825_v54 }
 0x4bf   : > { %v1734_v25 = vpop.xlane.xlu1 %1733 }
 0x4c0   : > { %v1792_v9 = vsub.f32 %v4468_v5, %v1734_v25 }
 0x4c2   : > { %v4564_v57 = vpop.eup %3269  ;;  %v1829_v34 = vmul.f32 1.442695, %v1792_v9 }
 0x4c3   : > { %1925 = vadd.xlane.f32.xlu1 %v4564_v57  ;;  %1919 = vadd.xlane.f32.xlu0 %v4562_v56  ;;  %v4575_v63 = vpop.eup %3271 }
 0x4c4   : > { %1745 = vmax.xlane.f32.xlu2 %v4570_v13  ;;  %v4577_v3 = vpop.eup %3273 }
 0x4c5   : > { %v1770_v28 = vpop.xlane.xlu0 %1769 }
 0x4c6   : > { %v1810_v2 = vsub.f32 %v4473_v6, %v1770_v28  ;;  %v1827_v6 = vmul.f32 1.442695, %v1791_v1  ;;  %v4627_v28 = vsel %vm1688_vm5, %v1663_v47, -1e+30 }
 0x4c7   : > { %v1736_v32 = vpop.xlane.xlu2 %1735  ;;  %v1768_v60 = vpop.xlane.xlu1 %1767 }
 0x4c8   : > { %v1865_v15 = vmul.f32 1.442695, %v1810_v2  ;;  %v1809_v59 = vsub.f32 %v4482_v16, %v1768_v60  ;;  %v1793_v5 = vsub.f32 %v4478_v14, %v1736_v32  ;;  %v1472_v2 = vpop.f32.mrf.mxu1  ;;  %v4638_v60 = vsel %vm1688_vm5, %v1664_v45, -1e+30 }
 0x4ca   : > { %v1863_v41 = vmul.f32 1.442695, %v1809_v59  ;;  %3275 = vpow2.f32 %v1865_v15  ;;  %v1831_v29 = vmul.f32 1.442695, %v1793_v5  ;;  %v1651_v15 = vpop.f32.mrf.mxu2  ;;  %v1668_v59 = vmul.f32 0.25, %v1472_v2 }
 0x4cb   : > { %1889 = vadd.xlane.f32.xlu1 %v4577_v3  ;;  %1921 = vadd.xlane.f32.xlu0 %v4575_v63 }
 0x4cc   : > { %3277 = vpow2.f32 %v1863_v41 }
 0x4cd   : > { %3279 = vpow2.f32 %v1827_v6  ;;  %v4645_v6 = vsel %vm1688_vm5, %v1668_v59, -1e+30 }
 0x4ce   : > { %3281 = vpow2.f32 %v1829_v34 }
 0x4cf   : > { %v978_v4 = vpop.permute.xlu2 %977 }
 0x4d0   : > { %1022 = vst.msk [vmem:[#allocation4 + $0xc] sm:$0xf] %vm874_vm14, %v978_v4  ;;  %v4583_v61 = vpop.eup %3275  ;;  %v1685_v4 = vmul.f32 0.25, %v1651_v15  ;;  %v1474_v2 = vpop.f32.mrf.mxu1 }
 0x4d1   : > { %v1669_v59 = vmul.f32 0.25, %v1474_v2 }
 0x4d2   : > { %v4585_v16 = vpop.eup %3277  ;;  %v4650_v51 = vsel %vm1688_vm5, %v1685_v4, -1e+30 }
 0x4d3   : > { %1929 = vadd.xlane.f32.xlu1 %v4583_v61  ;;  %1927 = vadd.xlane.f32.xlu2 %v4585_v16  ;;  %v4596_v21 = vpop.eup %3279 }
 0x4d4   : > { %v4604_v23 = vpop.eup %3281 }
 0x4d5   : > { %v1774_v12 = vpop.xlane.xlu0 %1773 }
 0x4d6   : > { %v1812_v24 = vsub.f32 %v4488_v42, %v1774_v12 }
 0x4d7   : > { %v972_v0 = vpop.permute.xlu2 %971 }
 0x4d8   : > { %1019 = vst.msk [vmem:[#allocation4] sm:$0xf] %vm874_vm14, %v972_v0  ;;  %v1869_v49 = vmul.f32 1.442695, %v1812_v24 }
 0x4da   : > { %3283 = vpow2.f32 %v1869_v49 }
 0x4db   : > { %1783 = vmax.xlane.f32.xlu1 %v4594_v20  ;;  %1891 = vadd.xlane.f32.xlu2 %v4596_v21  ;;  %3285 = vpow2.f32 %v1831_v29 }
 0x4dc   : > { %3287 = vpow2.f32 %v1859_v17 }
 0x4dd   : > { %v1776_v25 = vpop.xlane.xlu0 %1775 }
 0x4df   : > { %v976_v42 = vpop.permute.xlu1 %975  ;;  %973 = vrot.lane.b32.xlu0 %v4064_v44, %s3608_s14  ;;  %v4612_v44 = vsel %vm1688_vm5, %v1666_v58, -1e+30 }
 0x4e0   : > { %1021 = vst.msk [vmem:[#allocation4 + $0x8] sm:$0xf] %vm874_vm14, %v976_v42  ;;  %v4606_v35 = vpop.eup %3283 }
 0x4e1   : > { %v4614_v48 = vpop.eup %3285 }
 0x4e2   : > { %v4620_v43 = vpop.eup %3287 }
 0x4e3   : > { %1893 = vadd.xlane.f32.xlu1 %v4604_v23  ;;  %1933 = vadd.xlane.f32.xlu2 %v4606_v35 }
 0x4e7   : > { %v3083_v14 = vld [vmem:[#allocation4 + $0x8] sm:$0xff] }
 0x4e8   : > { %2177 = vmatpush.bf16.msrb.mxu2 %v3083_v14  ;;  %3107 = vmatpush.bf16.msra.mxu3 %v3083_v14 }
 0x4eb   : > { %1747 = vmax.xlane.f32.xlu1 %v4612_v44  ;;  %1895 = vadd.xlane.f32.xlu2 %v4614_v48 }
 0x509   : > { %1923 = vadd.xlane.f32.xlu0 %v4620_v43 }
 0x50a   : > { %v1738_v50 = vpop.xlane.xlu1 %1737 }
 0x50b   : > { %v1794_v38 = vsub.f32 %v4504_v55, %v1738_v50 }
 0x50d   : > { %v1833_v53 = vmul.f32 1.442695, %v1794_v38 }
 0x50f   : > { %3289 = vpow2.f32 %v1833_v53 }
 0x510   : > { %v1772_v54 = vpop.xlane.xlu2 %1771 }
 0x511   : > { %1741 = vmax.xlane.f32.xlu0 %v4627_v28  ;;  %v1811_v19 = vsub.f32 %v4511_v40, %v1772_v54 }
 0x512   : > { %v1780_v37 = vpop.xlane.xlu1 %1779 }
 0x513   : > { %v1867_v46 = vmul.f32 1.442695, %v1811_v19 }
 0x515   : > { %v4631_v36 = vpop.eup %3289 }
 0x516   : > { %1897 = vadd.xlane.f32.xlu1 %v4631_v36  ;;  %v4634_v55 = vpop.xlane.xlu0 %1883 }
 0x518   : > { %v1778_v32 = vpop.xlane.xlu2 %1777 }
 0x519   : > { %v1814_v41 = vsub.f32 %v4525_v26, %v1778_v32  ;;  %1743 = vmax.xlane.f32.xlu0 %v4638_v60 }
 0x51a   : > { %v1782_v40 = vpop.xlane.xlu1 %1781 }
 0x51b   : > { %v1873_v1 = vmul.f32 1.442695, %v1814_v41  ;;  %v1816_v34 = vsub.f32 %v4530_v7, %v1782_v40  ;;  %v4667_v7 = vsel %vm1688_vm5, %v1667_v33, -1e+30 }
 0x51d   : > { %3291 = vpow2.f32 %v1873_v1  ;;  %v1877_v42 = vmul.f32 1.442695, %v1816_v34 }
 0x51e   : > { %1751 = vmax.xlane.f32.xlu1 %v4645_v6  ;;  %v1916_v9 = vpop.xlane.xlu0 %1915  ;;  %3293 = vpow2.f32 %v1867_v46 }
 0x520   : > { %v1740_v12 = vpop.xlane.xlu2 %1739 }
 0x521   : > { %v1795_v26 = vsub.f32 %v4541_v11, %v1740_v12  ;;  %1785 = vmax.xlane.f32.xlu0 %v4650_v51  ;;  %v1813_v11 = vsub.f32 %v4493_v10, %v1776_v25 }
 0x523   : > { %v4654_v24 = vpop.eup %3291  ;;  %v1835_v0 = vmul.f32 1.442695, %v1795_v26  ;;  %v1871_v58 = vmul.f32 1.442695, %v1813_v11 }
 0x524   : > { %1937 = vadd.xlane.f32.xlu2 %v4654_v24  ;;  %v4658_v5 = vpop.eup %3293 }
 0x525   : > { %3295 = vpow2.f32 %v1835_v0 }
 0x526   : > { %v1886_v49 = vpop.xlane.xlu0 %1885  ;;  %3297 = vrcp.f32 %v1916_v9  ;;  %v4683_v9 = vsel %vm1688_vm5, %v1669_v59, -1e+30 }
 0x527   : > { %3299 = vpow2.f32 %v1877_v42 }
 0x529   : > { %1931 = vadd.xlane.f32.xlu0 %v4658_v5 }
 0x52b   : > { %v4662_v29 = vpop.eup %3295 }
 0x52c   : > { %1899 = vadd.xlane.f32.xlu2 %v4662_v29  ;;  %v3298_v39 = vpop.eup %3297 }
 0x52d   : > { %v1995_v17 = vmul.f32 %v3298_v39, %v4535_v18  ;;  %v4671_v10 = vpop.eup %3299  ;;  %v1815_v18 = vsub.f32 %v4516_v31, %v1780_v37 }
 0x52e   : > { %v1918_v14 = vpop.xlane.xlu0 %1917  ;;  %v1888_v38 = vpop.xlane.xlu2 %1887 }
 0x52f   : > { %3301 = vrcp.f32 %v1918_v14  ;;  %v2027_v25 = vpack.c.bf16 %v1995_v17, %v1995_v17  ;;  %v1875_v19 = vmul.f32 1.442695, %v1815_v18 }
 0x530   : > { %3303 = vpow2.f32 %v1871_v58 }
 0x531   : > { %1749 = vmax.xlane.f32.xlu0 %v4667_v7  ;;  %v2236_v32 = vunpack.c.l.b16 %v2027_v25 }
 0x534   : > { %1941 = vadd.xlane.f32.xlu2 %v4671_v10 }
 0x535   : > { %v3302_v50 = vpop.eup %3301 }
 0x536   : > { %v4674_v47 = vpop.xlane.xlu1 %1925  ;;  %v1920_v52 = vpop.xlane.xlu0 %1919  ;;  %v1996_v53 = vmul.f32 %v3302_v50, %v4554_v62 }
 0x537   : > { %v4677_v54 = vpop.eup %3303  ;;  %3305 = vrcp.f32 %v1920_v52  ;;  %v1746_v46 = vpop.xlane.xlu2 %1745 }
 0x538   : > { %v2028_v45 = vpack.c.bf16 %v1996_v53, %v1996_v53  ;;  %v1798_v31 = vsub.f32 %v4570_v13, %v1746_v46 }
 0x539   : > { %1935 = vadd.xlane.f32.xlu0 %v4677_v54 }
 0x53a   : > { %v2237_v15 = vunpack.c.l.b16 %v2028_v45  ;;  %v1841_v26 = vmul.f32 1.442695, %v1798_v31 }
 0x53c   : > { %v2252_v41 = vpack.c.b16 %v2237_v15, %v2236_v32 }
 0x53d   : > { %v3306_v62 = vpop.eup %3305 }
 0x53e   : > { %v1890_v1 = vpop.xlane.xlu1 %1889  ;;  %2324 = vmatmul.bf16.vlgmr.msrb.gmra.mxu0 %v2252_v41  ;;  %v1922_v4 = vpop.xlane.xlu0 %1921  ;;  %v1997_v37 = vmul.f32 %v3306_v62, %v4562_v56 }
 0x53f   : > { %3307 = vrcp.f32 %v1922_v4 }
 0x540   : > { %3309 = vpow2.f32 %v1875_v19  ;;  %v2029_v34 = vpack.c.bf16 %v1997_v37, %v1997_v37 }
 0x541   : > { %1753 = vmax.xlane.f32.xlu0 %v4683_v9  ;;  %3311 = vrcp.f32 %v1886_v49 }
 0x542   : > { %3313 = vrcp.f32 %v4634_v55  ;;  %v2238_v11 = vunpack.c.l.b16 %v2029_v34 }
 0x543   : > { %3315 = vpow2.f32 %v1841_v26 }
 0x545   : > { %v3308_v12 = vpop.eup %3307 }
 0x546   : > { %v4688_v40 = vpop.xlane.xlu1 %1929  ;;  %v1998_v0 = vmul.f32 %v3308_v12, %v4575_v63  ;;  %v4691_v42 = vpop.eup %3309 }
 0x547   : > { %v3312_v33 = vpop.eup %3311  ;;  %v1928_v18 = vpop.xlane.xlu2 %1927 }
 0x548   : > { %v2030_v8 = vpack.c.bf16 %v1998_v0, %v1998_v0  ;;  %v3314_v14 = vpop.eup %3313  ;;  %v1980_v63 = vmul.f32 %v3312_v33, %v4545_v30 }
 0x549   : > { %1939 = vadd.xlane.f32.xlu0 %v4691_v42  ;;  %v4696_v49 = vpop.eup %3315  ;;  %v1979_v50 = vmul.f32 %v3314_v14, %v4519_v22 }
 0x54a   : > { %v2239_v13 = vunpack.c.l.b16 %v2030_v8  ;;  %v2012_v52 = vpack.c.bf16 %v1980_v63, %v1980_v63 }
 0x54b   : > { %v2011_v25 = vpack.c.bf16 %v1979_v50, %v1979_v50 }
 0x54c   : > { %v2253_v56 = vpack.c.b16 %v2239_v13, %v2238_v11  ;;  %v2092_v45 = vunpack.c.l.b16 %v2012_v52 }
 0x54d   : > { %v2091_v30 = vunpack.c.l.b16 %v2011_v25 }
 0x54e   : > { %v1784_v58 = vpop.xlane.xlu1 %1783  ;;  %2329 = vmatmul.bf16.gmra.mxu0 %v2253_v56 }
 0x54f   : > { %v1817_v39 = vsub.f32 %v4594_v20, %v1784_v58  ;;  %v2107_v32 = vpack.c.b16 %v2092_v45, %v2091_v30  ;;  %v1892_v46 = vpop.xlane.xlu2 %1891 }
 0x551   : > { %v1879_v17 = vmul.f32 1.442695, %v1817_v39  ;;  %1905 = vadd.xlane.f32.xlu0 %v4696_v49  ;;  %v974_v55 = vpop.permute.xlu0 %973 }
 0x552   : > { %1020 = vst.msk [vmem:[#allocation4 + $0x4] sm:$0xf] %vm874_vm14, %v974_v55  ;;  %vm2445_vm14 = vcmask 261248  }
 0x553   : > { %3317 = vpow2.f32 %v1879_v17 }
 0x554   : > { %3319 = vrcp.f32 %v1890_v1 }
 0x555   : > { %3321 = vrcp.f32 %v1888_v38 }
 0x556   : > { %v1894_v53 = vpop.xlane.xlu1 %1893 }
 0x557   : > { %v1934_v11 = vpop.xlane.xlu2 %1933 }
 0x559   : > { %v4702_v20 = vpop.eup %3317  ;;  %v3082_v2 = vld [vmem:[#allocation4] sm:$0xff] }
 0x55a   : > { %1943 = vadd.xlane.f32.xlu2 %v4702_v20  ;;  %2178 = vmatpush.bf16.msrb.mxu2 %v3082_v2  ;;  %v3320_v15 = vpop.eup %3319 }
 0x55b   : > { %3108 = vmatpush.bf16.msra.mxu3 %v3082_v2  ;;  %v3322_v22 = vpop.eup %3321  ;;  %v1982_v19 = vmul.f32 %v3320_v15, %v4577_v3 }
 0x55c   : > { %v1981_v4 = vmul.f32 %v3322_v22, %v4556_v27 }
 0x55d   : > { %2179 = vmatmul.bf16.vlgmr.msrb.gmra.mxu2 %v2107_v32  ;;  %v2014_v38 = vpack.c.bf16 %v1982_v19, %v1982_v19 }
 0x55e   : > { %v1748_v59 = vpop.xlane.xlu1 %1747  ;;  %v2013_v62 = vpack.c.bf16 %v1981_v4, %v1981_v4 }
 0x55f   : > { %v1799_v41 = vsub.f32 %v4612_v44, %v1748_v59  ;;  %v2094_v31 = vunpack.c.l.b16 %v2014_v38  ;;  %v1896_v63 = vpop.xlane.xlu2 %1895 }
 0x560   : > { %v2093_v12 = vunpack.c.l.b16 %v2013_v62 }
 0x561   : > { %v1843_v1 = vmul.f32 1.442695, %v1799_v41 }
 0x562   : > { %v2108_v26 = vpack.c.b16 %v2094_v31, %v2093_v12 }
 0x563   : > { %3323 = vpow2.f32 %v1843_v1 }
 0x564   : > { %3325 = vrcp.f32 %v1894_v53 }
 0x565   : > { %3327 = vrcp.f32 %v1892_v46 }
 0x566   : > { %3329 = vrcp.f32 %v4674_v47 }
 0x569   : > { %v4708_v37 = vpop.eup %3323 }
 0x56a   : > { %1907 = vadd.xlane.f32.xlu0 %v4708_v37  ;;  %v3326_v0 = vpop.eup %3325 }
 0x56b   : > { %v3328_v44 = vpop.eup %3327  ;;  %v1984_v3 = vmul.f32 %v3326_v0, %v4604_v23 }
 0x56c   : > { %v1983_v27 = vmul.f32 %v3328_v44, %v4596_v21  ;;  %v3330_v14 = vpop.eup %3329 }
 0x56d   : > { %2184 = vmatmul.bf16.gmra.mxu2 %v2108_v26  ;;  %v2016_v34 = vpack.c.bf16 %v1984_v3, %v1984_v3  ;;  %v2000_v39 = vmul.f32 %v3330_v14, %v4564_v57 }
 0x56e   : > { %v2015_v8 = vpack.c.bf16 %v1983_v27, %v1983_v27 }
 0x56f   : > { %v2096_v13 = vunpack.c.l.b16 %v2016_v34  ;;  %v2032_v55 = vpack.c.bf16 %v2000_v39, %v2000_v39 }
 0x570   : > { %v2095_v33 = vunpack.c.l.b16 %v2015_v8 }
 0x571   : > { %v2241_v25 = vunpack.c.l.b16 %v2032_v55 }
 0x572   : > { %v2109_v58 = vpack.c.b16 %v2096_v13, %v2095_v33 }
 0x57c   : > { %v1924_v56 = vpop.xlane.xlu0 %1923 }
 0x57d   : > { %3331 = vrcp.f32 %v1924_v56  ;;  %2189 = vmatmul.bf16.gmra.mxu2 %v2109_v58 }
 0x57e   : > { %3333 = vrcp.f32 %v4688_v40 }
 0x57f   : > { %3335 = vrcp.f32 %v1896_v63 }
 0x580   : > { %3337 = vrcp.f32 %v1928_v18 }
 0x583   : > { %v3332_v17 = vpop.eup %3331 }
 0x584   : > { %v1742_v21 = vpop.xlane.xlu0 %1741  ;;  %v1999_v23 = vmul.f32 %v3332_v17, %v4620_v43  ;;  %v3334_v45 = vpop.eup %3333 }
 0x585   : > { %v1796_v47 = vsub.f32 %v4627_v28, %v1742_v21  ;;  %v3336_v57 = vpop.eup %3335  ;;  %v2002_v28 = vmul.f32 %v3334_v45, %v4583_v61 }
 0x586   : > { %v2031_v50 = vpack.c.bf16 %v1999_v23, %v1999_v23  ;;  %v3338_v32 = vpop.eup %3337  ;;  %v1985_v43 = vmul.f32 %v3336_v57, %v4614_v48 }
 0x587   : > { %v1837_v52 = vmul.f32 1.442695, %v1796_v47  ;;  %v2001_v18 = vmul.f32 %v3338_v32, %v4585_v16  ;;  %v2034_v38 = vpack.c.bf16 %v2002_v28, %v2002_v28 }
 0x588   : > { %v2240_v53 = vunpack.c.l.b16 %v2031_v50  ;;  %v2017_v1 = vpack.c.bf16 %v1985_v43, %v1985_v43 }
 0x589   : > { %3339 = vpow2.f32 %v1837_v52  ;;  %v1898_v2 = vpop.xlane.xlu1 %1897  ;;  %v2033_v4 = vpack.c.bf16 %v2001_v18, %v2001_v18  ;;  %v2243_v12 = vunpack.c.l.b16 %v2034_v38 }
 0x58a   : > { %3341 = vrcp.f32 %v1898_v2  ;;  %v2254_v30 = vpack.c.b16 %v2241_v25, %v2240_v53  ;;  %v2097_v62 = vunpack.c.l.b16 %v2017_v1 }
 0x58b   : > { %v2242_v61 = vunpack.c.l.b16 %v2033_v4 }
 0x58c   : > { %2334 = vmatmul.bf16.gmra.mxu0 %v2254_v30  ;;  %v1744_v40 = vpop.xlane.xlu0 %1743 }
 0x58d   : > { %v1797_v15 = vsub.f32 %v4638_v60, %v1744_v40  ;;  %v2255_v3 = vpack.c.b16 %v2243_v12, %v2242_v61 }
 0x58f   : > { %v4722_v59 = vpop.eup %3339  ;;  %v1839_v22 = vmul.f32 1.442695, %v1797_v15 }
 0x590   : > { %v3342_v41 = vpop.eup %3341  ;;  %1901 = vadd.xlane.f32.xlu1 %v4722_v59 }
 0x591   : > { %3343 = vpow2.f32 %v1839_v22  ;;  %v1986_v19 = vmul.f32 %v3342_v41, %v4631_v36  ;;  %v1752_v31 = vpop.xlane.xlu1 %1751 }
 0x592   : > { %3345 = vrcp.f32 %v1934_v11  ;;  %v1801_v36 = vsub.f32 %v4645_v6, %v1752_v31 }
 0x593   : > { %v2018_v46 = vpack.c.bf16 %v1986_v19, %v1986_v19 }
 0x594   : > { %v1786_v60 = vpop.xlane.xlu0 %1785  ;;  %v1847_v34 = vmul.f32 1.442695, %v1801_v36 }
 0x595   : > { %v1818_v48 = vsub.f32 %v4650_v51, %v1786_v60  ;;  %v2098_v16 = vunpack.c.l.b16 %v2018_v46 }
 0x597   : > { %v4727_v26 = vpop.eup %3343  ;;  %v1881_v0 = vmul.f32 1.442695, %v1818_v48  ;;  %v2110_v44 = vpack.c.b16 %v2098_v16, %v2097_v62  ;;  %v1938_v13 = vpop.xlane.xlu2 %1937 }
 0x598   : > { %1903 = vadd.xlane.f32.xlu1 %v4727_v26  ;;  %v3346_v51 = vpop.eup %3345 }
 0x599   : > { %3347 = vpow2.f32 %v1881_v0  ;;  %2194 = vmatmul.bf16.vlgmr.msra.gmra.mxu3 %v2110_v44  ;;  %v2004_v11 = vmul.f32 %v3346_v51, %v4606_v35 }
 0x59b   : > { %v2036_v58 = vpack.c.bf16 %v2004_v11, %v2004_v11 }
 0x59c   : > { %2339 = vmatmul.bf16.gmra.mxu0 %v2255_v3  ;;  %v1932_v27 = vpop.xlane.xlu0 %1931 }
 0x59d   : > { %3349 = vrcp.f32 %v1932_v27  ;;  %v2245_v23 = vunpack.c.l.b16 %v2036_v58 }
 0x59e   : > { %3351 = vpow2.f32 %v1847_v34 }
 0x59f   : > { %v4731_v8 = vpop.eup %3347  ;;  %3353 = vrcp.f32 %v1938_v13  ;;  %v1900_v55 = vpop.xlane.xlu2 %1899 }
 0x5a0   : > { %1945 = vadd.xlane.f32.xlu1 %v4731_v8 }
 0x5a3   : > { %v3350_v33 = vpop.eup %3349 }
 0x5a4   : > { %v1750_v56 = vpop.xlane.xlu0 %1749  ;;  %v2003_v6 = vmul.f32 %v3350_v33, %v4658_v5  ;;  %v4737_v63 = vpop.eup %3351 }
 0x5a5   : > { %v1800_v14 = vsub.f32 %v4667_v7, %v1750_v56  ;;  %v3354_v50 = vpop.eup %3353 }
 0x5a6   : > { %v2035_v39 = vpack.c.bf16 %v2003_v6, %v2003_v6  ;;  %v2006_v7 = vmul.f32 %v3354_v50, %v4654_v24 }
 0x5a7   : > { %v1845_v17 = vmul.f32 1.442695, %v1800_v14  ;;  %v1942_v53 = vpop.xlane.xlu2 %1941 }
 0x5a8   : > { %1911 = vadd.xlane.f32.xlu1 %v4737_v63  ;;  %v2244_v21 = vunpack.c.l.b16 %v2035_v39  ;;  %v2038_v2 = vpack.c.bf16 %v2006_v7, %v2006_v7 }
 0x5a9   : > { %3355 = vpow2.f32 %v1845_v17 }
 0x5aa   : > { %v2256_v35 = vpack.c.b16 %v2245_v23, %v2244_v21  ;;  %v2247_v15 = vunpack.c.l.b16 %v2038_v2 }
 0x5ac   : > { %2344 = vmatmul.bf16.gmra.mxu0 %v2256_v35  ;;  %v1936_v47 = vpop.xlane.xlu0 %1935 }
 0x5ad   : > { %3357 = vrcp.f32 %v1936_v47 }
 0x5ae   : > { %3359 = vrcp.f32 %v1942_v53 }
 0x5af   : > { %v4740_v5 = vpop.eup %3355 }
 0x5b0   : > { %1909 = vadd.xlane.f32.xlu2 %v4740_v5 }
 0x5b3   : > { %v3358_v52 = vpop.eup %3357 }
 0x5b4   : > { %v1754_v25 = vpop.xlane.xlu0 %1753  ;;  %v2005_v45 = vmul.f32 %v3358_v52, %v4677_v54  ;;  %v3360_v22 = vpop.eup %3359 }
 0x5b5   : > { %v1802_v57 = vsub.f32 %v4683_v9, %v1754_v25  ;;  %v2008_v54 = vmul.f32 %v3360_v22, %v4671_v10 }
 0x5b6   : > { %v2037_v30 = vpack.c.bf16 %v2005_v45, %v2005_v45 }
 0x5b7   : > { %v1849_v32 = vmul.f32 1.442695, %v1802_v57  ;;  %v2040_v1 = vpack.c.bf16 %v2008_v54, %v2008_v54 }
 0x5b8   : > { %v2246_v40 = vunpack.c.l.b16 %v2037_v30 }
 0x5b9   : > { %3361 = vpow2.f32 %v1849_v32  ;;  %v2249_v46 = vunpack.c.l.b16 %v2040_v1 }
 0x5ba   : > { %v2257_v43 = vpack.c.b16 %v2247_v15, %v2246_v40 }
 0x5bb   : > { %v2325_v18 = vpop.f32.mrf.mxu0 }
 0x5bc   : > { %2349 = vmatmul.bf16.vlgmr.msrb.gmra.mxu1 %v2257_v43  ;;  %v1940_v28 = vpop.xlane.xlu0 %1939 }
 0x5bd   : > { %3363 = vrcp.f32 %v1940_v28 }
 0x5be   : > { %3365 = vrcp.f32 %v1900_v55 }
 0x5bf   : > { %v4746_v24 = vpop.eup %3361 }
 0x5c0   : > { %1913 = vadd.xlane.f32.xlu0 %v4746_v24 }
 0x5c3   : > { %v3364_v41 = vpop.eup %3363  ;;  %v2327_v9 = vpop.f32.mrf.mxu0 }
 0x5c4   : > { %2399 = vrot.lane.b32.xlu1 %v2327_v9, %s3609_s18  ;;  %v2007_v19 = vmul.f32 %v3364_v41, %v4691_v42  ;;  %v3366_v0 = vpop.eup %3365  ;;  %v1906_v51 = vpop.xlane.xlu0 %1905  ;;  %v3099_v41 = vld [vmem:[#allocation12 + $0x8] sm:$0xff] }
 0x5c5   : > { %v1987_v44 = vmul.f32 %v3366_v0, %v4662_v29  ;;  %2537 = vmatpush.bf16.msrb.mxu3 %v3099_v41 }
 0x5c6   : > { %v2039_v4 = vpack.c.bf16 %v2007_v19, %v2007_v19 }
 0x5c7   : > { %v2019_v33 = vpack.c.bf16 %v1987_v44, %v1987_v44 }
 0x5c8   : > { %2397 = vrot.lane.b32.xlu2 %v2325_v18, %s3609_s18  ;;  %v2248_v38 = vunpack.c.l.b16 %v2039_v4 }
 0x5c9   : > { %v2099_v6 = vunpack.c.l.b16 %v2019_v33 }
 0x5ca   : > { %v2258_v60 = vpack.c.b16 %v2249_v46, %v2248_v38  ;;  %v3098_v38 = vld [vmem:[#allocation12] sm:$0xff] }
 0x5cb   : > { %v2330_v48 = vpop.f32.mrf.mxu0  ;;  %2538 = vmatpush.bf16.msrb.mxu3 %v3098_v38  ;;  %v4817_v38 = vld [vmem:[%s4918_s5] ss:$0 sm:$0xff] }
 0x5cc   : > { %2354 = vmatmul.bf16.gmra.mxu1 %v2258_v60 }
 0x5cd   : > { %v1944_v34 = vpop.xlane.xlu2 %1943 }
 0x5d3   : > { %v2332_v62 = vpop.f32.mrf.mxu0 }
 0x5d4   : > { %2401 = vrot.lane.b32.xlu0 %v2330_v48, %s3609_s18  ;;  %2403 = vrot.lane.b32.xlu2 %v2332_v62, %s3609_s18 }
 0x5dd   : > { %v1908_v52 = vpop.xlane.xlu0 %1907 }
 0x5e0   : > { %v2180_v10 = vpop.f32.mrf.mxu2 }
 0x5e1   : > { %2365 = vst.msk [vmem:[#allocation5] sm:$0xff] %vm1379_vm4, %v2180_v10 }
 0x5e8   : > { %v2182_v16 = vpop.f32.mrf.mxu2 }
 0x5e9   : > { %2366 = vst.msk [vmem:[#allocation5 + $0x8] sm:$0xff] %vm1379_vm4, %v2182_v16 }
 0x5f0   : > { %v2185_v42 = vpop.f32.mrf.mxu2 }
 0x5f1   : > { %2367 = vst.msk [vmem:[#allocation5 + $0x10] sm:$0xff] %vm1379_vm4, %v2185_v42 }
 0x5f8   : > { %v2187_v31 = vpop.f32.mrf.mxu2 }
 0x5f9   : > { %2368 = vst.msk [vmem:[#allocation5 + $0x18] sm:$0xff] %vm1379_vm4, %v2187_v31 }
 0x600   : > { %v2190_v61 = vpop.f32.mrf.mxu2 }
 0x601   : > { %2369 = vst.msk [vmem:[#allocation5 + $0x20] sm:$0xff] %vm1379_vm4, %v2190_v61 }
 0x603   : > { %v1902_v12 = vpop.xlane.xlu1 %1901 }
 0x604   : > { %3367 = vrcp.f32 %v1902_v12 }
 0x608   : > { %v2192_v3 = vpop.f32.mrf.mxu2 }
 0x609   : > { %v2335_v36 = vpop.f32.mrf.mxu0  ;;  %2370 = vst.msk [vmem:[#allocation5 + $0x28] sm:$0xff] %vm1379_vm4, %v2192_v3 }
 0x60a   : > { %v3368_v27 = vpop.eup %3367  ;;  %2405 = vrot.lane.b32.xlu0 %v2335_v36, %s3609_s18 }
 0x60b   : > { %v1904_v13 = vpop.xlane.xlu1 %1903  ;;  %v1988_v11 = vmul.f32 %v3368_v27, %v4722_v59 }
 0x60c   : > { %3369 = vrcp.f32 %v1904_v13 }
 0x60d   : > { %3371 = vrcp.f32 %v1906_v51  ;;  %v2020_v56 = vpack.c.bf16 %v1988_v11, %v1988_v11 }
 0x60e   : > { %3373 = vrcp.f32 %v1944_v34 }
 0x60f   : > { %v2100_v58 = vunpack.c.l.b16 %v2020_v56 }
 0x611   : > { %v2337_v29 = vpop.f32.mrf.mxu0  ;;  %v2111_v14 = vpack.c.b16 %v2100_v58, %v2099_v6 }
 0x612   : > { %v3370_v39 = vpop.eup %3369  ;;  %2407 = vrot.lane.b32.xlu1 %v2337_v29, %s3609_s18 }
 0x613   : > { %v3372_v17 = vpop.eup %3371  ;;  %2199 = vmatmul.bf16.gmra.mxu3 %v2111_v14  ;;  %v1946_v21 = vpop.xlane.xlu1 %1945  ;;  %v1989_v55 = vmul.f32 %v3370_v39, %v4727_v26 }
 0x614   : > { %v3374_v23 = vpop.eup %3373  ;;  %3375 = vrcp.f32 %v1946_v21  ;;  %v1990_v59 = vmul.f32 %v3372_v17, %v4696_v49 }
 0x615   : > { %v2009_v35 = vmul.f32 %v3374_v23, %v4702_v20  ;;  %v2021_v50 = vpack.c.bf16 %v1989_v55, %v1989_v55  ;;  %3377 = vrcp.f32 %v1908_v52 }
 0x616   : > { %v2022_v53 = vpack.c.bf16 %v1990_v59, %v1990_v59 }
 0x617   : > { %v2041_v45 = vpack.c.bf16 %v2009_v35, %v2009_v35  ;;  %v2101_v57 = vunpack.c.l.b16 %v2021_v50 }
 0x618   : > { %v2102_v26 = vunpack.c.l.b16 %v2022_v53 }
 0x619   : > { %v2340_v47 = vpop.f32.mrf.mxu0  ;;  %v2250_v49 = vunpack.c.l.b16 %v2041_v45 }
 0x61a   : > { %v3376_v7 = vpop.eup %3375  ;;  %2409 = vrot.lane.b32.xlu2 %v2340_v47, %s3609_s18  ;;  %v2112_v40 = vpack.c.b16 %v2102_v26, %v2101_v57 }
 0x61b   : > { %v2010_v25 = vmul.f32 %v3376_v7, %v4731_v8  ;;  %v3378_v18 = vpop.eup %3377  ;;  %v1912_v9 = vpop.xlane.xlu1 %1911 }
 0x61c   : > { %v2195_v2 = vpop.f32.mrf.mxu3  ;;  %v1991_v28 = vmul.f32 %v3378_v18, %v4708_v37 }
 0x61d   : > { %2371 = vst.msk [vmem:[#allocation5 + $0x30] sm:$0xff] %vm1379_vm4, %v2195_v2  ;;  %v2042_v30 = vpack.c.bf16 %v2010_v25, %v2010_v25 }
 0x61e   : > { %v2023_v4 = vpack.c.bf16 %v1991_v28, %v1991_v28 }
 0x61f   : > { %v2251_v32 = vunpack.c.l.b16 %v2042_v30 }
 0x620   : > { %v2103_v60 = vunpack.c.l.b16 %v2023_v4 }
 0x621   : > { %v2342_v20 = vpop.f32.mrf.mxu0  ;;  %v2259_v15 = vpack.c.b16 %v2251_v32, %v2250_v49 }
 0x622   : > { %2411 = vrot.lane.b32.xlu0 %v2342_v20, %s3609_s18 }
 0x623   : > { %v1910_v43 = vpop.xlane.xlu2 %1909  ;;  %2204 = vmatmul.bf16.gmra.mxu3 %v2112_v40  ;;  %2359 = vmatmul.bf16.gmra.mxu1 %v2259_v15 }
 0x624   : > { %3379 = vrcp.f32 %v1910_v43  ;;  %v2197_v8 = vpop.f32.mrf.mxu3 }
 0x625   : > { %2372 = vst.msk [vmem:[#allocation5 + $0x38] sm:$0xff] %vm1379_vm4, %v2197_v8  ;;  %3381 = vrcp.f32 %v1912_v9 }
 0x629   : > { %v2345_v22 = vpop.f32.mrf.mxu0 }
 0x62a   : > { %v3380_v54 = vpop.eup %3379  ;;  %2413 = vrot.lane.b32.xlu1 %v2345_v22, %s3609_s18 }
 0x62b   : > { %v2398_v19 = vpop.permute.xlu2 %2397  ;;  %v1992_v1 = vmul.f32 %v3380_v54, %v4740_v5  ;;  %v3382_v42 = vpop.eup %3381 }
 0x62c   : > { %2446 = vst.msk [vmem:[#allocation5] sm:$0xff] %vm2445_vm14, %v2398_v19  ;;  %v1993_v31 = vmul.f32 %v3382_v42, %v4737_v63 }
 0x62d   : > { %v2024_v46 = vpack.c.bf16 %v1992_v1, %v1992_v1 }
 0x62e   : > { %v2025_v44 = vpack.c.bf16 %v1993_v31, %v1993_v31  ;;  %v2583_v31 = vld [vmem:[%s3770_s19 + $0x10] sm:$0xff] }
 0x62f   : > { %v2104_v48 = vunpack.c.l.b16 %v2024_v46 }
 0x630   : > { %v2105_v3 = vunpack.c.l.b16 %v2025_v44  ;;  %v2584_v44 = vld [vmem:[%s3770_s19 + $0x18] sm:$0xff] }
 0x631   : > { %v2347_v37 = vpop.f32.mrf.mxu0  ;;  %v2113_v62 = vpack.c.b16 %v2104_v48, %v2103_v60  ;;  %v2581_v60 = vld [vmem:[%s3770_s19] sm:$0xff] }
 0x632   : > { %2415 = vrot.lane.b32.xlu2 %v2347_v37, %s3609_s18 }
 0x633   : > { %v2404_v10 = vpop.permute.xlu2 %2403  ;;  %2209 = vmatmul.bf16.gmra.mxu3 %v2113_v62  ;;  %v1914_v16 = vpop.xlane.xlu0 %1913  ;;  %v2462_v33 = vld [vmem:[#allocation5] sm:$0xff] }
 0x634   : > { %2449 = vst.msk [vmem:[#allocation5 + $0x18] sm:$0xff] %vm2445_vm14, %v2404_v10  ;;  %3383 = vrcp.f32 %v1914_v16  ;;  %v2582_v10 = vld [vmem:[%s3770_s19 + $0x8] sm:$0xff] }
 0x636   : > { %v2400_v5 = vpop.permute.xlu1 %2399 }
 0x637   : > { %2447 = vst.msk [vmem:[#allocation5 + $0x8] sm:$0xff] %vm2445_vm14, %v2400_v5 }
 0x639   : > { %v2350_v61 = vpop.f32.mrf.mxu1 }
 0x63a   : > { %v3384_v12 = vpop.eup %3383  ;;  %2417 = vrot.lane.b32.xlu0 %v2350_v61, %s3609_s18 }
 0x63b   : > { %v1994_v0 = vmul.f32 %v3384_v12, %v4746_v24  ;;  %v2465_v58 = vld [vmem:[#allocation5 + $0x18] sm:$0xff] }
 0x63d   : > { %v2026_v36 = vpack.c.bf16 %v1994_v0, %v1994_v0 }
 0x63e   : > { %v2463_v63 = vld [vmem:[#allocation5 + $0x8] sm:$0xff] }
 0x63f   : > { %v2106_v27 = vunpack.c.l.b16 %v2026_v36  ;;  %v2478_v24 = vpack.c.bf16 %v2463_v63, %v2462_v33 }
 0x641   : > { %v2352_v51 = vpop.f32.mrf.mxu1  ;;  %v2114_v34 = vpack.c.b16 %v2106_v27, %v2105_v3 }
 0x642   : > { %2419 = vrot.lane.b32.xlu1 %v2352_v51, %s3609_s18 }
 0x643   : > { %2214 = vmatmul.bf16.gmra.mxu3 %v2114_v34  ;;  %v2585_v34 = vld [vmem:[%s3770_s19 + $0x20] sm:$0xff] }
 0x646   : > { %v2402_v13 = vpop.permute.xlu0 %2401 }
 0x647   : > { %2448 = vst.msk [vmem:[#allocation5 + $0x10] sm:$0xff] %vm2445_vm14, %v2402_v13 }
 0x649   : > { %v2355_v11 = vpop.f32.mrf.mxu1 }
 0x64a   : > { %2421 = vrot.lane.b32.xlu2 %v2355_v11, %s3609_s18 }
 0x64e   : > { %v2464_v6 = vld [vmem:[#allocation5 + $0x10] sm:$0xff] }
 0x64f   : > { %v2479_v29 = vpack.c.bf16 %v2465_v58, %v2464_v6 }
 0x651   : > { %v2357_v56 = vpop.f32.mrf.mxu1 }
 0x652   : > { %2423 = vrot.lane.b32.xlu0 %v2357_v56, %s3609_s18  ;;  %v2586_v56 = vld [vmem:[%s3770_s19 + $0x28] sm:$0xff] }
 0x653   : > { %3028 = vmatmul.msk.bf16.vlgmr.msrb.gmra.mxu3 %vm2506_vm6, %v2478_v24 }
 0x663   : > { %3029 = vmatmul.msk.bf16.gmra.mxu3 %vm2506_vm6, %v2479_v29 }
 0x674   : > { %v2410_v14 = vpop.permute.xlu2 %2409 }
 0x675   : > { %2452 = vst.msk [vmem:[#allocation5 + $0x30] sm:$0xff] %vm2445_vm14, %v2410_v14 }
 0x67c   : > { %v2406_v39 = vpop.permute.xlu0 %2405  ;;  %v2468_v50 = vld [vmem:[#allocation5 + $0x30] sm:$0xff] }
 0x67d   : > { %2450 = vst.msk [vmem:[#allocation5 + $0x20] sm:$0xff] %vm2445_vm14, %v2406_v39 }
 0x684   : > { %v2408_v17 = vpop.permute.xlu1 %2407  ;;  %v2466_v21 = vld [vmem:[#allocation5 + $0x20] sm:$0xff] }
 0x685   : > { %2451 = vst.msk [vmem:[#allocation5 + $0x28] sm:$0xff] %vm2445_vm14, %v2408_v17  ;;  %v2587_v17 = vld [vmem:[%s3770_s19 + $0x30] sm:$0xff] }
 0x68c   : > { %v2467_v23 = vld [vmem:[#allocation5 + $0x28] sm:$0xff]  ;;  %v2416_v25 = vpop.permute.xlu2 %2415 }
 0x68d   : > { %v2480_v55 = vpack.c.bf16 %v2467_v23, %v2466_v21 }
 0x68f   : > { %3030 = vmatmul.msk.bf16.gmra.mxu3 %vm2506_vm6, %v2480_v55 }
 0x694   : > { %v2412_v59 = vpop.permute.xlu0 %2411 }
 0x695   : > { %2453 = vst.msk [vmem:[#allocation5 + $0x38] sm:$0xff] %vm2445_vm14, %v2412_v59  ;;  %v2588_v59 = vld [vmem:[%s3770_s19 + $0x38] sm:$0xff] }
 0x696   : > { %v2200_v35 = vpop.f32.mrf.mxu3 }
 0x697   : > { %2373 = vst.msk [vmem:[#allocation5 + $0x40] sm:$0xff] %vm1379_vm4, %v2200_v35 }
 0x69c   : > { %v2414_v47 = vpop.permute.xlu1 %2413  ;;  %v2469_v7 = vld [vmem:[#allocation5 + $0x38] sm:$0xff] }
 0x69d   : > { %2454 = vst.msk [vmem:[#allocation5 + $0x40] sm:$0xff] %vm2445_vm14, %v2414_v47  ;;  %v2481_v52 = vpack.c.bf16 %v2469_v7, %v2468_v50  ;;  %v2589_v7 = vld [vmem:[%s3770_s19 + $0x40] sm:$0xff] }
 0x69e   : > { %v2202_v53 = vpop.f32.mrf.mxu3 }
 0x69f   : > { %2374 = vst.msk [vmem:[#allocation5 + $0x48] sm:$0xff] %vm1379_vm4, %v2202_v53  ;;  %3031 = vmatmul.msk.bf16.gmra.mxu3 %vm2506_vm6, %v2481_v52 }
 0x6a0   : > { %2455 = vst.msk [vmem:[#allocation5 + $0x48] sm:$0xff] %vm2445_vm14, %v2416_v25  ;;  %v2360_v45 = vpop.f32.mrf.mxu1 }
 0x6a1   : > { %2425 = vrot.lane.b32.xlu1 %v2360_v45, %s3609_s18  ;;  %v2590_v45 = vld [vmem:[%s3770_s19 + $0x48] sm:$0xff] }
 0x6a4   : > { %v2470_v49 = vld [vmem:[#allocation5 + $0x40] sm:$0xff]  ;;  %v2422_v43 = vpop.permute.xlu2 %2421 }
 0x6a6   : > { %v2205_v2 = vpop.f32.mrf.mxu3 }
 0x6a7   : > { %2375 = vst.msk [vmem:[#allocation5 + $0x50] sm:$0xff] %vm1379_vm4, %v2205_v2  ;;  %v2471_v30 = vld [vmem:[#allocation5 + $0x48] sm:$0xff] }
 0x6a8   : > { %v2362_v57 = vpop.f32.mrf.mxu1  ;;  %v2482_v32 = vpack.c.bf16 %v2471_v30, %v2470_v49 }
 0x6a9   : > { %2427 = vrot.lane.b32.xlu2 %v2362_v57, %s3609_s18 }
 0x6ac   : > { %v2418_v26 = vpop.permute.xlu0 %2417 }
 0x6ad   : > { %2456 = vst.msk [vmem:[#allocation5 + $0x50] sm:$0xff] %vm2445_vm14, %v2418_v26  ;;  %v2591_v26 = vld [vmem:[%s3770_s19 + $0x50] sm:$0xff] }
 0x6ae   : > { %v2207_v20 = vpop.f32.mrf.mxu3 }
 0x6af   : > { %2376 = vst.msk [vmem:[#allocation5 + $0x58] sm:$0xff] %vm1379_vm4, %v2207_v20  ;;  %3032 = vmatmul.msk.bf16.gmra.mxu3 %vm2506_vm6, %v2482_v32 }
 0x6b4   : > { %v2420_v40 = vpop.permute.xlu1 %2419  ;;  %v2472_v18 = vld [vmem:[#allocation5 + $0x50] sm:$0xff] }
 0x6b5   : > { %2457 = vst.msk [vmem:[#allocation5 + $0x58] sm:$0xff] %vm2445_vm14, %v2420_v40  ;;  %v2592_v40 = vld [vmem:[%s3770_s19 + $0x58] sm:$0xff] }
 0x6b6   : > { %v2210_v15 = vpop.f32.mrf.mxu3 }
 0x6b7   : > { %2377 = vst.msk [vmem:[#allocation5 + $0x60] sm:$0xff] %vm1379_vm4, %v2210_v15 }
 0x6b8   : > { %2458 = vst.msk [vmem:[#allocation5 + $0x60] sm:$0xff] %vm2445_vm14, %v2422_v43 }
 0x6bc   : > { %v2473_v8 = vld [vmem:[#allocation5 + $0x58] sm:$0xff] }
 0x6bd   : > { %v2483_v28 = vpack.c.bf16 %v2473_v8, %v2472_v18  ;;  %v2593_v8 = vld [vmem:[%s3770_s19 + $0x60] sm:$0xff] }
 0x6be   : > { %v2212_v22 = vpop.f32.mrf.mxu3 }
 0x6bf   : > { %2378 = vst.msk [vmem:[#allocation5 + $0x68] sm:$0xff] %vm1379_vm4, %v2212_v22  ;;  %3033 = vmatmul.msk.bf16.gmra.mxu3 %vm2506_vm6, %v2483_v28  ;;  %v2474_v9 = vld [vmem:[#allocation5 + $0x60] sm:$0xff] }
 0x6c4   : > { %v2424_v54 = vpop.permute.xlu0 %2423 }
 0x6c5   : > { %2459 = vst.msk [vmem:[#allocation5 + $0x68] sm:$0xff] %vm2445_vm14, %v2424_v54 }
 0x6c6   : > { %v2215_v41 = vpop.f32.mrf.mxu3 }
 0x6c7   : > { %2379 = vst.msk [vmem:[#allocation5 + $0x70] sm:$0xff] %vm1379_vm4, %v2215_v41  ;;  %v2594_v41 = vld [vmem:[%s3770_s19 + $0x68] sm:$0xff] }
 0x6cc   : > { %v2475_v19 = vld [vmem:[#allocation5 + $0x68] sm:$0xff] }
 0x6cd   : > { %v2484_v1 = vpack.c.bf16 %v2475_v19, %v2474_v9 }
 0x6ce   : > { %v2217_v4 = vpop.f32.mrf.mxu3 }
 0x6cf   : > { %2380 = vst.msk [vmem:[#allocation5 + $0x78] sm:$0xff] %vm1379_vm4, %v2217_v4  ;;  %3034 = vmatmul.msk.bf16.gmra.mxu3 %vm2506_vm6, %v2484_v1  ;;  %v2595_v4 = vld [vmem:[%s3770_s19 + $0x70] sm:$0xff] }
 0x6d6   : > { %v2540_v46 = vpop.f32.mrf.mxu3 }
 0x6d7   : > { %v2541_v48 = vadd.f32 %v4817_v38, %v2540_v46 }
 0x6d9   : > { %v2597_v37 = vadd.f32 %v2581_v60, %v2541_v48 }
 0x6db   : > { %2613 = vst [vmem:[%s4823_s10] sm:$0xff] %v2597_v37  ;;  %v2596_v37 = vld [vmem:[%s3770_s19 + $0x78] sm:$0xff] }
 0x6de   : > { %v2542_v62 = vpop.f32.mrf.mxu3 }
 0x6df   : > { %v2543_v16 = vadd.f32 %v4817_v38, %v2542_v62 }
 0x6e1   : > { %v2598_v42 = vadd.f32 %v2582_v10, %v2543_v16 }
 0x6e3   : > { %2614 = vst [vmem:[%s4823_s10 + $0x8] sm:$0xff] %v2598_v42 }
 0x6e6   : > { %v2545_v5 = vpop.f32.mrf.mxu3 }
 0x6e7   : > { %v2546_v61 = vadd.f32 %v4817_v38, %v2545_v5 }
 0x6e9   : > { %v2599_v12 = vadd.f32 %v2583_v31, %v2546_v61 }
 0x6eb   : > { %2615 = vst [vmem:[%s4823_s10 + $0x10] sm:$0xff] %v2599_v12 }
 0x6ee   : > { %v2547_v0 = vpop.f32.mrf.mxu3 }
 0x6ef   : > { %v2548_v36 = vadd.f32 %v4817_v38, %v2547_v0 }
 0x6f1   : > { %v2600_v3 = vadd.f32 %v2584_v44, %v2548_v36 }
 0x6f3   : > { %2616 = vst [vmem:[%s4823_s10 + $0x18] sm:$0xff] %v2600_v3 }
 0x703   : > { %v2428_v27 = vpop.permute.xlu2 %2427 }
 0x704   : > { %2461 = vst.msk [vmem:[#allocation5 + $0x78] sm:$0xff] %vm2445_vm14, %v2428_v27 }
 0x70b   : > { %v2477_v58 = vld [vmem:[#allocation5 + $0x78] sm:$0xff] }
 0x712   : > { %v2550_v51 = vpop.f32.mrf.mxu3 }
 0x713   : > { %v2551_v13 = vadd.f32 %v4817_v38, %v2550_v51  ;;  %v2426_v11 = vpop.permute.xlu1 %2425 }
 0x714   : > { %2460 = vst.msk [vmem:[#allocation5 + $0x70] sm:$0xff] %vm2445_vm14, %v2426_v11 }
 0x715   : > { %v2601_v63 = vadd.f32 %v2585_v34, %v2551_v13 }
 0x717   : > { %2617 = vst [vmem:[%s4823_s10 + $0x20] sm:$0xff] %v2601_v63 }
 0x71a   : > { %v2552_v33 = vpop.f32.mrf.mxu3 }
 0x71b   : > { %v2553_v24 = vadd.f32 %v4817_v38, %v2552_v33  ;;  %v2476_v6 = vld [vmem:[#allocation5 + $0x70] sm:$0xff] }
 0x71c   : > { %v2485_v29 = vpack.c.bf16 %v2477_v58, %v2476_v6 }
 0x71d   : > { %v2602_v14 = vadd.f32 %v2586_v56, %v2553_v24 }
 0x71e   : > { %3035 = vmatmul.msk.bf16.gmra.mxu3 %vm2506_vm6, %v2485_v29 }
 0x71f   : > { %2618 = vst [vmem:[%s4823_s10 + $0x28] sm:$0xff] %v2602_v14 }
 0x722   : > { %v2555_v39 = vpop.f32.mrf.mxu3 }
 0x723   : > { %v2556_v21 = vadd.f32 %v4817_v38, %v2555_v39 }
 0x725   : > { %v2603_v23 = vadd.f32 %v2587_v17, %v2556_v21 }
 0x727   : > { %2619 = vst [vmem:[%s4823_s10 + $0x30] sm:$0xff] %v2603_v23 }
 0x72a   : > { %v2557_v55 = vpop.f32.mrf.mxu3 }
 0x72b   : > { %v2558_v35 = vadd.f32 %v4817_v38, %v2557_v55 }
 0x72d   : > { %v2604_v47 = vadd.f32 %v2588_v59, %v2558_v35 }
 0x72f   : > { %2620 = vst [vmem:[%s4823_s10 + $0x38] sm:$0xff] %v2604_v47 }
 0x732   : > { %v2560_v50 = vpop.f32.mrf.mxu3 }
 0x733   : > { %v2561_v52 = vadd.f32 %v4817_v38, %v2560_v50 }
 0x735   : > { %v2605_v53 = vadd.f32 %v2589_v7, %v2561_v52 }
 0x737   : > { %2621 = vst [vmem:[%s4823_s10 + $0x40] sm:$0xff] %v2605_v53 }
 0x73a   : > { %v2562_v25 = vpop.f32.mrf.mxu3 }
 0x73b   : > { %v2563_v2 = vadd.f32 %v4817_v38, %v2562_v25 }
 0x73d   : > { %v2606_v57 = vadd.f32 %v2590_v45, %v2563_v2 }
 0x73f   : > { %2622 = vst [vmem:[%s4823_s10 + $0x48] sm:$0xff] %v2606_v57 }
 0x742   : > { %v2565_v30 = vpop.f32.mrf.mxu3 }
 0x743   : > { %v2566_v49 = vadd.f32 %v4817_v38, %v2565_v30 }
 0x745   : > { %v2607_v32 = vadd.f32 %v2591_v26, %v2566_v49 }
 0x747   : > { %2623 = vst [vmem:[%s4823_s10 + $0x50] sm:$0xff] %v2607_v32 }
 0x74a   : > { %v2567_v20 = vpop.f32.mrf.mxu3 }
 0x74b   : > { %v2568_v15 = vadd.f32 %v4817_v38, %v2567_v20 }
 0x74d   : > { %v2608_v43 = vadd.f32 %v2592_v40, %v2568_v15 }
 0x74f   : > { %2624 = vst [vmem:[%s4823_s10 + $0x58] sm:$0xff] %v2608_v43 }
 0x752   : > { %v2570_v18 = vpop.f32.mrf.mxu3 }
 0x753   : > { %v2571_v28 = vadd.f32 %v4817_v38, %v2570_v18 }
 0x755   : > { %v2609_v22 = vadd.f32 %v2593_v8, %v2571_v28 }
 0x757   : > { %2625 = vst [vmem:[%s4823_s10 + $0x60] sm:$0xff] %v2609_v22 }
 0x75a   : > { %v2572_v54 = vpop.f32.mrf.mxu3 }
 0x75b   : > { %v2573_v9 = vadd.f32 %v4817_v38, %v2572_v54 }
 0x75d   : > { %v2610_v19 = vadd.f32 %v2594_v41, %v2573_v9 }
 0x75f   : > { %2626 = vst [vmem:[%s4823_s10 + $0x68] sm:$0xff] %v2610_v19 }
 0x7a1   : > { %v2575_v1 = vpop.f32.mrf.mxu3 }
 0x7a2   : > { %v2576_v46 = vadd.f32 %v4817_v38, %v2575_v1 }
 0x7a4   : > { %v2611_v60 = vadd.f32 %v2595_v4, %v2576_v46 }
 0x7a6   : > { %2627 = vst [vmem:[%s4823_s10 + $0x70] sm:$0xff] %v2611_v60 }
 0x7a9   : > { %v2577_v48 = vpop.f32.mrf.mxu3 }
 0x7aa   : > { %v2578_v62 = vadd.f32 %v4817_v38, %v2577_v48 }
 0x7ac   : > { %v2612_v10 = vadd.f32 %v2596_v37, %v2578_v62 }
 0x7ae   : > { %2628 = vst [vmem:[%s4823_s10 + $0x78] sm:$0xff] %v2612_v10 }
 0x7af   : > { %3532 = shalt.err (!%p3529_p0)
}
 0x7b0   : > { %s3610_s11 = smov 128   ;;  %s3611_s18 = smov 8  }
 0x7b1   : > { %3131 = dma.vmem_to_hbm [thread:$0]  (%p3736_p3), %s2645_s27, 2048, %s2647_s1, %s2630_s3, %s3610_s11, %s3610_s11, %s3611_s18  }
 0x7b2 PF: > { %s2661_s28 = sand.u32 1, %s3575_s21   ;;  %p3148_p5 = pnand %p2770_p9, %p3696_p6 }
 0x7b3   : > { %s2662_s9 = scalar_lea.sflag [#allocation8], %s2661_s28 }
 0x7b4   : > { %p3149_p7 = pneg %p3148_p5 }
 0x7b6   : > { %3570 = dma.done.wait (%p3149_p7), %s2662_s9, 2048  }
 0x7b7   : > { %3572 = vsyncadd (%p3149_p7), %s2662_s9, 4294965248  ;;  %s24_s26 = sadd.s32 1, %s3595_s26   ;;  %s4946_s17 = sld [smem:[#allocation19_spill]] }
 0x7b8   : > { %p21_p10 = scmp.ge.s32.totalorder %s24_s26, 4   ;;  %s4947_s21 = smov %s3579_s22 }
 0x7b9   : > { %s4948_s22 = smov %s3583_s23  ;;  %s4949_s23 = smov %s3752_s30 }
 0x7ba   : > { %s4950_s24 = smov %s3591_s25  ;;  %23 = sbr.rel (!%p21_p10) target bundleno = 12 (0xc), region = 110 }
 0x7bd   : > { %s4951_s25 = smov %s4946_s17 }
 0x7bf   :  { %2668 = vsyncpa [#allocation7], 1 }
 0x7c0   :  { %2670 = vsyncpa [#allocation7 + $0x1], 1 }
 0x7c1   :  { %2671 = vsyncpa [#allocation10], 1 }
 0x7c2   :  { %2672 = vsyncpa [#allocation13], 1 }
 0x7c3   :  { %2673 = vsyncpa [#allocation8], 1 }
 0x7c4   :  { %2675 = vsyncpa [#allocation8 + $0x1], 1 }

</bundles_post_ra>
